<compile_context>
chip_gen: v6e
topology: v6e:2x2x1
jax: 0.10.0
libtpu: 0.0.40
codegen_flags: <defaults>
</compile_context>

<pallas_src>
import functools

import jax
import jax.numpy as jnp
import numpy as np
from jax.experimental import pallas as pl
from jax.experimental.pallas import tpu as pltpu

_HI = jax.lax.Precision.HIGHEST  # used only by the pure-JAX reference


# ----------------------------------------------------------------------------- kernels
def _conv1_radix3x3_kernel(x_ref, w1_ref, sc1_ref, sh1_ref, wr_ref, scr_ref, shr_ref,
                           xm_ref, u_ref, hpad_ref, *,
                           H, W, cin_g, cout_g, conv_groups, pad_top, per_group):
    """Fused: 1x1 conv + BN + ReLU  ->  grouped 3x3 conv (pad=1) + BN + ReLU.

    One batch image per grid step.  h1 never leaves VMEM; the 3x3 taps are shifted
    slice reads from a row-padded VMEM scratch (no HBM tap materialization).
    """
    HW = H * W

    # ---- stage 1: 1x1 conv + folded BN + ReLU (stays in VMEM) --------------------
    h1 = jnp.dot(x_ref[0], w1_ref[...], preferred_element_type=jnp.float32)
    h1 = jnp.maximum(h1 * sc1_ref[...] + sh1_ref[...], 0.0)

    # zero-padded (flattened-row) copy of h1: pad rows give the H-boundary zeros
    hpad_ref[...] = jnp.zeros_like(hpad_ref)
    hpad_ref[pl.ds(pad_top, HW), :] = h1

    # ---- stage 2: grouped 3x3 conv as 9 shifted matmuls ---------------------------
    cout_total = conv_groups * cout_g
    if per_group:
        accs = [jnp.zeros((HW, cout_g), jnp.float32) for _ in range(conv_groups)]
    else:
        accs = [jnp.zeros((HW, cout_total), jnp.float32)]

    t = 0
    for dy in range(3):
        for dx in range(3):
            off = (dy - 1) * W + (dx - 1)
            sh = hpad_ref[pl.ds(pad_top + off, HW), :]
            if dx == 0:                      # source column x-1 must exist
                sh = sh * xm_ref[0]
            elif dx == 2:                    # source column x+1 must exist
                sh = sh * xm_ref[1]
            shb = sh.astype(jnp.bfloat16)
            if per_group:
                for g in range(conv_groups):
                    accs[g] = accs[g] + jnp.dot(
                        shb[:, g * cin_g:(g + 1) * cin_g],
                        wr_ref[t * conv_groups + g],
                        preferred_element_type=jnp.float32)
            else:
                # block-diagonal dense weights (cheap when gw <= MXU width)
                accs[0] = accs[0] + jnp.dot(shb, wr_ref[t],
                                            preferred_element_type=jnp.float32)
            t += 1

    u = accs[0] if len(accs) == 1 else jnp.concatenate(accs, axis=-1)
    u = jnp.maximum(u * scr_ref[...] + shr_ref[...], 0.0)
    u_ref[0] = u.astype(u_ref.dtype)         # single lane-dense store


def _attention_kernel(u_ref, wa1_ref, sca_ref, sha_ref, wa2_ref, ba2_ref, s_ref, *,
                      radix, C):
    """Fused attention path on the few pixels the module actually consumes:
    gap-sum over radix splits -> 1x1 conv (+bias folded) + BN + ReLU ->
    1x1 conv (+bias) -> per-pixel radix softmax."""
    u = u_ref[0].astype(jnp.float32)                 # (Qb, radix*C)
    gap = u[:, 0:C]
    for r in range(1, radix):
        gap = gap + u[:, r * C:(r + 1) * C]
    h = jnp.dot(gap.astype(jnp.bfloat16), wa1_ref[...],
                preferred_element_type=jnp.float32)
    h = jnp.maximum(h * sca_ref[...] + sha_ref[...], 0.0)
    att = jnp.dot(h.astype(jnp.bfloat16), wa2_ref[...],
                  preferred_element_type=jnp.float32) + ba2_ref[...]
    parts = [att[:, r * C:(r + 1) * C] for r in range(radix)]
    m = parts[0]
    for pt in parts[1:]:
        m = jnp.maximum(m, pt)
    exps = [jnp.exp(pt - m) for pt in parts]
    den = exps[0]
    for e in exps[1:]:
        den = den + e
    inv = 1.0 / den
    for r in range(radix):
        s_ref[0, :, r * C:(r + 1) * C] = (exps[r] * inv).astype(s_ref.dtype)


def _final_fused_kernel(u_ref, a_ref, res_ref, wf_ref, scf_ref, shf_ref, o_ref, *,
                        radix, C):
    """Per (batch, row-tile): weighted radix split-sum, final 1x1 conv, folded BN,
    residual add and ReLU - fully fused, lane-dense single store."""
    u = u_ref[0].astype(jnp.float32)                 # (TR, radix*C)
    a = a_ref[0]                                     # (radix, C)
    sa = a[0:1, :] * u[:, 0:C]
    for r in range(1, radix):
        sa = sa + a[r:r + 1, :] * u[:, r * C:(r + 1) * C]
    y = jnp.dot(sa.astype(jnp.bfloat16), wf_ref[...],
                preferred_element_type=jnp.float32)
    y = y * scf_ref[...] + shf_ref[...] + res_ref[0]
    o_ref[0] = jnp.maximum(y, 0.0).astype(o_ref.dtype)


# --------------------------------------------------------------------------- wrappers
def _fold_bn(gamma, beta, mean, var, conv_bias=None, eps=1e-5):
    scale = gamma / jnp.sqrt(var + eps)
    shift = beta - mean * scale
    if conv_bias is not None:
        shift = shift + conv_bias * scale
    return scale[None, :].astype(jnp.float32), shift[None, :].astype(jnp.float32)


def _pick_row_tile(HW, cap=512):
    """Largest multiple-of-8 divisor of HW that is <= cap and yields >=2 row tiles."""
    if HW <= 8:
        return HW
    half = max(8, (HW // 2) - ((HW // 2) % 8))
    cap = min(cap, half)
    for cand in range(cap, 7, -8):
        if HW % cand == 0:
            return cand
    return HW


def bottleneck_forward(x_nchw, p, *, channels, radix=2, groups=1, bottleneck_width=64):
    assert groups == 1, \
        "TODO(synk): rSoftMax plumbing implemented for groups == 1 (module default)"
    B, Cin, H, W = x_nchw.shape
    gw = int(channels * (bottleneck_width / 64.0)) * groups      # group_width
    HW = H * W
    conv_groups = groups * radix
    cin_g = gw // conv_groups
    cout_g = (gw * radix) // conv_groups
    inter = p['att1_w'].shape[0]
    Cout = p['convf_w'].shape[0]
    assert Cin == Cout, "identity residual requires in_channels == channels*expansion"

    f32, bf16 = jnp.float32, jnp.bfloat16

    # NCHW -> NHWC-flat (one transpose at each end of the block; keep NHWC end-to-end
    # when chaining blocks to avoid these glue passes).
    x_nhwc = jnp.transpose(x_nchw, (0, 2, 3, 1)).astype(f32)
    res3 = x_nhwc.reshape(B, HW, Cin)                 # f32 identity residual
    x3 = res3.astype(bf16)                            # bf16 activations for the MXU

    # --- folded BN params + bf16 weights ------------------------------------------
    w1 = jnp.transpose(p['conv1_w'][:, :, 0, 0]).astype(bf16)            # (Cin, gw)
    sc1, sh1 = _fold_bn(p['bn1_g'], p['bn1_b'], p['bn1_m'], p['bn1_v'])
    scr, shr = _fold_bn(p['bnr_g'], p['bnr_b'], p['bnr_m'], p['bnr_v'])
    wa1 = jnp.transpose(p['att1_w'][:, :, 0, 0]).astype(bf16)            # (gw, inter)
    sca, sha = _fold_bn(p['bna_g'], p['bna_b'], p['bna_m'], p['bna_v'],
                        conv_bias=p['att1_b'])
    wa2 = jnp.transpose(p['att2_w'][:, :, 0, 0]).astype(bf16)            # (inter, r*gw)
    ba2 = p['att2_b'][None, :].astype(f32)
    wf = jnp.transpose(p['convf_w'][:, :, 0, 0]).astype(bf16)            # (gw, Cout)
    scf, shf = _fold_bn(p['bnf_g'], p['bnf_b'], p['bnf_m'], p['bnf_v'])

    # grouped 3x3 weights: per-group matrices when K is MXU-sized, otherwise a
    # block-diagonal dense matrix per tap (no wasted MXU when gw <= MXU width).
    per_group = cin_g >= 128
    if per_group:
        wr = jnp.transpose(p['radix_w'].reshape(conv_groups, cout_g, cin_g, 3, 3),
                           (3, 4, 0, 2, 1)).reshape(9 * conv_groups, cin_g, cout_g)
    else:
        wr = jnp.zeros((9, gw, gw * radix), f32)
        for g in range(conv_groups):
            blk = p['radix_w'][g * cout_g:(g + 1) * cout_g]              # (cout_g,cin_g,3,3)
            blk = jnp.transpose(blk, (2, 3, 1, 0)).reshape(9, cin_g, cout_g)
            wr = wr.at[:, g * cin_g:(g + 1) * cin_g,
                       g * cout_g:(g + 1) * cout_g].set(blk)
    wr = wr.astype(bf16)

    # W-boundary masks for the dx=0 / dx=2 taps (H-boundary = scratch zero pad rows)
    xx = jnp.arange(HW, dtype=jnp.int32) % W
    xmask = jnp.stack([(xx > 0), (xx < W - 1)], axis=0).astype(f32)[:, :, None]  # (2,HW,1)

    pad_top = ((W + 1 + 7) // 8) * 8                  # sublane-aligned pad rows

    # --- fused ConvBlock + radix 3x3 conv + BN + ReLU (one image per block) --------
    u = pl.pallas_call(
        functools.partial(_conv1_radix3x3_kernel, H=H, W=W, cin_g=cin_g, cout_g=cout_g,
                          conv_groups=conv_groups, pad_top=pad_top, per_group=per_group),
        out_shape=jax.ShapeDtypeStruct((B, HW, radix * gw), bf16),
        grid=(B,),
        in_specs=[
            pl.BlockSpec((1, HW, Cin), lambda b: (b, 0, 0)),
            pl.BlockSpec(w1.shape, lambda b: (0, 0)),
            pl.BlockSpec((1, gw), lambda b: (0, 0)),
            pl.BlockSpec((1, gw), lambda b: (0, 0)),
            pl.BlockSpec(wr.shape, lambda b: (0, 0, 0)),
            pl.BlockSpec((1, radix * gw), lambda b: (0, 0)),
            pl.BlockSpec((1, radix * gw), lambda b: (0, 0)),
            pl.BlockSpec((2, HW, 1), lambda b: (0, 0, 0)),
        ],
        out_specs=pl.BlockSpec((1, HW, radix * gw), lambda b: (b, 0, 0)),
        scratch_shapes=[pltpu.VMEM((2 * pad_top + HW, gw), jnp.float32)],
        compiler_params=pltpu.CompilerParams(
            dimension_semantics=("parallel",),
            vmem_limit_bytes=32 * 1024 * 1024),
    )(x3, w1, sc1, sh1, wr, scr, shr, xmask)          # (B, HW, radix*gw) bf16

    # --- fused attention path, only on the pixels the module consumes --------------
    # (torch's .view(B,-1,1,1) + split/zip truncation uses only the first radix*gw
    #  flattened (radix-major, c, h, w) softmax values per batch)
    Q = min(HW, radix * gw)
    Qb = min(HW, ((Q + 7) // 8) * 8)
    s_small = pl.pallas_call(
        functools.partial(_attention_kernel, radix=radix, C=gw),
        out_shape=jax.ShapeDtypeStruct((B, Qb, radix * gw), f32),
        grid=(B,),
        in_specs=[
            pl.BlockSpec((1, Qb, radix * gw), lambda b: (b, 0, 0)),
            pl.BlockSpec((gw, inter), lambda b: (0, 0)),
            pl.BlockSpec((1, inter), lambda b: (0, 0)),
            pl.BlockSpec((1, inter), lambda b: (0, 0)),
            pl.BlockSpec((inter, radix * gw), lambda b: (0, 0)),
            pl.BlockSpec((1, radix * gw), lambda b: (0, 0)),
        ],
        out_specs=pl.BlockSpec((1, Qb, radix * gw), lambda b: (b, 0, 0)),
        compiler_params=pltpu.CompilerParams(dimension_semantics=("parallel",)),
    )(u, wa1, sca, sha, wa2, ba2)                     # (B, Qb, radix*gw)

    # index plumbing reproducing the truncation (no compute): element j of the torch
    # flat order lives at pixel j % HW, channel j // HW (radix block 0).
    idx = jnp.arange(radix * gw)
    a = s_small[:, idx % HW, idx // HW].reshape(B, radix, gw)    # (B, radix, gw) f32

    # --- weighted split-sum + final 1x1 conv + BN + residual + ReLU (fused) --------
    TR = _pick_row_tile(HW)
    y3 = pl.pallas_call(
        functools.partial(_final_fused_kernel, radix=radix, C=gw),
        out_shape=jax.ShapeDtypeStruct((B, HW, Cout), f32),
        grid=(B, HW // TR),
        in_specs=[
            pl.BlockSpec((1, TR, radix * gw), lambda b, t: (b, t, 0)),
            pl.BlockSpec((1, radix, gw), lambda b, t: (b, 0, 0)),
            pl.BlockSpec((1, TR, Cin), lambda b, t: (b, t, 0)),
            pl.BlockSpec((gw, Cout), lambda b, t: (0, 0)),
            pl.BlockSpec((1, Cout), lambda b, t: (0, 0)),
            pl.BlockSpec((1, Cout), lambda b, t: (0, 0)),
        ],
        out_specs=pl.BlockSpec((1, TR, Cout), lambda b, t: (b, t, 0)),
        compiler_params=pltpu.CompilerParams(
            dimension_semantics=("parallel", "parallel"),
            vmem_limit_bytes=32 * 1024 * 1024),
    )(u, a, res3, wf, scf, shf)

    return jnp.transpose(y3.reshape(B, H, W, Cout), (0, 3, 1, 2))   # back to NCHW


# ------------------------------------------------------------------ pure-JAX reference
def reference_forward(x, p, *, channels, radix=2, groups=1, bottleneck_width=64, eps=1e-5):
    gw = int(channels * (bottleneck_width / 64.0)) * groups
    dn = ('NCHW', 'OIHW', 'NCHW')

    def bn(y, g, b, m, v):
        sc = g / jnp.sqrt(v + eps)
        return y * sc[None, :, None, None] + (b - m * sc)[None, :, None, None]

    conv = functools.partial(jax.lax.conv_general_dilated,
                             dimension_numbers=dn, precision=_HI)

    y = conv(x, p['conv1_w'], (1, 1), 'VALID')
    y = jnp.maximum(bn(y, p['bn1_g'], p['bn1_b'], p['bn1_m'], p['bn1_v']), 0.0)

    u = conv(y, p['radix_w'], (1, 1), ((1, 1), (1, 1)), feature_group_count=groups * radix)
    u = jnp.maximum(bn(u, p['bnr_g'], p['bnr_b'], p['bnr_m'], p['bnr_v']), 0.0)

    splits = [u[:, r * gw:(r + 1) * gw] for r in range(radix)]
    gap = sum(splits)

    h = conv(gap, p['att1_w'], (1, 1), 'VALID') + p['att1_b'][None, :, None, None]
    h = jnp.maximum(bn(h, p['bna_g'], p['bna_b'], p['bna_m'], p['bna_v']), 0.0)
    att = conv(h, p['att2_w'], (1, 1), 'VALID') + p['att2_b'][None, :, None, None]

    B = x.shape[0]
    s = att.reshape(B, groups, radix, -1)
    s = jnp.swapaxes(s, 1, 2)
    s = jax.nn.softmax(s, axis=1)
    s = s.reshape(B, -1, 1, 1)
    att_maps = [s[:, i * gw:(i + 1) * gw] for i in range(radix)]
    out = sum(am * sp for am, sp in zip(att_maps, splits))

    y = conv(out, p['convf_w'], (1, 1), 'VALID')
    y = bn(y, p['bnf_g'], p['bnf_b'], p['bnf_m'], p['bnf_v'])
    return jnp.maximum(y + x, 0.0)


# ---------------------------------------------------------------------------- driver
if __name__ == "__main__":
    B, H, W = 2, 16, 16
    channels = 4
    radix, groups, bottleneck_width, expansion = 2, 1, 64, 4
    in_channels = channels * expansion            # so identity residual is valid
    gw = int(channels * (bottleneck_width / 64.0)) * groups
    inter = max(32, gw * radix // 4)
    conv_groups = groups * radix

    key = jax.random.PRNGKey(0)
    ks = jax.random.split(key, 24)

    def nrm(k, shape, s=0.1):
        return s * jax.random.normal(k, shape, jnp.float32)

    def uni(k, shape):
        return jax.random.uniform(k, shape, jnp.float32, 0.5, 1.5)

    params = {
        'conv1_w': nrm(ks[0], (gw, in_channels, 1, 1)),
        'bn1_g': uni(ks[1], (gw,)), 'bn1_b': nrm(ks[2], (gw,)),
        'bn1_m': nrm(ks[3], (gw,)), 'bn1_v': uni(ks[4], (gw,)),
        'radix_w': nrm(ks[5], (gw * radix, gw // conv_groups, 3, 3)),
        'bnr_g': uni(ks[6], (gw * radix,)), 'bnr_b': nrm(ks[7], (gw * radix,)),
        'bnr_m': nrm(ks[8], (gw * radix,)), 'bnr_v': uni(ks[9], (gw * radix,)),
        'att1_w': nrm(ks[10], (inter, gw, 1, 1)), 'att1_b': nrm(ks[11], (inter,)),
        'bna_g': uni(ks[12], (inter,)), 'bna_b': nrm(ks[13], (inter,)),
        'bna_m': nrm(ks[14], (inter,)), 'bna_v': uni(ks[15], (inter,)),
        'att2_w': nrm(ks[16], (gw * radix, inter, 1, 1)), 'att2_b': nrm(ks[17], (gw * radix,)),
        'convf_w': nrm(ks[18], (channels * expansion, gw, 1, 1)),
        'bnf_g': uni(ks[19], (channels * expansion,)), 'bnf_b': nrm(ks[20], (channels * expansion,)),
        'bnf_m': nrm(ks[21], (channels * expansion,)), 'bnf_v': uni(ks[22], (channels * expansion,)),
    }

    x = jax.random.normal(ks[23], (B, in_channels, H, W), jnp.float32)

    out = bottleneck_forward(x, params, channels=channels, radix=radix,
                             groups=groups, bottleneck_width=bottleneck_width)
    out = jax.block_until_ready(out)
    assert out.shape == (B, in_channels, H, W)

    ref = reference_forward(x, params, channels=channels, radix=radix,
                            groups=groups, bottleneck_width=bottleneck_width)
    # tolerance accounts for bf16 matmul inputs (f32 accumulation) in the kernels
    np.testing.assert_allclose(np.asarray(out), np.asarray(ref), atol=2e-2, rtol=2e-2)

    print("KERNEL_OK")
</pallas_src>

<mosaic_0001>
module attributes {stable_mosaic.version = 11 : i64} {
  func.func @_conv1_radix3x3_kernel(%arg0: i32, %arg1: memref<1x256x16xbf16, #tpu.memory_space<vmem>>, %arg2: memref<16x4xbf16, #tpu.memory_space<vmem>>, %arg3: memref<1x4xf32, #tpu.memory_space<vmem>>, %arg4: memref<1x4xf32, #tpu.memory_space<vmem>>, %arg5: memref<9x4x8xbf16, #tpu.memory_space<vmem>>, %arg6: memref<1x8xf32, #tpu.memory_space<vmem>>, %arg7: memref<1x8xf32, #tpu.memory_space<vmem>>, %arg8: memref<2x256x1xf32, #tpu.memory_space<vmem>>, %arg9: memref<1x256x8xbf16, #tpu.memory_space<vmem>>, %arg10: memref<304x4xf32, #tpu.memory_space<vmem>>) attributes {dimension_semantics = [#tpu.dimension_semantics<parallel>], iteration_bounds = array<i64: 2>, scalar_prefetch = 0 : i64, scratch_operands = 1 : i64, tpu.core_type = #tpu.core_type<tc>, window_params = [{transform_indices = @transform_0, window_bounds = array<i64: 1, 256, 16>}, {pipeline_mode = #tpu.pipeline_mode<synchronous>, transform_indices = @transform_1, window_bounds = array<i64: 16, 4>}, {pipeline_mode = #tpu.pipeline_mode<synchronous>, transform_indices = @transform_2, window_bounds = array<i64: 1, 4>}, {pipeline_mode = #tpu.pipeline_mode<synchronous>, transform_indices = @transform_3, window_bounds = array<i64: 1, 4>}, {pipeline_mode = #tpu.pipeline_mode<synchronous>, transform_indices = @transform_4, window_bounds = array<i64: 9, 4, 8>}, {pipeline_mode = #tpu.pipeline_mode<synchronous>, transform_indices = @transform_5, window_bounds = array<i64: 1, 8>}, {pipeline_mode = #tpu.pipeline_mode<synchronous>, transform_indices = @transform_6, window_bounds = array<i64: 1, 8>}, {pipeline_mode = #tpu.pipeline_mode<synchronous>, transform_indices = @transform_7, window_bounds = array<i64: 2, 256, 1>}, {transform_indices = @transform_8, window_bounds = array<i64: 1, 256, 8>}]} {
    %c0 = arith.constant 0 : index
    %c0_0 = arith.constant 0 : index
    %c0_1 = arith.constant 0 : index
    %0 = vector.load %arg1[%c0, %c0_0, %c0_1] : memref<1x256x16xbf16, #tpu.memory_space<vmem>>, vector<1x256x16xbf16>
    %1 = vector.shape_cast %0 : vector<1x256x16xbf16> to vector<256x16xbf16>
    %c0_2 = arith.constant 0 : index
    %c0_3 = arith.constant 0 : index
    %2 = vector.load %arg2[%c0_2, %c0_3] : memref<16x4xbf16, #tpu.memory_space<vmem>>, vector<16x4xbf16>
    %cst = arith.constant dense<0.000000e+00> : vector<256x4xf32>
    %3 = tpu.matmul %1, %2, %cst {dimension_numbers = #tpu.dot_dimension_numbers<[1], [0], [0], [1], [0, 0, 1, 1], [], []>} : vector<256x16xbf16>, vector<16x4xbf16>, vector<256x4xf32> -> vector<256x4xf32>
    %c0_4 = arith.constant 0 : index
    %c0_5 = arith.constant 0 : index
    %4 = vector.load %arg3[%c0_4, %c0_5] : memref<1x4xf32, #tpu.memory_space<vmem>>, vector<1x4xf32>
    %5 = vector.broadcast %4 : vector<1x4xf32> to vector<256x4xf32>
    %6 = arith.mulf %3, %5 : vector<256x4xf32>
    %c0_6 = arith.constant 0 : index
    %c0_7 = arith.constant 0 : index
    %7 = vector.load %arg4[%c0_6, %c0_7] : memref<1x4xf32, #tpu.memory_space<vmem>>, vector<1x4xf32>
    %8 = vector.broadcast %7 : vector<1x4xf32> to vector<256x4xf32>
    %9 = arith.addf %6, %8 : vector<256x4xf32>
    %cst_8 = arith.constant 0.000000e+00 : f32
    %10 = vector.broadcast %cst_8 : f32 to vector<256x4xf32>
    %11 = arith.maximumf %9, %10 : vector<256x4xf32>
    %cst_9 = arith.constant 0.000000e+00 : f32
    %12 = vector.broadcast %cst_9 : f32 to vector<304x4xf32>
    %c0_10 = arith.constant 0 : index
    %c0_11 = arith.constant 0 : index
    %13 = vector.load %arg10[%c0_10, %c0_11] : memref<304x4xf32, #tpu.memory_space<vmem>>, vector<304x4xf32>
    tpu.vector_store %arg10[%c0_10, %c0_11], %12 {strides = array<i32>} : memref<304x4xf32, #tpu.memory_space<vmem>>, vector<304x4xf32>,
    %c24 = arith.constant 24 : index
    %c0_12 = arith.constant 0 : index
    %14 = vector.load %arg10[%c24, %c0_12] : memref<304x4xf32, #tpu.memory_space<vmem>>, vector<256x4xf32>
    tpu.vector_store %arg10[%c24, %c0_12], %11 {strides = array<i32>} : memref<304x4xf32, #tpu.memory_space<vmem>>, vector<256x4xf32>,
    %cst_13 = arith.constant 0.000000e+00 : f32
    %15 = vector.broadcast %cst_13 : f32 to vector<256x8xf32>
    %c7 = arith.constant 7 : index
    %c0_14 = arith.constant 0 : index
    %16 = vector.load %arg10[%c7, %c0_14] : memref<304x4xf32, #tpu.memory_space<vmem>>, vector<256x4xf32>
    %c0_15 = arith.constant 0 : index
    %c0_16 = arith.constant 0 : index
    %c0_17 = arith.constant 0 : index
    %17 = vector.load %arg8[%c0_15, %c0_16, %c0_17] : memref<2x256x1xf32, #tpu.memory_space<vmem>>, vector<1x256x1xf32>
    %18 = vector.shape_cast %17 : vector<1x256x1xf32> to vector<256x1xf32>
    %19 = vector.broadcast %18 : vector<256x1xf32> to vector<256x4xf32>
    %20 = arith.mulf %16, %19 : vector<256x4xf32>
    %21 = arith.truncf %20 : vector<256x4xf32> to vector<256x4xbf16>
    %c0_18 = arith.constant 0 : index
    %c0_19 = arith.constant 0 : index
    %c0_20 = arith.constant 0 : index
    %22 = vector.load %arg5[%c0_18, %c0_19, %c0_20] : memref<9x4x8xbf16, #tpu.memory_space<vmem>>, vector<1x4x8xbf16>
    %23 = vector.shape_cast %22 : vector<1x4x8xbf16> to vector<4x8xbf16>
    %cst_21 = arith.constant dense<0.000000e+00> : vector<256x8xf32>
    %24 = tpu.matmul %21, %23, %cst_21 {dimension_numbers = #tpu.dot_dimension_numbers<[1], [0], [0], [1], [0, 0, 1, 1], [], []>} : vector<256x4xbf16>, vector<4x8xbf16>, vector<256x8xf32> -> vector<256x8xf32>
    %25 = arith.addf %15, %24 : vector<256x8xf32>
    %c8 = arith.constant 8 : index
    %c0_22 = arith.constant 0 : index
    %26 = vector.load %arg10[%c8, %c0_22] : memref<304x4xf32, #tpu.memory_space<vmem>>, vector<256x4xf32>
    %27 = arith.truncf %26 : vector<256x4xf32> to vector<256x4xbf16>
    %c1 = arith.constant 1 : index
    %c0_23 = arith.constant 0 : index
    %c0_24 = arith.constant 0 : index
    %28 = vector.load %arg5[%c1, %c0_23, %c0_24] : memref<9x4x8xbf16, #tpu.memory_space<vmem>>, vector<1x4x8xbf16>
    %29 = vector.shape_cast %28 : vector<1x4x8xbf16> to vector<4x8xbf16>
    %cst_25 = arith.constant dense<0.000000e+00> : vector<256x8xf32>
    %30 = tpu.matmul %27, %29, %cst_25 {dimension_numbers = #tpu.dot_dimension_numbers<[1], [0], [0], [1], [0, 0, 1, 1], [], []>} : vector<256x4xbf16>, vector<4x8xbf16>, vector<256x8xf32> -> vector<256x8xf32>
    %31 = arith.addf %25, %30 : vector<256x8xf32>
    %c9 = arith.constant 9 : index
    %c0_26 = arith.constant 0 : index
    %32 = vector.load %arg10[%c9, %c0_26] : memref<304x4xf32, #tpu.memory_space<vmem>>, vector<256x4xf32>
    %c1_27 = arith.constant 1 : index
    %c0_28 = arith.constant 0 : index
    %c0_29 = arith.constant 0 : index
    %33 = vector.load %arg8[%c1_27, %c0_28, %c0_29] : memref<2x256x1xf32, #tpu.memory_space<vmem>>, vector<1x256x1xf32>
    %34 = vector.shape_cast %33 : vector<1x256x1xf32> to vector<256x1xf32>
    %35 = vector.broadcast %34 : vector<256x1xf32> to vector<256x4xf32>
    %36 = arith.mulf %32, %35 : vector<256x4xf32>
    %37 = arith.truncf %36 : vector<256x4xf32> to vector<256x4xbf16>
    %c2 = arith.constant 2 : index
    %c0_30 = arith.constant 0 : index
    %c0_31 = arith.constant 0 : index
    %38 = vector.load %arg5[%c2, %c0_30, %c0_31] : memref<9x4x8xbf16, #tpu.memory_space<vmem>>, vector<1x4x8xbf16>
    %39 = vector.shape_cast %38 : vector<1x4x8xbf16> to vector<4x8xbf16>
    %cst_32 = arith.constant dense<0.000000e+00> : vector<256x8xf32>
    %40 = tpu.matmul %37, %39, %cst_32 {dimension_numbers = #tpu.dot_dimension_numbers<[1], [0], [0], [1], [0, 0, 1, 1], [], []>} : vector<256x4xbf16>, vector<4x8xbf16>, vector<256x8xf32> -> vector<256x8xf32>
    %41 = arith.addf %31, %40 : vector<256x8xf32>
    %c23 = arith.constant 23 : index
    %c0_33 = arith.constant 0 : index
    %42 = vector.load %arg10[%c23, %c0_33] : memref<304x4xf32, #tpu.memory_space<vmem>>, vector<256x4xf32>
    %c0_34 = arith.constant 0 : index
    %c0_35 = arith.constant 0 : index
    %c0_36 = arith.constant 0 : index
    %43 = vector.load %arg8[%c0_34, %c0_35, %c0_36] : memref<2x256x1xf32, #tpu.memory_space<vmem>>, vector<1x256x1xf32>
    %44 = vector.shape_cast %43 : vector<1x256x1xf32> to vector<256x1xf32>
    %45 = vector.broadcast %44 : vector<256x1xf32> to vector<256x4xf32>
    %46 = arith.mulf %42, %45 : vector<256x4xf32>
    %47 = arith.truncf %46 : vector<256x4xf32> to vector<256x4xbf16>
    %c3 = arith.constant 3 : index
    %c0_37 = arith.constant 0 : index
    %c0_38 = arith.constant 0 : index
    %48 = vector.load %arg5[%c3, %c0_37, %c0_38] : memref<9x4x8xbf16, #tpu.memory_space<vmem>>, vector<1x4x8xbf16>
    %49 = vector.shape_cast %48 : vector<1x4x8xbf16> to vector<4x8xbf16>
    %cst_39 = arith.constant dense<0.000000e+00> : vector<256x8xf32>
    %50 = tpu.matmul %47, %49, %cst_39 {dimension_numbers = #tpu.dot_dimension_numbers<[1], [0], [0], [1], [0, 0, 1, 1], [], []>} : vector<256x4xbf16>, vector<4x8xbf16>, vector<256x8xf32> -> vector<256x8xf32>
    %51 = arith.addf %41, %50 : vector<256x8xf32>
    %c24_40 = arith.constant 24 : index
    %c0_41 = arith.constant 0 : index
    %52 = vector.load %arg10[%c24_40, %c0_41] : memref<304x4xf32, #tpu.memory_space<vmem>>, vector<256x4xf32>
    %53 = arith.truncf %52 : vector<256x4xf32> to vector<256x4xbf16>
    %c4 = arith.constant 4 : index
    %c0_42 = arith.constant 0 : index
    %c0_43 = arith.constant 0 : index
    %54 = vector.load %arg5[%c4, %c0_42, %c0_43] : memref<9x4x8xbf16, #tpu.memory_space<vmem>>, vector<1x4x8xbf16>
    %55 = vector.shape_cast %54 : vector<1x4x8xbf16> to vector<4x8xbf16>
    %cst_44 = arith.constant dense<0.000000e+00> : vector<256x8xf32>
    %56 = tpu.matmul %53, %55, %cst_44 {dimension_numbers = #tpu.dot_dimension_numbers<[1], [0], [0], [1], [0, 0, 1, 1], [], []>} : vector<256x4xbf16>, vector<4x8xbf16>, vector<256x8xf32> -> vector<256x8xf32>
    %57 = arith.addf %51, %56 : vector<256x8xf32>
    %c25 = arith.constant 25 : index
    %c0_45 = arith.constant 0 : index
    %58 = vector.load %arg10[%c25, %c0_45] : memref<304x4xf32, #tpu.memory_space<vmem>>, vector<256x4xf32>
    %c1_46 = arith.constant 1 : index
    %c0_47 = arith.constant 0 : index
    %c0_48 = arith.constant 0 : index
    %59 = vector.load %arg8[%c1_46, %c0_47, %c0_48] : memref<2x256x1xf32, #tpu.memory_space<vmem>>, vector<1x256x1xf32>
    %60 = vector.shape_cast %59 : vector<1x256x1xf32> to vector<256x1xf32>
    %61 = vector.broadcast %60 : vector<256x1xf32> to vector<256x4xf32>
    %62 = arith.mulf %58, %61 : vector<256x4xf32>
    %63 = arith.truncf %62 : vector<256x4xf32> to vector<256x4xbf16>
    %c5 = arith.constant 5 : index
    %c0_49 = arith.constant 0 : index
    %c0_50 = arith.constant 0 : index
    %64 = vector.load %arg5[%c5, %c0_49, %c0_50] : memref<9x4x8xbf16, #tpu.memory_space<vmem>>, vector<1x4x8xbf16>
    %65 = vector.shape_cast %64 : vector<1x4x8xbf16> to vector<4x8xbf16>
    %cst_51 = arith.constant dense<0.000000e+00> : vector<256x8xf32>
    %66 = tpu.matmul %63, %65, %cst_51 {dimension_numbers = #tpu.dot_dimension_numbers<[1], [0], [0], [1], [0, 0, 1, 1], [], []>} : vector<256x4xbf16>, vector<4x8xbf16>, vector<256x8xf32> -> vector<256x8xf32>
    %67 = arith.addf %57, %66 : vector<256x8xf32>
    %c39 = arith.constant 39 : index
    %c0_52 = arith.constant 0 : index
    %68 = vector.load %arg10[%c39, %c0_52] : memref<304x4xf32, #tpu.memory_space<vmem>>, vector<256x4xf32>
    %c0_53 = arith.constant 0 : index
    %c0_54 = arith.constant 0 : index
    %c0_55 = arith.constant 0 : index
    %69 = vector.load %arg8[%c0_53, %c0_54, %c0_55] : memref<2x256x1xf32, #tpu.memory_space<vmem>>, vector<1x256x1xf32>
    %70 = vector.shape_cast %69 : vector<1x256x1xf32> to vector<256x1xf32>
    %71 = vector.broadcast %70 : vector<256x1xf32> to vector<256x4xf32>
    %72 = arith.mulf %68, %71 : vector<256x4xf32>
    %73 = arith.truncf %72 : vector<256x4xf32> to vector<256x4xbf16>
    %c6 = arith.constant 6 : index
    %c0_56 = arith.constant 0 : index
    %c0_57 = arith.constant 0 : index
    %74 = vector.load %arg5[%c6, %c0_56, %c0_57] : memref<9x4x8xbf16, #tpu.memory_space<vmem>>, vector<1x4x8xbf16>
    %75 = vector.shape_cast %74 : vector<1x4x8xbf16> to vector<4x8xbf16>
    %cst_58 = arith.constant dense<0.000000e+00> : vector<256x8xf32>
    %76 = tpu.matmul %73, %75, %cst_58 {dimension_numbers = #tpu.dot_dimension_numbers<[1], [0], [0], [1], [0, 0, 1, 1], [], []>} : vector<256x4xbf16>, vector<4x8xbf16>, vector<256x8xf32> -> vector<256x8xf32>
    %77 = arith.addf %67, %76 : vector<256x8xf32>
    %c40 = arith.constant 40 : index
    %c0_59 = arith.constant 0 : index
    %78 = vector.load %arg10[%c40, %c0_59] : memref<304x4xf32, #tpu.memory_space<vmem>>, vector<256x4xf32>
    %79 = arith.truncf %78 : vector<256x4xf32> to vector<256x4xbf16>
    %c7_60 = arith.constant 7 : index
    %c0_61 = arith.constant 0 : index
    %c0_62 = arith.constant 0 : index
    %80 = vector.load %arg5[%c7_60, %c0_61, %c0_62] : memref<9x4x8xbf16, #tpu.memory_space<vmem>>, vector<1x4x8xbf16>
    %81 = vector.shape_cast %80 : vector<1x4x8xbf16> to vector<4x8xbf16>
    %cst_63 = arith.constant dense<0.000000e+00> : vector<256x8xf32>
    %82 = tpu.matmul %79, %81, %cst_63 {dimension_numbers = #tpu.dot_dimension_numbers<[1], [0], [0], [1], [0, 0, 1, 1], [], []>} : vector<256x4xbf16>, vector<4x8xbf16>, vector<256x8xf32> -> vector<256x8xf32>
    %83 = arith.addf %77, %82 : vector<256x8xf32>
    %c41 = arith.constant 41 : index
    %c0_64 = arith.constant 0 : index
    %84 = vector.load %arg10[%c41, %c0_64] : memref<304x4xf32, #tpu.memory_space<vmem>>, vector<256x4xf32>
    %c1_65 = arith.constant 1 : index
    %c0_66 = arith.constant 0 : index
    %c0_67 = arith.constant 0 : index
    %85 = vector.load %arg8[%c1_65, %c0_66, %c0_67] : memref<2x256x1xf32, #tpu.memory_space<vmem>>, vector<1x256x1xf32>
    %86 = vector.shape_cast %85 : vector<1x256x1xf32> to vector<256x1xf32>
    %87 = vector.broadcast %86 : vector<256x1xf32> to vector<256x4xf32>
    %88 = arith.mulf %84, %87 : vector<256x4xf32>
    %89 = arith.truncf %88 : vector<256x4xf32> to vector<256x4xbf16>
    %c8_68 = arith.constant 8 : index
    %c0_69 = arith.constant 0 : index
    %c0_70 = arith.constant 0 : index
    %90 = vector.load %arg5[%c8_68, %c0_69, %c0_70] : memref<9x4x8xbf16, #tpu.memory_space<vmem>>, vector<1x4x8xbf16>
    %91 = vector.shape_cast %90 : vector<1x4x8xbf16> to vector<4x8xbf16>
    %cst_71 = arith.constant dense<0.000000e+00> : vector<256x8xf32>
    %92 = tpu.matmul %89, %91, %cst_71 {dimension_numbers = #tpu.dot_dimension_numbers<[1], [0], [0], [1], [0, 0, 1, 1], [], []>} : vector<256x4xbf16>, vector<4x8xbf16>, vector<256x8xf32> -> vector<256x8xf32>
    %93 = arith.addf %83, %92 : vector<256x8xf32>
    %c0_72 = arith.constant 0 : index
    %c0_73 = arith.constant 0 : index
    %94 = vector.load %arg6[%c0_72, %c0_73] : memref<1x8xf32, #tpu.memory_space<vmem>>, vector<1x8xf32>
    %95 = vector.broadcast %94 : vector<1x8xf32> to vector<256x8xf32>
    %96 = arith.mulf %93, %95 : vector<256x8xf32>
    %c0_74 = arith.constant 0 : index
    %c0_75 = arith.constant 0 : index
    %97 = vector.load %arg7[%c0_74, %c0_75] : memref<1x8xf32, #tpu.memory_space<vmem>>, vector<1x8xf32>
    %98 = vector.broadcast %97 : vector<1x8xf32> to vector<256x8xf32>
    %99 = arith.addf %96, %98 : vector<256x8xf32>
    %cst_76 = arith.constant 0.000000e+00 : f32
    %100 = vector.broadcast %cst_76 : f32 to vector<256x8xf32>
    %101 = arith.maximumf %99, %100 : vector<256x8xf32>
    %102 = arith.truncf %101 : vector<256x8xf32> to vector<256x8xbf16>
    %c0_77 = arith.constant 0 : index
    %c0_78 = arith.constant 0 : index
    %c0_79 = arith.constant 0 : index
    %103 = vector.load %arg9[%c0_77, %c0_78, %c0_79] : memref<1x256x8xbf16, #tpu.memory_space<vmem>>, vector<1x256x8xbf16>
    %104 = vector.shape_cast %103 : vector<1x256x8xbf16> to vector<256x8xbf16>
    %105 = vector.shape_cast %102 : vector<256x8xbf16> to vector<1x256x8xbf16>
    tpu.vector_store %arg9[%c0_77, %c0_78, %c0_79], %105 {strides = array<i32>} : memref<1x256x8xbf16, #tpu.memory_space<vmem>>, vector<1x256x8xbf16>,
    return
  }
  func.func @transform_0(%arg0: i32) -> (i32, i32, i32) {
    %c0_i32 = arith.constant 0 : i32
    %c0_i32_0 = arith.constant 0 : i32
    %c0_i32_1 = arith.constant 0 : i32
    return %arg0, %c0_i32, %c0_i32_0 : i32, i32, i32
  }
  func.func @transform_1(%arg0: i32) -> (i32, i32) {
    %c0_i32 = arith.constant 0 : i32
    %c0_i32_0 = arith.constant 0 : i32
    %c0_i32_1 = arith.constant 0 : i32
    return %c0_i32, %c0_i32_0 : i32, i32
  }
  func.func @transform_2(%arg0: i32) -> (i32, i32) {
    %c0_i32 = arith.constant 0 : i32
    %c0_i32_0 = arith.constant 0 : i32
    %c0_i32_1 = arith.constant 0 : i32
    return %c0_i32, %c0_i32_0 : i32, i32
  }
  func.func @transform_3(%arg0: i32) -> (i32, i32) {
    %c0_i32 = arith.constant 0 : i32
    %c0_i32_0 = arith.constant 0 : i32
    %c0_i32_1 = arith.constant 0 : i32
    return %c0_i32, %c0_i32_0 : i32, i32
  }
  func.func @transform_4(%arg0: i32) -> (i32, i32, i32) {
    %c0_i32 = arith.constant 0 : i32
    %c0_i32_0 = arith.constant 0 : i32
    %c0_i32_1 = arith.constant 0 : i32
    %c0_i32_2 = arith.constant 0 : i32
    return %c0_i32, %c0_i32_0, %c0_i32_1 : i32, i32, i32
  }
  func.func @transform_5(%arg0: i32) -> (i32, i32) {
    %c0_i32 = arith.constant 0 : i32
    %c0_i32_0 = arith.constant 0 : i32
    %c0_i32_1 = arith.constant 0 : i32
    return %c0_i32, %c0_i32_0 : i32, i32
  }
  func.func @transform_6(%arg0: i32) -> (i32, i32) {
    %c0_i32 = arith.constant 0 : i32
    %c0_i32_0 = arith.constant 0 : i32
    %c0_i32_1 = arith.constant 0 : i32
    return %c0_i32, %c0_i32_0 : i32, i32
  }
  func.func @transform_7(%arg0: i32) -> (i32, i32, i32) {
    %c0_i32 = arith.constant 0 : i32
    %c0_i32_0 = arith.constant 0 : i32
    %c0_i32_1 = arith.constant 0 : i32
    %c0_i32_2 = arith.constant 0 : i32
    return %c0_i32, %c0_i32_0, %c0_i32_1 : i32, i32, i32
  }
  func.func @transform_8(%arg0: i32) -> (i32, i32, i32) {
    %c0_i32 = arith.constant 0 : i32
    %c0_i32_0 = arith.constant 0 : i32
    %c0_i32_1 = arith.constant 0 : i32
    return %arg0, %c0_i32, %c0_i32_0 : i32, i32, i32
  }
}

</mosaic_0001>

<bundles_post_ra>
// kernel: tpu_custom_call.1
= control target key start
LH: loop header
LB: loop body
LE: loop exit
PB: predicated region body
PF: predicated region fallthrough
CT: control target
= control target key end

     0   :  { %s5204_s27 = smov 0   ;;  %s7248_s0 = inlined_call_operand.vmem [shape: bf16[2,256,16], index: 0, kind: input, shape index: {}]   ;;  %s7249_s1 = inlined_call_operand.vmem [shape: bf16[16,4], index: 1, kind: input, shape index: {}]   ;;  %s7250_s2 = inlined_call_operand.vmem [shape: f32[1,4], index: 2, kind: input, shape index: {}]   ;;  %s7251_s3 = inlined_call_operand.vmem [shape: f32[1,4], index: 3, kind: input, shape index: {}]   ;;  %s7252_s4 = inlined_call_operand.vmem [shape: bf16[9,4,8], index: 4, kind: input, shape index: {}]   ;;  %s7253_s5 = inlined_call_operand.vmem [shape: f32[1,8], index: 5, kind: input, shape index: {}]   ;;  %s7254_s6 = inlined_call_operand.vmem [shape: f32[1,8], index: 6, kind: input, shape index: {}]   ;;  %s7255_s7 = inlined_call_operand.vmem [shape: f32[2,256,1], index: 7, kind: input, shape index: {}]   ;;  %s7256_s8 = inlined_call_operand.vmem [shape: bf16[2,256,8], index: 8, kind: output, shape index: {}]  }
   0x1 LB: > { %s4303_s28 = sadd.s32 4294967295, %s5155_s27   ;;  %p4307_p0 = scmp.ge.s32.totalorder %s5155_s27, 1  ;;  %s5155_s27 = sphi %s5204_s27, %s18_s27  }
   0x2   : > { %p262_p1 = scmp.lt.s32.totalorder %s5155_s27, 3 }
   0x4   : > { %p263_p2 = pnand %p4307_p0, %p262_p1 }
   0x6   : > { %266 = sbr.rel (%p263_p2) target bundleno = 757 (0x2f5), region = 52 }
   0xb   : > { %v852_v0 = vld [vmem:[%s7255_s7 + $0x10] sm:$0xff]  ;;  %v850_v1 = vld [vmem:[%s7255_s7] sm:$0xff]  ;;  %p296_p3 = scmp.lt.s32.totalorder %s4303_s28, 1  ;;  %v5157_v2 = vmov 0   ;;  %vm747_vm0 = vcmask 31744   ;;  %v853_v4 = vld [vmem:[%s7255_s7 + $0x18] sm:$0xff] }
   0xc   : > { %5131 = vset.pattern.permute.xlu1 %v5157_v2  ;;  %5130 = vset.pattern.permute.xlu0 %v5157_v2  ;;  %v5132_v3 = vld [vmem:[%s7249_s1] sm:$0xff]   ;;  %v851_v5 = vld [vmem:[%s7255_s7 + $0x8] sm:$0xff]  ;;  %v5158_v6 = vmov 0.0   ;;  %vm427_vm1 = vcmask 130048   ;;  %v4383_v12 = vld [vmem:[%s7255_s7 + $0x118] sm:$0xff]  ;;  %vm1189_vm2 = vcmask 1041408  }
   0xd   : > { %894 = vperm.xlu1 %5131, %v852_v0   ;;  %884 = vperm.xlu0 %5130, %v850_v1   ;;  %s7775_s28 = smov (!%p296_p3, %s4303_s28), 1  ;;  %748 = vst.msk [vmem:[#allocation2] sm:$0xff] %vm747_vm0, %v5158_v6  ;;  %749 = vst.msk [vmem:[#allocation2 + $0x8] sm:$0xff] %vm747_vm0, %v5158_v6  ;;  %v4381_v7 = vld [vmem:[%s7255_s7 + $0x108] sm:$0xff]  ;;  %v4380_v8 = vld [vmem:[%s7255_s7 + $0x100] sm:$0xff]  ;;  %vm4215_vm3 = vcmask 60416  }
   0xe   : > { %750 = vst.msk [vmem:[#allocation2 + $0x10] sm:$0xff] %vm747_vm0, %v5158_v6  ;;  %751 = vst.msk [vmem:[#allocation2 + $0x18] sm:$0xff] %vm747_vm0, %v5158_v6  ;;  %4771 = vmatprep.subr.bf16.mxu0 %v5132_v3  ;;  %s4567_s17 = sshll.u32 %s7775_s28, 7  ;;  %v4382_v13 = vld [vmem:[%s7255_s7 + $0x110] sm:$0xff]  ;;  %v855_v15 = vld [vmem:[%s7255_s7 + $0x28] sm:$0xff] }
   0xf   : > { %752 = vst.msk [vmem:[#allocation2 + $0x20] sm:$0xff] %vm747_vm0, %v5158_v6  ;;  %753 = vst.msk [vmem:[#allocation2 + $0x28] sm:$0xff] %vm747_vm0, %v5158_v6  ;;  %4772 = vmatpush3.bf16.msra.mxu0 %v5132_v3  ;;  %s5273_s20 = scalar_lea.vmem %s7248_s0, %s4567_s17  ;;  %v854_v16 = vld [vmem:[%s7255_s7 + $0x20] sm:$0xff]  ;;  %v857_v18 = vld [vmem:[%s7255_s7 + $0x38] sm:$0xff]  ;;  %s7008_s19 = scalar_lea.vmem %s7256_s8, %s4567_s17 }
  0x10   : > { %754 = vst.msk [vmem:[#allocation2 + $0x30] sm:$0xff] %vm747_vm0, %v5158_v6  ;;  %755 = vst.msk [vmem:[#allocation2 + $0x38] sm:$0xff] %vm747_vm0, %v5158_v6  ;;  %v5133_v9 = vld [vmem:[%s5273_s20] sm:$0xff]   ;;  %v5134_v10 = vld [vmem:[%s5273_s20 + $0x8] sm:$0xff]  }
  0x11   : > { %756 = vst.msk [vmem:[#allocation2 + $0x40] sm:$0xff] %vm747_vm0, %v5158_v6  ;;  %757 = vst.msk [vmem:[#allocation2 + $0x48] sm:$0xff] %vm747_vm0, %v5158_v6  ;;  %899 = vperm.xlu1 %5131, %v853_v4   ;;  %889 = vperm.xlu0 %5130, %v851_v5   ;;  %v5135_v11 = vld [vmem:[%s5273_s20 + $0x10] sm:$0xff]   ;;  %v5136_v14 = vld [vmem:[%s5273_s20 + $0x18] sm:$0xff]  }
  0x12   : > { %758 = vst.msk [vmem:[#allocation2 + $0x50] sm:$0xff] %vm747_vm0, %v5158_v6  ;;  %759 = vst.msk [vmem:[#allocation2 + $0x58] sm:$0xff] %vm747_vm0, %v5158_v6  ;;  %4773 = vmatprep.mubr.msk.bf16.mxu0 %vm427_vm1, %v5133_v9  ;;  %v5137_v17 = vld [vmem:[%s5273_s20 + $0x20] sm:$0xff]   ;;  %v856_v19 = vld [vmem:[%s7255_s7 + $0x30] sm:$0xff] }
  0x13   : > { %760 = vst.msk [vmem:[#allocation2 + $0x60] sm:$0xff] %vm747_vm0, %v5158_v6  ;;  %761 = vst.msk [vmem:[#allocation2 + $0x68] sm:$0xff] %vm747_vm0, %v5158_v6  ;;  %4774 = vmatmul.mubr.msk.bf16.vlgmr.msra.gmra.mxu0 %vm427_vm1, %v5134_v10  ;;  %v5138_v20 = vld [vmem:[%s5273_s20 + $0x28] sm:$0xff]   ;;  %v4384_v22 = vld [vmem:[%s7255_s7 + $0x120] sm:$0xff] }
  0x14   : > { %762 = vst.msk [vmem:[#allocation2 + $0x70] sm:$0xff] %vm747_vm0, %v5158_v6  ;;  %763 = vst.msk [vmem:[#allocation2 + $0x78] sm:$0xff] %vm747_vm0, %v5158_v6  ;;  %4777 = vmatprep.mubr.msk.bf16.mxu0 %vm427_vm1, %v5135_v11  ;;  %v4385_v21 = vld [vmem:[%s7255_s7 + $0x128] sm:$0xff]  ;;  %v5139_v23 = vld [vmem:[%s5273_s20 + $0x30] sm:$0xff]  }
  0x15   : > { %764 = vst.msk [vmem:[#allocation2 + $0x80] sm:$0xff] %vm747_vm0, %v5158_v6  ;;  %765 = vst.msk [vmem:[#allocation2 + $0x88] sm:$0xff] %vm747_vm0, %v5158_v6  ;;  %1638 = vperm.xlu1 %5131, %v4381_v7   ;;  %1633 = vperm.xlu0 %5130, %v4380_v8   ;;  %v4387_v24 = vld [vmem:[%s7255_s7 + $0x138] sm:$0xff]  ;;  %v4386_v25 = vld [vmem:[%s7255_s7 + $0x130] sm:$0xff] }
  0x16   : > { %766 = vst.msk [vmem:[#allocation2 + $0x90] sm:$0xff] %vm747_vm0, %v5158_v6  ;;  %767 = vst.msk [vmem:[#allocation2 + $0x98] sm:$0xff] %vm747_vm0, %v5158_v6  ;;  %v5140_v26 = vld [vmem:[%s5273_s20 + $0x38] sm:$0xff]   ;;  %v859_v27 = vld [vmem:[%s7255_s7 + $0x48] sm:$0xff] }
  0x17   : > { %768 = vst.msk [vmem:[#allocation2 + $0xa0] sm:$0xff] %vm747_vm0, %v5158_v6  ;;  %769 = vst.msk [vmem:[#allocation2 + $0xa8] sm:$0xff] %vm747_vm0, %v5158_v6  ;;  %v858_v28 = vld [vmem:[%s7255_s7 + $0x40] sm:$0xff]  ;;  %v861_v30 = vld [vmem:[%s7255_s7 + $0x58] sm:$0xff] }
  0x18   : > { %770 = vst.msk [vmem:[#allocation2 + $0xb0] sm:$0xff] %vm747_vm0, %v5158_v6  ;;  %771 = vst.msk [vmem:[#allocation2 + $0xb8] sm:$0xff] %vm747_vm0, %v5158_v6  ;;  %v5141_v29 = vld [vmem:[%s5273_s20 + $0x40] sm:$0xff]   ;;  %v860_v31 = vld [vmem:[%s7255_s7 + $0x50] sm:$0xff] }
  0x19   : > { %772 = vst.msk [vmem:[#allocation2 + $0xc0] sm:$0xff] %vm747_vm0, %v5158_v6  ;;  %773 = vst.msk [vmem:[#allocation2 + $0xc8] sm:$0xff] %vm747_vm0, %v5158_v6  ;;  %1648 = vperm.xlu1 %5131, %v4383_v12   ;;  %1643 = vperm.xlu0 %5130, %v4382_v13   ;;  %v5142_v32 = vld [vmem:[%s5273_s20 + $0x48] sm:$0xff]   ;;  %v4388_v34 = vld [vmem:[%s7255_s7 + $0x140] sm:$0xff] }
  0x1a   : > { %774 = vst.msk [vmem:[#allocation2 + $0xd0] sm:$0xff] %vm747_vm0, %v5158_v6  ;;  %775 = vst.msk [vmem:[#allocation2 + $0xd8] sm:$0xff] %vm747_vm0, %v5158_v6  ;;  %v4389_v33 = vld [vmem:[%s7255_s7 + $0x148] sm:$0xff]  ;;  %v5143_v35 = vld [vmem:[%s5273_s20 + $0x50] sm:$0xff]  }
  0x1b   : > { %776 = vst.msk [vmem:[#allocation2 + $0xe0] sm:$0xff] %vm747_vm0, %v5158_v6  ;;  %777 = vst.msk [vmem:[#allocation2 + $0xe8] sm:$0xff] %vm747_vm0, %v5158_v6  ;;  %4778 = vmatmul.mubr.msk.bf16.gmra.mxu0 %vm427_vm1, %v5136_v14  ;;  %v4391_v36 = vld [vmem:[%s7255_s7 + $0x158] sm:$0xff]  ;;  %v4390_v37 = vld [vmem:[%s7255_s7 + $0x150] sm:$0xff] }
  0x1c   : > { %778 = vst.msk [vmem:[#allocation2 + $0xf0] sm:$0xff] %vm747_vm0, %v5158_v6  ;;  %779 = vst.msk [vmem:[#allocation2 + $0xf8] sm:$0xff] %vm747_vm0, %v5158_v6  ;;  %4781 = vmatprep.mubr.msk.bf16.mxu0 %vm427_vm1, %v5137_v17  ;;  %v5144_v38 = vld [vmem:[%s5273_s20 + $0x58] sm:$0xff]   ;;  %v863_v39 = vld [vmem:[%s7255_s7 + $0x68] sm:$0xff] }
  0x1d   : > { %780 = vst.msk [vmem:[#allocation2 + $0x100] sm:$0xff] %vm747_vm0, %v5158_v6  ;;  %781 = vst.msk [vmem:[#allocation2 + $0x108] sm:$0xff] %vm747_vm0, %v5158_v6  ;;  %909 = vperm.xlu1 %5131, %v855_v15   ;;  %904 = vperm.xlu0 %5130, %v854_v16   ;;  %v862_v40 = vld [vmem:[%s7255_s7 + $0x60] sm:$0xff]  ;;  %v865_v42 = vld [vmem:[%s7255_s7 + $0x78] sm:$0xff] }
  0x1e   : > { %782 = vst.msk [vmem:[#allocation2 + $0x110] sm:$0xff] %vm747_vm0, %v5158_v6  ;;  %783 = vst.msk [vmem:[#allocation2 + $0x118] sm:$0xff] %vm747_vm0, %v5158_v6  ;;  %v5145_v41 = vld [vmem:[%s5273_s20 + $0x60] sm:$0xff]   ;;  %v864_v43 = vld [vmem:[%s7255_s7 + $0x70] sm:$0xff] }
  0x1f   : > { %784 = vst.msk [vmem:[#allocation2 + $0x120] sm:$0xff] %vm747_vm0, %v5158_v6  ;;  %785 = vst.msk [vmem:[#allocation2 + $0x128] sm:$0xff] %vm747_vm0, %v5158_v6  ;;  %v5146_v44 = vld [vmem:[%s5273_s20 + $0x68] sm:$0xff]   ;;  %v4392_v46 = vld [vmem:[%s7255_s7 + $0x160] sm:$0xff] }
  0x20   : > { %v4393_v45 = vld [vmem:[%s7255_s7 + $0x168] sm:$0xff]  ;;  %v5147_v47 = vld [vmem:[%s5273_s20 + $0x70] sm:$0xff]   ;;  %v4395_v48 = vld [vmem:[%s7255_s7 + $0x178] sm:$0xff] }
  0x21   : > { %919 = vperm.xlu1 %5131, %v857_v18   ;;  %914 = vperm.xlu0 %5130, %v856_v19   ;;  %v4394_v49 = vld [vmem:[%s7255_s7 + $0x170] sm:$0xff]  ;;  %v5148_v50 = vld [vmem:[%s5273_s20 + $0x78] sm:$0xff]   ;;  %v867_v51 = vld [vmem:[%s7255_s7 + $0x88] sm:$0xff] }
  0x22   : > { %v866_v52 = vld [vmem:[%s7255_s7 + $0x80] sm:$0xff]  ;;  %v869_v53 = vld [vmem:[%s7255_s7 + $0x98] sm:$0xff]  ;;  %v868_v54 = vld [vmem:[%s7255_s7 + $0x90] sm:$0xff] }
  0x23   : > { %4782 = vmatmul.mubr.msk.bf16.gmra.mxu0 %vm427_vm1, %v5138_v20  ;;  %v4397_v55 = vld [vmem:[%s7255_s7 + $0x188] sm:$0xff]  ;;  %v4396_v56 = vld [vmem:[%s7255_s7 + $0x180] sm:$0xff]  ;;  %v4399_v57 = vld [vmem:[%s7255_s7 + $0x198] sm:$0xff] }
  0x24   : > { %4785 = vmatprep.mubr.msk.bf16.mxu0 %vm427_vm1, %v5139_v23  ;;  %v4398_v58 = vld [vmem:[%s7255_s7 + $0x190] sm:$0xff]  ;;  %v871_v59 = vld [vmem:[%s7255_s7 + $0xa8] sm:$0xff]  ;;  %v870_v60 = vld [vmem:[%s7255_s7 + $0xa0] sm:$0xff] }
  0x25   : > { %1658 = vperm.xlu1 %5131, %v4385_v21   ;;  %1653 = vperm.xlu0 %5130, %v4384_v22   ;;  %v873_v61 = vld [vmem:[%s7255_s7 + $0xb8] sm:$0xff]  ;;  %v872_v62 = vld [vmem:[%s7255_s7 + $0xb0] sm:$0xff]  ;;  %v4401_v63 = vld [vmem:[%s7255_s7 + $0x1a8] sm:$0xff] }
  0x26   : > { %v4400_v0 = vld [vmem:[%s7255_s7 + $0x1a0] sm:$0xff]  ;;  %v4403_v1 = vld [vmem:[%s7255_s7 + $0x1b8] sm:$0xff]  ;;  %v4402_v2 = vld [vmem:[%s7255_s7 + $0x1b0] sm:$0xff] }
  0x27   : > { %v4347_v3 = vld [vmem:[%s7252_s4 + $0x2] sm:$0x3]  ;;  %v1091_v5 = vld [vmem:[#allocation2 + $0x8] sm:$0xff]  ;;  %v1092_v6 = vld [vmem:[#allocation2 + $0x10] sm:$0xff] }
  0x28   : > { %5111 = vmatprep.subr.msk.bf16.mxu1 %vm1189_vm2, %v4347_v3  ;;  %v1191_v4 = vsel %vm1189_vm2, %v4347_v3, 0  ;;  %v1090_v7 = vld [vmem:[%s7252_s4] sm:$0x3]  ;;  %v1123_v8 = vpack.c.bf16 %v1092_v6, %v1091_v5  ;;  %v875_v9 = vld [vmem:[%s7255_s7 + $0xc8] sm:$0xff]  ;;  %v877_v12 = vld [vmem:[%s7255_s7 + $0xd8] sm:$0xff] }
  0x29   : > { %1668 = vperm.xlu1 %5131, %v4387_v24   ;;  %1663 = vperm.xlu0 %5130, %v4386_v25   ;;  %v874_v10 = vld [vmem:[%s7255_s7 + $0xc0] sm:$0xff]  ;;  %v1403_v11 = vsel %vm1189_vm2, %v1090_v7, 0  ;;  %v876_v13 = vld [vmem:[%s7255_s7 + $0xd0] sm:$0xff]  ;;  %v4405_v14 = vld [vmem:[%s7255_s7 + $0x1c8] sm:$0xff] }
  0x2a   : > { %4806 = vmatpush3.bf16.msra.mxu1 %v1191_v4  ;;  %5112 = vmatprep.subr.msk.bf16.mxu0 %vm1189_vm2, %v1090_v7  ;;  %v4404_v15 = vld [vmem:[%s7255_s7 + $0x1c0] sm:$0xff]  ;;  %v4407_v17 = vld [vmem:[%s7255_s7 + $0x1d8] sm:$0xff]  ;;  %v4406_v18 = vld [vmem:[%s7255_s7 + $0x1d0] sm:$0xff] }
  0x2b   : > { %4786 = vmatmul.mubr.msk.bf16.gmra.mxu0 %vm427_vm1, %v5140_v26  ;;  %4807 = vmatprep.mubr.msk.bf16.mxu1 %vm747_vm0, %v1123_v8  ;;  %v5471_v16 = vld [vmem:[%s7252_s4 + $0x4] sm:$0x3]  ;;  %v879_v19 = vld [vmem:[%s7255_s7 + $0xe8] sm:$0xff]  ;;  %v881_v21 = vld [vmem:[%s7255_s7 + $0xf8] sm:$0xff] }
  0x2c   : > { %4789 = vmatprep.mubr.msk.bf16.mxu0 %vm427_vm1, %v5141_v29  ;;  %4840 = vmatpush3.bf16.msra.mxu0 %v1403_v11  ;;  %v878_v20 = vld [vmem:[%s7255_s7 + $0xe0] sm:$0xff]  ;;  %v880_v22 = vld [vmem:[%s7255_s7 + $0xf0] sm:$0xff]  ;;  %v4409_v23 = vld [vmem:[%s7255_s7 + $0x1e8] sm:$0xff] }
  0x2d   : > { %929 = vperm.xlu1 %5131, %v859_v27   ;;  %924 = vperm.xlu0 %5130, %v858_v28   ;;  %v4408_v24 = vld [vmem:[%s7255_s7 + $0x1e0] sm:$0xff]  ;;  %v4411_v25 = vld [vmem:[%s7255_s7 + $0x1f8] sm:$0xff]  ;;  %v4410_v26 = vld [vmem:[%s7255_s7 + $0x1f0] sm:$0xff] }
  0x2e   : > { %5113 = vmatprep.subr.msk.bf16.mxu1 %vm1189_vm2, %v5471_v16  ;;  %v818_v29 = vld [vmem:[#allocation2 + $0x7] sm:$0xff]  ;;  %v5594_v7 = vld [vmem:[%s7250_s2] ss:$0 sm:$0xff] }
  0x2f   : > { %v5603_v11 = vld [vmem:[%s7251_s3] ss:$0 sm:$0xff] }
  0x31   : > { %939 = vperm.xlu1 %5131, %v861_v30   ;;  %934 = vperm.xlu0 %5130, %v860_v31   ;;  %v819_v30 = vld [vmem:[#allocation2 + $0xf] sm:$0xff] }
  0x33   : > { %4790 = vmatmul.mubr.msk.bf16.gmra.mxu0 %vm427_vm1, %v5142_v32 }
  0x34   : > { %4793 = vmatprep.mubr.msk.bf16.mxu0 %vm427_vm1, %v5143_v35 }
  0x35   : > { %1678 = vperm.xlu1 %5131, %v4389_v33   ;;  %1673 = vperm.xlu0 %5130, %v4388_v34  }
  0x39   : > { %1688 = vperm.xlu1 %5131, %v4391_v36   ;;  %1683 = vperm.xlu0 %5130, %v4390_v37  }
  0x3b   : > { %4794 = vmatmul.mubr.msk.bf16.gmra.mxu0 %vm427_vm1, %v5144_v38 }
  0x3c   : > { %4797 = vmatprep.mubr.msk.bf16.mxu0 %vm427_vm1, %v5145_v41 }
  0x3d   : > { %949 = vperm.xlu1 %5131, %v863_v39   ;;  %944 = vperm.xlu0 %5130, %v862_v40  }
  0x41   : > { %959 = vperm.xlu1 %5131, %v865_v42   ;;  %954 = vperm.xlu0 %5130, %v864_v43  }
  0x43   : > { %4798 = vmatmul.mubr.msk.bf16.gmra.mxu0 %vm427_vm1, %v5146_v44 }
  0x44   : > { %4801 = vmatprep.mubr.msk.bf16.mxu0 %vm427_vm1, %v5147_v47 }
  0x45   : > { %1698 = vperm.xlu1 %5131, %v4393_v45   ;;  %1693 = vperm.xlu0 %5130, %v4392_v46  }
  0x49   : > { %1708 = vperm.xlu1 %5131, %v4395_v48   ;;  %1703 = vperm.xlu0 %5130, %v4394_v49  }
  0x4b   : > { %4802 = vmatmul.mubr.msk.bf16.gmra.mxu0 %vm427_vm1, %v5148_v50  ;;  %v5547_v50 = vld [vmem:[%s7252_s4 + $0x6] sm:$0x3] }
  0x4c   : > { %5114 = vmatprep.subr.msk.bf16.mxu0 %vm1189_vm2, %v5547_v50 }
  0x4d   : > { %969 = vperm.xlu1 %5131, %v867_v51   ;;  %964 = vperm.xlu0 %5130, %v866_v52  }
  0x51   : > { %979 = vperm.xlu1 %5131, %v869_v53   ;;  %974 = vperm.xlu0 %5130, %v868_v54  }
  0x55   : > { %1718 = vperm.xlu1 %5131, %v4397_v55   ;;  %1713 = vperm.xlu0 %5130, %v4396_v56  }
  0x59   : > { %1728 = vperm.xlu1 %5131, %v4399_v57   ;;  %1723 = vperm.xlu0 %5130, %v4398_v58  }
  0x5d   : > { %989 = vperm.xlu1 %5131, %v871_v59   ;;  %984 = vperm.xlu0 %5130, %v870_v60  }
  0x61   : > { %999 = vperm.xlu1 %5131, %v873_v61   ;;  %994 = vperm.xlu0 %5130, %v872_v62  }
  0x65   : > { %1738 = vperm.xlu1 %5131, %v4401_v63   ;;  %1733 = vperm.xlu0 %5130, %v4400_v0  }
  0x69   : > { %1748 = vperm.xlu1 %5131, %v4403_v1   ;;  %1743 = vperm.xlu0 %5130, %v4402_v2  }
  0x6d   : > { %1009 = vperm.xlu1 %5131, %v875_v9   ;;  %1004 = vperm.xlu0 %5130, %v874_v10  }
  0x71   : > { %1019 = vperm.xlu1 %5131, %v877_v12   ;;  %1014 = vperm.xlu0 %5130, %v876_v13  }
  0x75   : > { %1758 = vperm.xlu1 %5131, %v4405_v14   ;;  %1753 = vperm.xlu0 %5130, %v4404_v15  }
  0x79   : > { %1768 = vperm.xlu1 %5131, %v4407_v17   ;;  %1763 = vperm.xlu0 %5130, %v4406_v18  }
  0x7d   : > { %1029 = vperm.xlu1 %5131, %v879_v19   ;;  %1024 = vperm.xlu0 %5130, %v878_v20  }
  0x81   : > { %1039 = vperm.xlu1 %5131, %v881_v21   ;;  %1034 = vperm.xlu0 %5130, %v880_v22  }
  0x85   : > { %1778 = vperm.xlu1 %5131, %v4409_v23   ;;  %1773 = vperm.xlu0 %5130, %v4408_v24  }
  0x88   : > { %v5505_v27 = vpop.permute.xlu1 %894  ;;  %v5507_v28 = vpop.permute.xlu0 %884 }
  0x89   : > { %7404 = vst [vmem:[#allocation3_spill] sm:$0xff] %v5505_v27  ;;  %7405 = vst [vmem:[#allocation4_spill] sm:$0xff] %v5507_v28  ;;  %1788 = vperm.xlu1 %5131, %v4411_v25   ;;  %1783 = vperm.xlu0 %5130, %v4410_v26   ;;  %v1042_v31 = vmul.f32 %v5507_v28, %v818_v29 }
  0x8c   : > { %v5510_v32 = vpop.permute.xlu1 %899  ;;  %v5512_v33 = vpop.permute.xlu0 %889 }
  0x8d   : > { %7406 = vst [vmem:[#allocation5_spill] sm:$0xff] %v5510_v32  ;;  %7407 = vst [vmem:[#allocation6_spill] sm:$0xff] %v5512_v33  ;;  %v1043_v34 = vmul.f32 %v5512_v33, %v819_v30 }
  0x8f   : > { %v1074_v35 = vpack.c.bf16 %v1043_v34, %v1042_v31 }
  0x90   : > { %v5515_v36 = vpop.permute.xlu1 %1638  ;;  %v5517_v37 = vpop.permute.xlu0 %1633 }
  0x91   : > { %7408 = vst [vmem:[#allocation7_spill] sm:$0xff] %v5515_v36  ;;  %7409 = vst [vmem:[#allocation8_spill] sm:$0xff] %v5517_v37  ;;  %4841 = vmatprep.mubr.msk.bf16.mxu0 %vm747_vm0, %v1074_v35 }
  0x94   : > { %v5520_v38 = vpop.permute.xlu1 %1648  ;;  %v5522_v39 = vpop.permute.xlu0 %1643 }
  0x95   : > { %7410 = vst [vmem:[#allocation9_spill] sm:$0xff] %v5520_v38  ;;  %7411 = vst [vmem:[#allocation10_spill] sm:$0xff] %v5522_v39 }
  0x98   : > { %v5524_v40 = vpop.permute.xlu1 %909  ;;  %v5526_v41 = vpop.permute.xlu0 %904 }
  0x99   : > { %7412 = vst [vmem:[#allocation11_spill] sm:$0xff] %v5524_v40  ;;  %7413 = vst [vmem:[#allocation12_spill] sm:$0xff] %v5526_v41 }
  0x9c   : > { %v5528_v42 = vpop.permute.xlu1 %919  ;;  %v5530_v43 = vpop.permute.xlu0 %914 }
  0x9d   : > { %7414 = vst [vmem:[#allocation13_spill] sm:$0xff] %v5528_v42  ;;  %7415 = vst [vmem:[#allocation14_spill] sm:$0xff] %v5530_v43 }
  0xa0   : > { %v5532_v44 = vpop.permute.xlu1 %1658  ;;  %v5534_v45 = vpop.permute.xlu0 %1653 }
  0xa1   : > { %7416 = vst [vmem:[#allocation15_spill] sm:$0xff] %v5532_v44  ;;  %7417 = vst [vmem:[#allocation16_spill] sm:$0xff] %v5534_v45 }
  0xa4   : > { %v5536_v46 = vpop.permute.xlu1 %1668  ;;  %v5538_v47 = vpop.permute.xlu0 %1663 }
  0xa5   : > { %7418 = vst [vmem:[#allocation17_spill] sm:$0xff] %v5536_v46  ;;  %7419 = vst [vmem:[#allocation18_spill] sm:$0xff] %v5538_v47 }
  0xa8   : > { %v5540_v48 = vpop.permute.xlu1 %929  ;;  %v5542_v49 = vpop.permute.xlu0 %924 }
  0xa9   : > { %7420 = vst [vmem:[#allocation19_spill] sm:$0xff] %v5540_v48  ;;  %7421 = vst [vmem:[#allocation20_spill] sm:$0xff] %v5542_v49 }
  0xac   : > { %v5551_v51 = vpop.permute.xlu1 %939  ;;  %v5553_v52 = vpop.permute.xlu0 %934 }
  0xad   : > { %7422 = vst [vmem:[#allocation21_spill] sm:$0xff] %v5551_v51  ;;  %7423 = vst [vmem:[#allocation22_spill] sm:$0xff] %v5553_v52 }
  0xb0   : > { %v5555_v53 = vpop.permute.xlu1 %1678  ;;  %v5557_v54 = vpop.permute.xlu0 %1673 }
  0xb1   : > { %7424 = vst [vmem:[#allocation23_spill] sm:$0xff] %v5555_v53  ;;  %7425 = vst [vmem:[#allocation24_spill] sm:$0xff] %v5557_v54 }
  0xb4   : > { %v5559_v55 = vpop.permute.xlu1 %1688  ;;  %v5561_v56 = vpop.permute.xlu0 %1683 }
  0xb5   : > { %7426 = vst [vmem:[#allocation25_spill] sm:$0xff] %v5559_v55  ;;  %7427 = vst [vmem:[#allocation26_spill] sm:$0xff] %v5561_v56 }
  0xb8   : > { %v5563_v57 = vpop.permute.xlu1 %949  ;;  %v5565_v58 = vpop.permute.xlu0 %944 }
  0xb9   : > { %7428 = vst [vmem:[#allocation27_spill] sm:$0xff] %v5563_v57  ;;  %7429 = vst [vmem:[#allocation28_spill] sm:$0xff] %v5565_v58 }
  0xbc   : > { %v5567_v59 = vpop.permute.xlu1 %959  ;;  %v5569_v60 = vpop.permute.xlu0 %954 }
  0xbd   : > { %7430 = vst [vmem:[#allocation29_spill] sm:$0xff] %v5567_v59  ;;  %7431 = vst [vmem:[#allocation30_spill] sm:$0xff] %v5569_v60 }
  0xc0   : > { %v5571_v61 = vpop.permute.xlu1 %1698  ;;  %v5573_v62 = vpop.permute.xlu0 %1693 }
  0xc1   : > { %7432 = vst [vmem:[#allocation31_spill] sm:$0xff] %v5571_v61  ;;  %7433 = vst [vmem:[#allocation32_spill] sm:$0xff] %v5573_v62 }
  0xc4   : > { %v5575_v63 = vpop.permute.xlu1 %1708  ;;  %v5577_v0 = vpop.permute.xlu0 %1703 }
  0xc5   : > { %7434 = vst [vmem:[#allocation33_spill] sm:$0xff] %v5575_v63  ;;  %7435 = vst [vmem:[#allocation34_spill] sm:$0xff] %v5577_v0 }
  0xc8   : > { %v5579_v1 = vpop.permute.xlu1 %969  ;;  %v5581_v2 = vpop.permute.xlu0 %964 }
  0xc9   : > { %7436 = vst [vmem:[#allocation35_spill] sm:$0xff] %v5581_v2 }
  0xcc   : > { %v5583_v3 = vpop.permute.xlu1 %979  ;;  %v5585_v4 = vpop.permute.xlu0 %974 }
  0xcd   : > { %7437 = vst [vmem:[#allocation36_spill] sm:$0xff] %v5583_v3  ;;  %7438 = vst [vmem:[#allocation37_spill] sm:$0xff] %v5585_v4 }
  0xd0   : > { %v5587_v5 = vpop.permute.xlu1 %1718  ;;  %v5589_v6 = vpop.permute.xlu0 %1713 }
  0xd1   : > { %7439 = vst [vmem:[#allocation38_spill] sm:$0xff] %v5587_v5  ;;  %7440 = vst [vmem:[#allocation39_spill] sm:$0xff] %v5589_v6  ;;  %v1890_v5 = vsel %vm1189_vm2, %v5471_v16, 0 }
  0xd3   : > { %v4775_v10 = vpop.f32.mrf.mxu0 }
  0xd4   : > { %v5596_v8 = vpop.permute.xlu1 %1728  ;;  %v5598_v9 = vpop.permute.xlu0 %1723  ;;  %v646_v12 = vmul.f32 %v4775_v10, %v5594_v7 }
  0xd5   : > { %7441 = vst [vmem:[#allocation40_spill] sm:$0xff] %v5596_v8  ;;  %7442 = vst [vmem:[#allocation41_spill] sm:$0xff] %v5598_v9  ;;  %v510_v13 = vpop.f32.mrf.mxu0 }
  0xd6   : > { %v685_v14 = vadd.f32 %v5603_v11, %v646_v12  ;;  %v644_v15 = vmul.f32 %v5594_v7, %v510_v13 }
  0xd7   : > { %v4776_v19 = vpop.f32.mrf.mxu0 }
  0xd8   : > { %v5608_v17 = vpop.permute.xlu1 %989  ;;  %v5610_v18 = vpop.permute.xlu0 %984  ;;  %v717_v20 = vmax.f32 %v685_v14, 0.0  ;;  %v683_v21 = vadd.f32 %v5603_v11, %v644_v15  ;;  %v647_v22 = vmul.f32 %v4776_v19, %v5594_v7 }
  0xd9   : > { %7443 = vst [vmem:[#allocation42_spill] sm:$0xff] %v5610_v18  ;;  %v513_v23 = vpop.f32.mrf.mxu0 }
  0xda   : > { %788 = vst.msk [vmem:[#allocation2 + $0x28] sm:$0xff] %vm747_vm0, %v717_v20  ;;  %v715_v24 = vmax.f32 %v683_v21, 0.0  ;;  %v686_v25 = vadd.f32 %v5603_v11, %v647_v22  ;;  %v645_v26 = vmul.f32 %v5594_v7, %v513_v23 }
  0xdb   : > { %v4779_v31 = vpop.f32.mrf.mxu0 }
  0xdc   : > { %v5617_v29 = vpop.permute.xlu1 %999  ;;  %v5619_v30 = vpop.permute.xlu0 %994  ;;  %786 = vst.msk [vmem:[#allocation2 + $0x18] sm:$0xff] %vm747_vm0, %v715_v24  ;;  %v718_v34 = vmax.f32 %v686_v25, 0.0  ;;  %v684_v35 = vadd.f32 %v5603_v11, %v645_v26  ;;  %v650_v10 = vmul.f32 %v4779_v31, %v5594_v7 }
  0xdd   : > { %7444 = vst [vmem:[#allocation43_spill] sm:$0xff] %v5617_v29  ;;  %7445 = vst [vmem:[#allocation44_spill] sm:$0xff] %v5619_v30  ;;  %v526_v12 = vpop.f32.mrf.mxu0 }
  0xde   : > { %789 = vst.msk [vmem:[#allocation2 + $0x30] sm:$0xff] %vm747_vm0, %v718_v34  ;;  %v716_v13 = vmax.f32 %v684_v35, 0.0  ;;  %v689_v14 = vadd.f32 %v5603_v11, %v650_v10  ;;  %v648_v15 = vmul.f32 %v5594_v7, %v526_v12 }
  0xdf   : > { %v4780_v21 = vpop.f32.mrf.mxu0 }
  0xe0   : > { %v5627_v19 = vpop.permute.xlu1 %1738  ;;  %v5629_v20 = vpop.permute.xlu0 %1733  ;;  %787 = vst.msk [vmem:[#allocation2 + $0x20] sm:$0xff] %vm747_vm0, %v716_v13  ;;  %v721_v22 = vmax.f32 %v689_v14, 0.0  ;;  %v687_v23 = vadd.f32 %v5603_v11, %v648_v15  ;;  %v651_v24 = vmul.f32 %v4780_v21, %v5594_v7 }
  0xe1   : > { %7446 = vst [vmem:[#allocation45_spill] sm:$0xff] %v5627_v19  ;;  %7447 = vst [vmem:[#allocation46_spill] sm:$0xff] %v5629_v20  ;;  %v529_v25 = vpop.f32.mrf.mxu0  ;;  %v1095_v53 = vld [vmem:[#allocation2 + $0x28] sm:$0xff] }
  0xe2   : > { %792 = vst.msk [vmem:[#allocation2 + $0x48] sm:$0xff] %vm747_vm0, %v721_v22  ;;  %v719_v26 = vmax.f32 %v687_v23, 0.0  ;;  %v690_v31 = vadd.f32 %v5603_v11, %v651_v24  ;;  %v649_v34 = vmul.f32 %v5594_v7, %v529_v25 }
  0xe3   : > { %v4783_v12 = vpop.f32.mrf.mxu0  ;;  %v5644_v21 = vld [vmem:[#allocation2 + $0x17] sm:$0xff] }
  0xe4   : > { %v5637_v35 = vpop.permute.xlu1 %1748  ;;  %v5639_v10 = vpop.permute.xlu0 %1743  ;;  %790 = vst.msk [vmem:[#allocation2 + $0x38] sm:$0xff] %vm747_vm0, %v719_v26  ;;  %v722_v13 = vmax.f32 %v690_v31, 0.0  ;;  %v688_v14 = vadd.f32 %v5603_v11, %v649_v34  ;;  %v654_v15 = vmul.f32 %v4783_v12, %v5594_v7  ;;  %v1093_v26 = vld [vmem:[#allocation2 + $0x18] sm:$0xff] }
  0xe5   : > { %7448 = vst [vmem:[#allocation47_spill] sm:$0xff] %v5637_v35  ;;  %7449 = vst [vmem:[#allocation48_spill] sm:$0xff] %v5639_v10  ;;  %v542_v22 = vpop.f32.mrf.mxu0  ;;  %v1096_v31 = vld [vmem:[#allocation2 + $0x30] sm:$0xff] }
  0xe6   : > { %793 = vst.msk [vmem:[#allocation2 + $0x50] sm:$0xff] %vm747_vm0, %v722_v13  ;;  %v720_v23 = vmax.f32 %v688_v14, 0.0  ;;  %v693_v24 = vadd.f32 %v5603_v11, %v654_v15  ;;  %v652_v25 = vmul.f32 %v5594_v7, %v542_v22  ;;  %v5653_v6 = vld [vmem:[#allocation2 + $0x2f] sm:$0xff]  ;;  %v1044_v13 = vmul.f32 %v5505_v27, %v5644_v21 }
  0xe7   : > { %7452 = vst [vmem:[#allocation51_spill] sm:$0xff] %v5653_v6  ;;  %v4784_v34 = vpop.f32.mrf.mxu0  ;;  %v1094_v12 = vld [vmem:[#allocation2 + $0x20] sm:$0xff]  ;;  %v5668_v10 = vpack.c.bf16 %v1096_v31, %v1095_v53 }
  0xe8   : > { %v5649_v20 = vpop.permute.xlu1 %1009  ;;  %v5651_v19 = vpop.permute.xlu0 %1004  ;;  %v5657_v62 = vld [vmem:[#allocation2 + $0x1f] sm:$0xff]  ;;  %v5661_v14 = vld [vmem:[#allocation2 + $0x27] sm:$0xff]  ;;  %791 = vst.msk [vmem:[#allocation2 + $0x40] sm:$0xff] %vm747_vm0, %v720_v23  ;;  %v725_v15 = vmax.f32 %v693_v24, 0.0  ;;  %v691_v22 = vadd.f32 %v5603_v11, %v652_v25  ;;  %v655_v61 = vmul.f32 %v4784_v34, %v5594_v7  ;;  %v5666_v54 = vpack.c.bf16 %v1094_v12, %v1093_v26 }
  0xe9   : > { %7450 = vst [vmem:[#allocation49_spill] sm:$0xff] %v5649_v20  ;;  %7451 = vst [vmem:[#allocation50_spill] sm:$0xff] %v5651_v19  ;;  %v545_v35 = vpop.f32.mrf.mxu0  ;;  %v1045_v16 = vmul.f32 %v5510_v32, %v5657_v62  ;;  %v1046_v27 = vmul.f32 %v5526_v41, %v5661_v14  ;;  %v1047_v23 = vmul.f32 %v5524_v40, %v5653_v6  ;;  %v5679_v24 = vld [vmem:[%s7252_s4 + $0x8] sm:$0x3] }
  0xea   : > { %7453 = vst [vmem:[#allocation52_spill] sm:$0xff] %v5666_v54  ;;  %7454 = vst [vmem:[#allocation53_spill] sm:$0xff] %v5668_v10  ;;  %v723_v25 = vmax.f32 %v691_v22, 0.0  ;;  %v694_v53 = vadd.f32 %v5603_v11, %v655_v61  ;;  %v653_v26 = vmul.f32 %v5594_v7, %v545_v35  ;;  %4808 = vmatmul.mubr.msk.bf16.vlgmr.msra.gmra.mxu1 %vm747_vm0, %v5666_v54 }
  0xeb   : > { %796 = vst.msk [vmem:[#allocation2 + $0x68] sm:$0xff] %vm747_vm0, %v725_v15  ;;  %4874 = vmatpush3.bf16.msra.mxu1 %v1890_v5  ;;  %v4787_v12 = vpop.f32.mrf.mxu0  ;;  %4811 = vmatprep.mubr.msk.bf16.mxu1 %vm747_vm0, %v5668_v10  ;;  %v1075_v41 = vpack.c.bf16 %v1045_v16, %v1044_v13  ;;  %v1076_v40 = vpack.c.bf16 %v1047_v23, %v1046_v27  ;;  %v2216_v15 = vsel %vm1189_vm2, %v5547_v50, 0  ;;  %v5697_v32 = vld [vmem:[#allocation2 + $0x37] sm:$0xff]  ;;  %v5704_v5 = vld [vmem:[%s7252_s4 + $0xa] sm:$0x3] }
  0xec   : > { %v5684_v31 = vpop.permute.xlu1 %1019  ;;  %v5686_v34 = vpop.permute.xlu0 %1014  ;;  %794 = vst.msk [vmem:[#allocation2 + $0x58] sm:$0xff] %vm747_vm0, %v723_v25  ;;  %v726_v61 = vmax.f32 %v694_v53, 0.0  ;;  %v692_v35 = vadd.f32 %v5603_v11, %v653_v26  ;;  %v658_v22 = vmul.f32 %v4787_v12, %v5594_v7  ;;  %7457 = vst [vmem:[#allocation56_spill] sm:$0xff] %v5697_v32  ;;  %5115 = vmatprep.subr.msk.bf16.mxu1 %vm1189_vm2, %v5679_v24  ;;  %v1097_v53 = vld [vmem:[#allocation2 + $0x38] sm:$0xff] }
  0xed   : > { %7455 = vst [vmem:[#allocation54_spill] sm:$0xff] %v5684_v31  ;;  %7456 = vst [vmem:[#allocation55_spill] sm:$0xff] %v5686_v34  ;;  %4842 = vmatmul.mubr.msk.bf16.vlgmr.msra.gmra.mxu0 %vm747_vm0, %v1075_v41  ;;  %v558_v27 = vpop.f32.mrf.mxu0  ;;  %v1100_v26 = vld [vmem:[#allocation2 + $0x50] sm:$0xff] }
  0xee   : > { %7458 = vst [vmem:[#allocation57_spill] sm:$0xff] %v5704_v5  ;;  %797 = vst.msk [vmem:[#allocation2 + $0x70] sm:$0xff] %vm747_vm0, %v726_v61  ;;  %v724_v50 = vmax.f32 %v692_v35, 0.0  ;;  %v697_v13 = vadd.f32 %v5603_v11, %v658_v22  ;;  %v656_v16 = vmul.f32 %v5594_v7, %v558_v27  ;;  %4845 = vmatprep.mubr.msk.bf16.mxu0 %vm747_vm0, %v1076_v40  ;;  %v5715_v12 = vld [vmem:[#allocation2 + $0x4f] sm:$0xff]  ;;  %4908 = vmatpush3.bf16.msra.mxu0 %v2216_v15 }
  0xef   : > { %7461 = vst [vmem:[#allocation60_spill] sm:$0xff] %v5715_v12  ;;  %v4788_v41 = vpop.f32.mrf.mxu0  ;;  %v1098_v10 = vld [vmem:[#allocation2 + $0x40] sm:$0xff]  ;;  %v1048_v61 = vmul.f32 %v5530_v43, %v5697_v32  ;;  %5116 = vmatprep.subr.msk.bf16.mxu0 %vm1189_vm2, %v5704_v5 }
  0xf0   : > { %v5711_v23 = vpop.permute.xlu1 %1758  ;;  %v5713_v25 = vpop.permute.xlu0 %1753  ;;  %v5717_v54 = vld [vmem:[#allocation2 + $0x3f] sm:$0xff]  ;;  %v5721_v35 = vld [vmem:[#allocation2 + $0x47] sm:$0xff]  ;;  %795 = vst.msk [vmem:[#allocation2 + $0x60] sm:$0xff] %vm747_vm0, %v724_v50  ;;  %v729_v40 = vmax.f32 %v697_v13, 0.0  ;;  %v695_v22 = vadd.f32 %v5603_v11, %v656_v16  ;;  %v659_v27 = vmul.f32 %v4788_v41, %v5594_v7  ;;  %v5728_v15 = vpack.c.bf16 %v1098_v10, %v1097_v53 }
  0xf1   : > { %7459 = vst [vmem:[#allocation58_spill] sm:$0xff] %v5711_v23  ;;  %7460 = vst [vmem:[#allocation59_spill] sm:$0xff] %v5713_v25  ;;  %v1099_v25 = vld [vmem:[#allocation2 + $0x48] sm:$0xff]  ;;  %v561_v23 = vpop.f32.mrf.mxu0  ;;  %v1049_v43 = vmul.f32 %v5528_v42, %v5717_v54  ;;  %v1050_v32 = vmul.f32 %v5542_v49, %v5721_v35  ;;  %v1051_v50 = vmul.f32 %v5540_v48, %v5715_v12 }
  0xf2   : > { %7462 = vst [vmem:[#allocation61_spill] sm:$0xff] %v5721_v35  ;;  %7463 = vst [vmem:[#allocation62_spill] sm:$0xff] %v5728_v15  ;;  %v5730_v6 = vpack.c.bf16 %v1100_v26, %v1099_v25  ;;  %v727_v13 = vmax.f32 %v695_v22, 0.0  ;;  %v698_v16 = vadd.f32 %v5603_v11, %v659_v27  ;;  %v657_v10 = vmul.f32 %v5594_v7, %v561_v23  ;;  %v1103_v48 = vld [vmem:[#allocation2 + $0x68] sm:$0xff] }
  0xf3   : > { %800 = vst.msk [vmem:[#allocation2 + $0x88] sm:$0xff] %vm747_vm0, %v729_v40  ;;  %4812 = vmatmul.mubr.msk.bf16.gmra.mxu1 %vm747_vm0, %v5728_v15  ;;  %v4791_v26 = vpop.f32.mrf.mxu0  ;;  %v1077_v41 = vpack.c.bf16 %v1049_v43, %v1048_v61  ;;  %v1078_v49 = vpack.c.bf16 %v1051_v50, %v1050_v32  ;;  %v5752_v27 = vld [vmem:[#allocation2 + $0x57] sm:$0xff] }
  0xf4   : > { %7464 = vst [vmem:[#allocation63_spill] sm:$0xff] %v5730_v6  ;;  %v5741_v53 = vpop.permute.xlu1 %1768  ;;  %v5743_v25 = vpop.permute.xlu0 %1763  ;;  %4815 = vmatprep.mubr.msk.bf16.mxu1 %vm747_vm0, %v5730_v6  ;;  %798 = vst.msk [vmem:[#allocation2 + $0x78] sm:$0xff] %vm747_vm0, %v727_v13  ;;  %v730_v40 = vmax.f32 %v698_v16, 0.0  ;;  %v696_v22 = vadd.f32 %v5603_v11, %v657_v10  ;;  %v662_v23 = vmul.f32 %v4791_v26, %v5594_v7  ;;  %v1101_v50 = vld [vmem:[#allocation2 + $0x58] sm:$0xff] }
  0xf5   : > { %7465 = vst [vmem:[#allocation64_spill] sm:$0xff] %v5741_v53  ;;  %7466 = vst [vmem:[#allocation65_spill] sm:$0xff] %v5743_v25  ;;  %4846 = vmatmul.mubr.msk.bf16.gmra.mxu0 %vm747_vm0, %v1077_v41  ;;  %v574_v42 = vpop.f32.mrf.mxu0  ;;  %v1104_v13 = vld [vmem:[#allocation2 + $0x70] sm:$0xff] }
  0xf6   : > { %7467 = vst [vmem:[#allocation66_spill] sm:$0xff] %v5752_v27  ;;  %801 = vst.msk [vmem:[#allocation2 + $0x90] sm:$0xff] %vm747_vm0, %v730_v40  ;;  %v728_v15 = vmax.f32 %v696_v22, 0.0  ;;  %v701_v12 = vadd.f32 %v5603_v11, %v662_v23  ;;  %v660_v43 = vmul.f32 %v5594_v7, %v574_v42  ;;  %4849 = vmatprep.mubr.msk.bf16.mxu0 %vm747_vm0, %v1078_v49  ;;  %v5763_v16 = vld [vmem:[#allocation2 + $0x6f] sm:$0xff] }
  0xf7   : > { %7468 = vst [vmem:[#allocation67_spill] sm:$0xff] %v5763_v16  ;;  %v4792_v10 = vpop.f32.mrf.mxu0  ;;  %v1102_v26 = vld [vmem:[#allocation2 + $0x60] sm:$0xff]  ;;  %v1052_v40 = vmul.f32 %v5553_v52, %v5752_v27  ;;  %v5776_v5 = vpack.c.bf16 %v1104_v13, %v1103_v48 }
  0xf8   : > { %v5759_v32 = vpop.permute.xlu1 %1029  ;;  %v5761_v61 = vpop.permute.xlu0 %1024  ;;  %v5765_v41 = vld [vmem:[#allocation2 + $0x5f] sm:$0xff]  ;;  %v5769_v22 = vld [vmem:[#allocation2 + $0x67] sm:$0xff]  ;;  %799 = vst.msk [vmem:[#allocation2 + $0x80] sm:$0xff] %vm747_vm0, %v728_v15  ;;  %v733_v42 = vmax.f32 %v701_v12, 0.0  ;;  %v699_v49 = vadd.f32 %v5603_v11, %v660_v43  ;;  %v663_v23 = vmul.f32 %v4792_v10, %v5594_v7  ;;  %v5774_v6 = vpack.c.bf16 %v1102_v26, %v1101_v50 }
  0xf9   : > { %7469 = vst [vmem:[#allocation68_spill] sm:$0xff] %v5769_v22  ;;  %v577_v35 = vpop.f32.mrf.mxu0  ;;  %7471 = vst [vmem:[#allocation70_spill] sm:$0xff] %v5776_v5  ;;  %v1053_v53 = vmul.f32 %v5551_v51, %v5765_v41  ;;  %v1054_v52 = vmul.f32 %v5565_v58, %v5769_v22  ;;  %v1055_v15 = vmul.f32 %v5563_v57, %v5763_v16 }
  0xfa   : > { %7470 = vst [vmem:[#allocation69_spill] sm:$0xff] %v5774_v6  ;;  %804 = vst.msk [vmem:[#allocation2 + $0xa8] sm:$0xff] %vm747_vm0, %v733_v42  ;;  %v731_v12 = vmax.f32 %v699_v49, 0.0  ;;  %v702_v43 = vadd.f32 %v5603_v11, %v663_v23  ;;  %v661_v50 = vmul.f32 %v5594_v7, %v577_v35  ;;  %v1107_v57 = vld [vmem:[#allocation2 + $0x88] sm:$0xff] }
  0xfb   : > { %4816 = vmatmul.mubr.msk.bf16.gmra.mxu1 %vm747_vm0, %v5774_v6  ;;  %v4795_v13 = vpop.f32.mrf.mxu0  ;;  %v1079_v26 = vpack.c.bf16 %v1053_v53, %v1052_v40  ;;  %v1080_v58 = vpack.c.bf16 %v1055_v15, %v1054_v52  ;;  %v5798_v23 = vld [vmem:[#allocation2 + $0x77] sm:$0xff] }
  0xfc   : > { %v5787_v10 = vpop.permute.xlu1 %1039  ;;  %v5789_v48 = vpop.permute.xlu0 %1034  ;;  %4819 = vmatprep.mubr.msk.bf16.mxu1 %vm747_vm0, %v5776_v5  ;;  %802 = vst.msk [vmem:[#allocation2 + $0x98] sm:$0xff] %vm747_vm0, %v731_v12  ;;  %v734_v42 = vmax.f32 %v702_v43, 0.0  ;;  %v700_v49 = vadd.f32 %v5603_v11, %v661_v50  ;;  %v666_v35 = vmul.f32 %v4795_v13, %v5594_v7  ;;  %7472 = vst [vmem:[#allocation71_spill] sm:$0xff] %v5798_v23  ;;  %v1105_v15 = vld [vmem:[#allocation2 + $0x78] sm:$0xff]  ;;  %v3682_v5 = vld [vmem:[#allocation2 + $0x121] sm:$0xff] }
  0xfd   : > { %4850 = vmatmul.mubr.msk.bf16.gmra.mxu0 %vm747_vm0, %v1079_v26  ;;  %v590_v51 = vpop.f32.mrf.mxu0  ;;  %v1108_v12 = vld [vmem:[#allocation2 + $0x90] sm:$0xff] }
  0xfe   : > { %805 = vst.msk [vmem:[#allocation2 + $0xb0] sm:$0xff] %vm747_vm0, %v734_v42  ;;  %v732_v6 = vmax.f32 %v700_v49, 0.0  ;;  %v705_v16 = vadd.f32 %v5603_v11, %v666_v35  ;;  %v664_v53 = vmul.f32 %v5594_v7, %v590_v51  ;;  %4853 = vmatprep.mubr.msk.bf16.mxu0 %vm747_vm0, %v1080_v58  ;;  %v5809_v43 = vld [vmem:[#allocation2 + $0x8f] sm:$0xff]  ;;  %v1056_v42 = vmul.f32 %v5569_v60, %v5798_v23 }
  0xff   : > { %7475 = vst [vmem:[#allocation74_spill] sm:$0xff] %v5809_v43  ;;  %v4796_v50 = vpop.f32.mrf.mxu0  ;;  %v1106_v13 = vld [vmem:[#allocation2 + $0x80] sm:$0xff]  ;;  %v5822_v27 = vpack.c.bf16 %v1108_v12, %v1107_v57 }
 0x100   : > { %v5805_v52 = vpop.permute.xlu1 %1778  ;;  %v5807_v40 = vpop.permute.xlu0 %1773  ;;  %v5811_v26 = vld [vmem:[#allocation2 + $0x7f] sm:$0xff]  ;;  %v5815_v49 = vld [vmem:[#allocation2 + $0x87] sm:$0xff]  ;;  %803 = vst.msk [vmem:[#allocation2 + $0xa0] sm:$0xff] %vm747_vm0, %v732_v6  ;;  %v737_v51 = vmax.f32 %v705_v16, 0.0  ;;  %v703_v58 = vadd.f32 %v5603_v11, %v664_v53  ;;  %v667_v35 = vmul.f32 %v4796_v50, %v5594_v7  ;;  %v1059_v6 = vmul.f32 %v5579_v1, %v5809_v43 }
 0x101   : > { %7473 = vst [vmem:[#allocation72_spill] sm:$0xff] %v5805_v52  ;;  %7474 = vst [vmem:[#allocation73_spill] sm:$0xff] %v5807_v40  ;;  %v3681_v52 = vld [vmem:[#allocation2 + $0x119] sm:$0xff]  ;;  %v5820_v40 = vpack.c.bf16 %v1106_v13, %v1105_v15  ;;  %v593_v22 = vpop.f32.mrf.mxu0  ;;  %v1057_v60 = vmul.f32 %v5567_v59, %v5811_v26  ;;  %v1058_v23 = vmul.f32 %v5581_v2, %v5815_v49 }
 0x102   : > { %7477 = vst [vmem:[#allocation76_spill] sm:$0xff] %v5822_v27  ;;  %808 = vst.msk [vmem:[#allocation2 + $0xc8] sm:$0xff] %vm747_vm0, %v737_v51  ;;  %v735_v16 = vmax.f32 %v703_v58, 0.0  ;;  %v706_v53 = vadd.f32 %v5603_v11, %v667_v35  ;;  %v665_v15 = vmul.f32 %v5594_v7, %v593_v22 }
 0x103   : > { %7476 = vst [vmem:[#allocation75_spill] sm:$0xff] %v5820_v40  ;;  %4820 = vmatmul.mubr.msk.bf16.gmra.mxu1 %vm747_vm0, %v5820_v40  ;;  %v4799_v2 = vpop.f32.mrf.mxu0  ;;  %v1081_v51 = vpack.c.bf16 %v1057_v60, %v1056_v42  ;;  %v1082_v58 = vpack.c.bf16 %v1059_v6, %v1058_v23  ;;  %v5850_v40 = vld [vmem:[#allocation2 + $0x97] sm:$0xff] }
 0x104   : > { %v5833_v50 = vpop.permute.xlu1 %1788  ;;  %v5835_v57 = vpop.permute.xlu0 %1783  ;;  %4823 = vmatprep.mubr.msk.bf16.mxu1 %vm747_vm0, %v5822_v27  ;;  %806 = vst.msk [vmem:[#allocation2 + $0xb8] sm:$0xff] %vm747_vm0, %v735_v16  ;;  %v738_v22 = vmax.f32 %v706_v53, 0.0  ;;  %v704_v35 = vadd.f32 %v5603_v11, %v665_v15  ;;  %v670_v59 = vmul.f32 %v4799_v2, %v5594_v7  ;;  %v1109_v42 = vld [vmem:[#allocation2 + $0x98] sm:$0xff] }
 0x105   : > { %v5840_v12 = vmul.f32 %v3682_v5, %v5833_v50  ;;  %v5843_v13 = vmul.f32 %v3681_v52, %v5835_v57  ;;  %4854 = vmatmul.mubr.msk.bf16.gmra.mxu0 %vm747_vm0, %v1081_v51  ;;  %v606_v52 = vpop.f32.mrf.mxu0  ;;  %v1112_v6 = vld [vmem:[#allocation2 + $0xb0] sm:$0xff]  ;;  %v1060_v51 = vmul.f32 %v5585_v4, %v5850_v40 }
 0x106   : > { %809 = vst.msk [vmem:[#allocation2 + $0xd0] sm:$0xff] %vm747_vm0, %v738_v22  ;;  %v736_v27 = vmax.f32 %v704_v35, 0.0  ;;  %v709_v60 = vadd.f32 %v5603_v11, %v670_v59  ;;  %v668_v23 = vmul.f32 %v5594_v7, %v606_v52  ;;  %4857 = vmatprep.mubr.msk.bf16.mxu0 %vm747_vm0, %v1082_v58  ;;  %v5859_v2 = vld [vmem:[#allocation2 + $0xaf] sm:$0xff] }
 0x107   : > { %7478 = vst [vmem:[#allocation77_spill] sm:$0xff] %v5840_v12  ;;  %7479 = vst [vmem:[#allocation78_spill] sm:$0xff] %v5843_v13  ;;  %v4800_v16 = vpop.f32.mrf.mxu0  ;;  %v1110_v53 = vld [vmem:[#allocation2 + $0xa0] sm:$0xff]  ;;  %v1111_v52 = vld [vmem:[#allocation2 + $0xa8] sm:$0xff] }
 0x108   : > { %7480 = vst [vmem:[#allocation79_spill] sm:$0xff] %v5859_v2  ;;  %v5861_v15 = vld [vmem:[#allocation2 + $0x9f] sm:$0xff]  ;;  %v5865_v5 = vld [vmem:[#allocation2 + $0xa7] sm:$0xff]  ;;  %807 = vst.msk [vmem:[#allocation2 + $0xc0] sm:$0xff] %vm747_vm0, %v736_v27  ;;  %v741_v59 = vmax.f32 %v709_v60, 0.0  ;;  %v707_v22 = vadd.f32 %v5603_v11, %v668_v23  ;;  %v671_v58 = vmul.f32 %v4800_v16, %v5594_v7  ;;  %v5870_v35 = vpack.c.bf16 %v1110_v53, %v1109_v42 }
 0x109   : > { %v609_v13 = vpop.f32.mrf.mxu0  ;;  %v5872_v12 = vpack.c.bf16 %v1112_v6, %v1111_v52  ;;  %v1061_v43 = vmul.f32 %v5583_v3, %v5861_v15  ;;  %v1062_v4 = vmul.f32 %v5610_v18, %v5865_v5  ;;  %v1063_v27 = vmul.f32 %v5608_v17, %v5859_v2 }
 0x10a   : > { %7481 = vst [vmem:[#allocation80_spill] sm:$0xff] %v5870_v35  ;;  %812 = vst.msk [vmem:[#allocation2 + $0xe8] sm:$0xff] %vm747_vm0, %v741_v59  ;;  %v739_v60 = vmax.f32 %v707_v22, 0.0  ;;  %v710_v23 = vadd.f32 %v5603_v11, %v671_v58  ;;  %v669_v42 = vmul.f32 %v5594_v7, %v609_v13 }
 0x10b   : > { %7482 = vst [vmem:[#allocation81_spill] sm:$0xff] %v5872_v12  ;;  %4824 = vmatmul.mubr.msk.bf16.gmra.mxu1 %vm747_vm0, %v5870_v35  ;;  %v4803_v6 = vpop.f32.mrf.mxu0  ;;  %v1083_v16 = vpack.c.bf16 %v1061_v43, %v1060_v51  ;;  %v1084_v53 = vpack.c.bf16 %v1063_v27, %v1062_v4  ;;  %v5890_v22 = vld [vmem:[#allocation2 + $0xb7] sm:$0xff] }
 0x10c   : > { %4827 = vmatprep.mubr.msk.bf16.mxu1 %vm747_vm0, %v5872_v12  ;;  %810 = vst.msk [vmem:[#allocation2 + $0xd8] sm:$0xff] %vm747_vm0, %v739_v60  ;;  %v742_v52 = vmax.f32 %v710_v23, 0.0  ;;  %v708_v18 = vadd.f32 %v5603_v11, %v669_v42  ;;  %v674_v59 = vmul.f32 %v4803_v6, %v5594_v7  ;;  %v1113_v4 = vld [vmem:[#allocation2 + $0xb8] sm:$0xff]  ;;  %v1064_v6 = vmul.f32 %v5619_v30, %v5890_v22 }
 0x10d   : > { %4858 = vmatmul.mubr.msk.bf16.gmra.mxu0 %vm747_vm0, %v1083_v16  ;;  %v622_v13 = vpop.f32.mrf.mxu0  ;;  %v1116_v51 = vld [vmem:[#allocation2 + $0xd0] sm:$0xff] }
 0x10e   : > { %813 = vst.msk [vmem:[#allocation2 + $0xf0] sm:$0xff] %vm747_vm0, %v742_v52  ;;  %v740_v58 = vmax.f32 %v708_v18, 0.0  ;;  %v713_v35 = vadd.f32 %v5603_v11, %v674_v59  ;;  %v672_v43 = vmul.f32 %v5594_v7, %v622_v13  ;;  %4861 = vmatprep.mubr.msk.bf16.mxu0 %vm747_vm0, %v1084_v53  ;;  %v5897_v27 = vld [vmem:[#allocation2 + $0xcf] sm:$0xff] }
 0x10f   : > { %7483 = vst [vmem:[#allocation82_spill] sm:$0xff] %v5897_v27  ;;  %v4804_v60 = vpop.f32.mrf.mxu0  ;;  %v1114_v23 = vld [vmem:[#allocation2 + $0xc0] sm:$0xff]  ;;  %v1115_v13 = vld [vmem:[#allocation2 + $0xc8] sm:$0xff] }
 0x110   : > { %v5899_v42 = vld [vmem:[#allocation2 + $0xbf] sm:$0xff]  ;;  %v5903_v16 = vld [vmem:[#allocation2 + $0xc7] sm:$0xff]  ;;  %811 = vst.msk [vmem:[#allocation2 + $0xe0] sm:$0xff] %vm747_vm0, %v740_v58  ;;  %v745_v18 = vmax.f32 %v713_v35, 0.0  ;;  %v711_v52 = vadd.f32 %v5603_v11, %v672_v43  ;;  %v675_v53 = vmul.f32 %v4804_v60, %v5594_v7  ;;  %v5908_v59 = vpack.c.bf16 %v1114_v23, %v1113_v4 }
 0x111   : > { %7484 = vst [vmem:[#allocation83_spill] sm:$0xff] %v5903_v16  ;;  %v625_v12 = vpop.f32.mrf.mxu0  ;;  %v5910_v3 = vpack.c.bf16 %v1116_v51, %v1115_v13  ;;  %v1065_v2 = vmul.f32 %v5617_v29, %v5899_v42  ;;  %v1066_v30 = vmul.f32 %v5651_v19, %v5903_v16  ;;  %v1067_v58 = vmul.f32 %v5649_v20, %v5897_v27  ;;  %v6003_v29 = vld [vmem:[#allocation2 + $0x89] sm:$0xff]  ;;  %v6023_v20 = vld [vmem:[#allocation2 + $0xb1] sm:$0xff] }
 0x112   : > { %7485 = vst [vmem:[#allocation84_spill] sm:$0xff] %v5908_v59  ;;  %816 = vst.msk [vmem:[#allocation2 + $0x108] sm:$0xff] %vm747_vm0, %v745_v18  ;;  %v743_v35 = vmax.f32 %v711_v52, 0.0  ;;  %v714_v43 = vadd.f32 %v5603_v11, %v675_v53  ;;  %v673_v4 = vmul.f32 %v5594_v7, %v625_v12  ;;  %v6021_v27 = vld [vmem:[#allocation2 + $0xa9] sm:$0xff] }
 0x113   : > { %7486 = vst [vmem:[#allocation85_spill] sm:$0xff] %v5910_v3  ;;  %4828 = vmatmul.mubr.msk.bf16.gmra.mxu1 %vm747_vm0, %v5908_v59  ;;  %v1085_v51 = vpack.c.bf16 %v1065_v2, %v1064_v6  ;;  %v1086_v60 = vpack.c.bf16 %v1067_v58, %v1066_v30  ;;  %v5927_v19 = vld [vmem:[#allocation2 + $0xd7] sm:$0xff]  ;;  %v1119_v58 = vld [vmem:[#allocation2 + $0xe8] sm:$0xff] }
 0x114   : > { %4831 = vmatprep.mubr.msk.bf16.mxu1 %vm747_vm0, %v5910_v3  ;;  %814 = vst.msk [vmem:[#allocation2 + $0xf8] sm:$0xff] %vm747_vm0, %v743_v35  ;;  %v746_v23 = vmax.f32 %v714_v43, 0.0  ;;  %v712_v13 = vadd.f32 %v5603_v11, %v673_v4  ;;  %7487 = vst [vmem:[#allocation86_spill] sm:$0xff] %v5927_v19  ;;  %v1117_v12 = vld [vmem:[#allocation2 + $0xd8] sm:$0xff]  ;;  %v1068_v6 = vmul.f32 %v5686_v34, %v5927_v19  ;;  %v5955_v59 = vld [vmem:[#allocation2 + $0x49] sm:$0xff] }
 0x115   : > { %4862 = vmatmul.mubr.msk.bf16.gmra.mxu0 %vm747_vm0, %v1085_v51  ;;  %v5930_v18 = vld [vmem:[#allocation2 + $0xef] sm:$0xff]  ;;  %v6001_v19 = vld [vmem:[#allocation2 + $0x21] sm:$0xff] }
 0x116   : > { %7488 = vst [vmem:[#allocation87_spill] sm:$0xff] %v5930_v18  ;;  %817 = vst.msk [vmem:[#allocation2 + $0x110] sm:$0xff] %vm747_vm0, %v746_v23  ;;  %v744_v7 = vmax.f32 %v712_v13, 0.0  ;;  %4865 = vmatprep.mubr.msk.bf16.mxu0 %vm747_vm0, %v1086_v60  ;;  %v1120_v52 = vld [vmem:[#allocation2 + $0xf0] sm:$0xff]  ;;  %v1071_v4 = vmul.f32 %v5759_v32, %v5930_v18 }
 0x117   : > { %v1118_v2 = vld [vmem:[#allocation2 + $0xe0] sm:$0xff]  ;;  %v5949_v51 = vpack.c.bf16 %v1120_v52, %v1119_v58  ;;  %v1567_v13 = vld [vmem:[#allocation2 + $0x11] sm:$0xff]  ;;  %7501 = vst [vmem:[#allocation100_spill] sm:$0xff] %v6001_v19 }
 0x118   : > { %v5934_v30 = vld [vmem:[#allocation2 + $0xdf] sm:$0xff]  ;;  %v5938_v11 = vld [vmem:[#allocation2 + $0xe7] sm:$0xff]  ;;  %815 = vst.msk [vmem:[#allocation2 + $0x100] sm:$0xff] %vm747_vm0, %v744_v7  ;;  %v5941_v53 = vpack.c.bf16 %v1118_v2, %v1117_v12  ;;  %v1571_v12 = vld [vmem:[#allocation2 + $0x31] sm:$0xff]  ;;  %v1792_v52 = vmul.f32 %v5515_v36, %v1567_v13 }
 0x119   : > { %7489 = vst [vmem:[#allocation88_spill] sm:$0xff] %v5934_v30  ;;  %7490 = vst [vmem:[#allocation89_spill] sm:$0xff] %v5938_v11  ;;  %v1069_v35 = vmul.f32 %v5684_v31, %v5934_v30  ;;  %v1070_v43 = vmul.f32 %v5761_v61, %v5938_v11  ;;  %v1570_v7 = vld [vmem:[#allocation2 + $0x29] sm:$0xff]  ;;  %v5957_v31 = vld [vmem:[#allocation2 + $0x51] sm:$0xff]  ;;  %v1794_v30 = vmul.f32 %v5520_v38, %v6001_v19 }
 0x11a   : > { %7491 = vst [vmem:[#allocation90_spill] sm:$0xff] %v5941_v53  ;;  %7492 = vst [vmem:[#allocation91_spill] sm:$0xff] %v5949_v51  ;;  %v1566_v2 = vld [vmem:[#allocation2 + $0x9] sm:$0xff]  ;;  %v5962_v58 = vmul.f32 %v5522_v39, %v1570_v7  ;;  %v5991_v34 = vld [vmem:[#allocation2 + $0x71] sm:$0xff] }
 0x11b   : > { %4832 = vmatmul.mubr.msk.bf16.gmra.mxu1 %vm747_vm0, %v5941_v53  ;;  %v1087_v60 = vpack.c.bf16 %v1069_v35, %v1068_v6  ;;  %v1088_v23 = vpack.c.bf16 %v1071_v4, %v1070_v43  ;;  %v848_v3 = vld [vmem:[#allocation2 + $0xf7] sm:$0xff]  ;;  %v5965_v6 = vmul.f32 %v5520_v38, %v1571_v12  ;;  %v1791_v35 = vmul.f32 %v5517_v37, %v1566_v2  ;;  %v5989_v37 = vld [vmem:[#allocation2 + $0x69] sm:$0xff] }
 0x11c   : > { %4835 = vmatprep.mubr.msk.bf16.mxu1 %vm747_vm0, %v5949_v51  ;;  %7493 = vst [vmem:[#allocation92_spill] sm:$0xff] %v5962_v58  ;;  %v2118_v43 = vmul.f32 %v5512_v33, %v5657_v62  ;;  %v5971_v4 = vld [vmem:[#allocation2 + $0x19] sm:$0xff]  ;;  %v1072_v36 = vmul.f32 %v5789_v48, %v848_v3  ;;  %v5980_v2 = vmul.f32 %v5538_v47, %v5955_v59  ;;  %v7515_v19 = vld [vmem:[#allocation51_spill] sm:$0xff] }
 0x11d   : > { %4866 = vmatmul.mubr.msk.bf16.gmra.mxu0 %vm747_vm0, %v1087_v60  ;;  %7494 = vst [vmem:[#allocation93_spill] sm:$0xff] %v5965_v6  ;;  %7495 = vst [vmem:[#allocation94_spill] sm:$0xff] %v5971_v4  ;;  %v5973_v51 = vld [vmem:[#allocation2 + $0x10f] sm:$0xff]  ;;  %v1121_v60 = vld [vmem:[#allocation2 + $0xf8] sm:$0xff]  ;;  %v5994_v11 = vmul.f32 %v5761_v61, %v848_v3  ;;  %v1823_v6 = vpack.c.bf16 %v1792_v52, %v1791_v35  ;;  %v2117_v35 = vmul.f32 %v5507_v28, %v5644_v21 }
 0x11e   : > { %4869 = vmatprep.mubr.msk.bf16.mxu0 %vm747_vm0, %v1088_v23  ;;  %7496 = vst [vmem:[#allocation95_spill] sm:$0xff] %v5980_v2  ;;  %v5984_v23 = vmul.f32 %v5536_v46, %v5957_v31  ;;  %v6013_v3 = vmul.f32 %v5973_v51, %v5787_v10  ;;  %v1793_v16 = vmul.f32 %v5522_v39, %v5971_v4  ;;  %v6042_v28 = vld [vmem:[#allocation2 + $0xc9] sm:$0xff] }
 0x11f   : > { %v1122_v53 = vld [vmem:[#allocation2 + $0x100] sm:$0xff]  ;;  %7499 = vst [vmem:[#allocation98_spill] sm:$0xff] %v5994_v11  ;;  %v2149_v21 = vpack.c.bf16 %v2118_v43, %v2117_v35  ;;  %v6048_v39 = vmul.f32 %v5577_v0, %v6003_v29  ;;  %v6060_v35 = vmul.f32 %v5598_v9, %v6021_v27  ;;  %v6064_v38 = vmul.f32 %v5596_v8, %v6023_v20  ;;  %v7510_v43 = vld [vmem:[#allocation3_spill] sm:$0xff] }
 0x120   : > { %v849_v13 = vld [vmem:[#allocation2 + $0xff] sm:$0xff]  ;;  %7497 = vst [vmem:[#allocation96_spill] sm:$0xff] %v5984_v23  ;;  %v5986_v62 = vpack.c.bf16 %v1122_v53, %v1121_v60  ;;  %v5999_v58 = vld [vmem:[#allocation2 + $0x107] sm:$0xff]  ;;  %v6005_v53 = vld [vmem:[#allocation2 + $0x91] sm:$0xff]  ;;  %v1795_v2 = vmul.f32 %v5534_v45, %v1570_v7  ;;  %v1824_v45 = vpack.c.bf16 %v1794_v30, %v1793_v16 }
 0x121   : > { %v1073_v33 = vmul.f32 %v5787_v10, %v849_v13  ;;  %v5997_v18 = vmul.f32 %v5759_v32, %v849_v13  ;;  %v6009_v60 = vmul.f32 %v5999_v58, %v5789_v48  ;;  %7503 = vst [vmem:[#allocation102_spill] sm:$0xff] %v6013_v3  ;;  %7506 = vst [vmem:[#allocation105_spill] sm:$0xff] %v6048_v39  ;;  %v6068_v23 = vld [vmem:[#allocation2 + $0xe9] sm:$0xff]  ;;  %v2510_v3 = vsel %vm1189_vm2, %v5679_v24, 0  ;;  %v6101_v16 = vld [vmem:[#allocation2 + $0x41] sm:$0xff] }
 0x122   : > { %7498 = vst [vmem:[#allocation97_spill] sm:$0xff] %v5986_v62  ;;  %v6052_v13 = vmul.f32 %v5575_v63, %v6005_v53  ;;  %7508 = vst [vmem:[#allocation107_spill] sm:$0xff] %v6060_v35  ;;  %v6097_v35 = vld [vmem:[#allocation2 + $0x109] sm:$0xff]  ;;  %v7523_v24 = vld [vmem:[#allocation57_spill] sm:$0xff] }
 0x123   : > { %7500 = vst [vmem:[#allocation99_spill] sm:$0xff] %v5997_v18  ;;  %7502 = vst [vmem:[#allocation101_spill] sm:$0xff] %v6009_v60  ;;  %4836 = vmatmul.mubr.msk.bf16.gmra.mxu1 %vm747_vm0, %v5986_v62  ;;  %v1089_v52 = vpack.c.bf16 %v1073_v33, %v1072_v36  ;;  %v6034_v33 = vmul.f32 %v5561_v56, %v5989_v37  ;;  %v6038_v36 = vmul.f32 %v5559_v55, %v5991_v34 }
 0x124   : > { %4875 = vmatprep.mubr.msk.bf16.mxu1 %vm747_vm0, %v1823_v6  ;;  %v6044_v6 = vld [vmem:[#allocation2 + $0xd1] sm:$0xff]  ;;  %7507 = vst [vmem:[#allocation106_spill] sm:$0xff] %v6052_v13  ;;  %v1796_v62 = vmul.f32 %v5532_v44, %v1571_v12  ;;  %7509 = vst [vmem:[#allocation108_spill] sm:$0xff] %v6064_v38  ;;  %v7516_v12 = vld [vmem:[#allocation5_spill] sm:$0xff]  ;;  %v6125_v11 = vmul.f32 %v6097_v35, %v5835_v57 }
 0x125   : > { %7504 = vst [vmem:[#allocation103_spill] sm:$0xff] %v6034_v33  ;;  %7505 = vst [vmem:[#allocation104_spill] sm:$0xff] %v6038_v36  ;;  %4870 = vmatmul.mubr.msk.bf16.gmra.mxu0 %vm747_vm0, %v1089_v52  ;;  %v6070_v52 = vld [vmem:[#allocation2 + $0xf1] sm:$0xff]  ;;  %v2119_v33 = vmul.f32 %v7510_v43, %v5661_v14  ;;  %v2120_v39 = vmul.f32 %v7516_v12, %v7515_v19  ;;  %v6095_v36 = vld [vmem:[%s7252_s4 + $0xc] sm:$0x3]  ;;  %v6107_v19 = vmul.f32 %v5743_v25, %v6068_v23 }
 0x126   : > { %4909 = vmatprep.mubr.msk.bf16.mxu0 %vm747_vm0, %v2149_v21  ;;  %v7511_v44 = vld [vmem:[#allocation48_spill] sm:$0xff]  ;;  %v7513_v21 = vld [vmem:[#allocation47_spill] sm:$0xff]  ;;  %v1825_v38 = vpack.c.bf16 %v1796_v62, %v1795_v2 }
 0x127   : > { %v6080_v60 = vmul.f32 %v7511_v44, %v6042_v28  ;;  %v6084_v7 = vmul.f32 %v7513_v21, %v6044_v6  ;;  %v7517_v14 = vld [vmem:[#allocation11_spill] sm:$0xff]  ;;  %v6099_v13 = vld [vmem:[#allocation2 + $0x39] sm:$0xff]  ;;  %7518 = vst [vmem:[#allocation51_spill] sm:$0xff] %v6107_v19  ;;  %v2150_v4 = vpack.c.bf16 %v2120_v39, %v2119_v33  ;;  %v6140_v39 = vld [vmem:[%s7252_s4 + $0xe] sm:$0x3] }
 0x128   : > { %v2122_v43 = vmul.f32 %v7517_v14, %v5717_v54  ;;  %v7519_v54 = vld [vmem:[#allocation64_spill] sm:$0xff]  ;;  %v7526_v33 = vld [vmem:[#allocation23_spill] sm:$0xff] }
 0x129   : > { %7512 = vst [vmem:[#allocation109_spill] sm:$0xff] %v6080_v60  ;;  %7514 = vst [vmem:[#allocation110_spill] sm:$0xff] %v6084_v7  ;;  %v6111_v30 = vmul.f32 %v7519_v54, %v6070_v52  ;;  %v6113_v14 = vld [vmem:[#allocation2 + $0x111] sm:$0xff]  ;;  %v2836_v60 = vsel %vm1189_vm2, %v7523_v24, 0  ;;  %v7528_v7 = vld [vmem:[#allocation61_spill] sm:$0xff] }
 0x12a   : > { %v7521_v2 = vld [vmem:[#allocation56_spill] sm:$0xff] }
 0x12b   : > { %7520 = vst [vmem:[#allocation111_spill] sm:$0xff] %v6111_v30  ;;  %4876 = vmatmul.mubr.msk.bf16.vlgmr.msra.gmra.mxu1 %vm747_vm0, %v1824_v45  ;;  %v7522_v62 = vld [vmem:[#allocation12_spill] sm:$0xff]  ;;  %7524 = vst [vmem:[#allocation56_spill] sm:$0xff] %v6125_v11  ;;  %v1797_v45 = vmul.f32 %v5538_v47, %v6099_v13 }
 0x12c   : > { %v2121_v12 = vmul.f32 %v7522_v62, %v7521_v2  ;;  %4942 = vmatpush3.bf16.msra.mxu1 %v2510_v3  ;;  %4879 = vmatprep.mubr.msk.bf16.mxu1 %vm747_vm0, %v1825_v38  ;;  %v1798_v3 = vmul.f32 %v5536_v46, %v6101_v16  ;;  %v6135_v38 = vmul.f32 %v6113_v14, %v5833_v50  ;;  %v7527_v24 = vld [vmem:[#allocation24_spill] sm:$0xff]  ;;  %v7529_v46 = vld [vmem:[#allocation14_spill] sm:$0xff] }
 0x12d   : > { %5117 = vmatprep.subr.msk.bf16.mxu1 %vm1189_vm2, %v6095_v36  ;;  %4910 = vmatmul.mubr.msk.bf16.vlgmr.msra.gmra.mxu0 %vm747_vm0, %v2150_v4  ;;  %v1799_v2 = vmul.f32 %v7527_v24, %v5955_v59  ;;  %v2123_v47 = vmul.f32 %v7529_v46, %v7528_v7  ;;  %v7530_v4 = vld [vmem:[#allocation19_spill] sm:$0xff]  ;;  %v7531_v30 = vld [vmem:[#allocation60_spill] sm:$0xff]  ;;  %v7533_v59 = vld [vmem:[#allocation66_spill] sm:$0xff] }
 0x12e   : > { %v2151_v18 = vpack.c.bf16 %v2122_v43, %v2121_v12  ;;  %7525 = vst [vmem:[#allocation57_spill] sm:$0xff] %v6135_v38  ;;  %v1800_v43 = vmul.f32 %v7526_v33, %v5957_v31  ;;  %4976 = vmatpush3.bf16.msra.mxu0 %v2836_v60  ;;  %v1826_v62 = vpack.c.bf16 %v1798_v3, %v1797_v45  ;;  %v6158_v33 = vld [vmem:[#allocation2 + $0x59] sm:$0xff]  ;;  %v6160_v12 = vld [vmem:[#allocation2 + $0x61] sm:$0xff] }
 0x12f   : > { %5118 = vmatprep.subr.msk.bf16.mxu0 %vm1189_vm2, %v6140_v39  ;;  %v2126_v19 = vmul.f32 %v7530_v4, %v5765_v41  ;;  %v7534_v11 = vld [vmem:[#allocation20_spill] sm:$0xff]  ;;  %v1801_v41 = vmul.f32 %v5561_v56, %v6158_v33  ;;  %v1802_v3 = vmul.f32 %v5559_v55, %v6160_v12  ;;  %v7539_v56 = vld [vmem:[#allocation27_spill] sm:$0xff]  ;;  %v6184_v38 = vld [vmem:[#allocation2 + $0x81] sm:$0xff] }
 0x130   : > { %4913 = vmatprep.mubr.msk.bf16.mxu0 %vm747_vm0, %v2151_v18  ;;  %v1827_v31 = vpack.c.bf16 %v1800_v43, %v1799_v2  ;;  %v7532_v18 = vld [vmem:[#allocation13_spill] sm:$0xff]  ;;  %v2125_v7 = vmul.f32 %v7534_v11, %v7533_v59  ;;  %v7536_v2 = vld [vmem:[#allocation32_spill] sm:$0xff]  ;;  %v2130_v4 = vmul.f32 %v7539_v56, %v5811_v26  ;;  %v7540_v11 = vld [vmem:[#allocation67_spill] sm:$0xff] }
 0x131   : > { %v2124_v60 = vmul.f32 %v7532_v18, %v7531_v30  ;;  %v7535_v30 = vld [vmem:[#allocation31_spill] sm:$0xff]  ;;  %v1803_v59 = vmul.f32 %v7536_v2, %v5989_v37  ;;  %v6180_v55 = vld [vmem:[#allocation2 + $0x79] sm:$0xff] }
 0x132   : > { %v2153_v45 = vpack.c.bf16 %v2126_v19, %v2125_v7  ;;  %v1804_v43 = vmul.f32 %v7535_v30, %v5991_v34  ;;  %v1828_v7 = vpack.c.bf16 %v1802_v3, %v1801_v41  ;;  %v7541_v18 = vld [vmem:[#allocation21_spill] sm:$0xff]  ;;  %v7543_v41 = vld [vmem:[#allocation71_spill] sm:$0xff]  ;;  %v7544_v3 = vld [vmem:[#allocation28_spill] sm:$0xff] }
 0x133   : > { %4880 = vmatmul.mubr.msk.bf16.gmra.mxu1 %vm747_vm0, %v1826_v62  ;;  %v2152_v46 = vpack.c.bf16 %v2124_v60, %v2123_v47  ;;  %v3062_v62 = vld [vmem:[#allocation2 + $0x11f] sm:$0xff]  ;;  %v7538_v47 = vld [vmem:[#allocation22_spill] sm:$0xff]  ;;  %v3061_v60 = vld [vmem:[#allocation2 + $0x117] sm:$0xff]  ;;  %v2128_v34 = vmul.f32 %v7541_v18, %v7540_v11  ;;  %v2129_v26 = vmul.f32 %v7544_v3, %v7543_v41 }
 0x134   : > { %4883 = vmatprep.mubr.msk.bf16.mxu1 %vm747_vm0, %v1827_v31  ;;  %v7537_v31 = vld [vmem:[#allocation68_spill] sm:$0xff]  ;;  %v6191_v37 = vmul.f32 %v3062_v62, %v5787_v10  ;;  %v6201_v11 = vmul.f32 %v3061_v60, %v5789_v48  ;;  %v7546_v48 = vld [vmem:[#allocation38_spill] sm:$0xff] }
 0x135   : > { %4914 = vmatmul.mubr.msk.bf16.gmra.mxu0 %vm747_vm0, %v2152_v46  ;;  %v2127_v19 = vmul.f32 %v7538_v47, %v7537_v31  ;;  %v1829_v46 = vpack.c.bf16 %v1804_v43, %v1803_v59  ;;  %v6198_v43 = vmul.f32 %v5973_v51, %v5759_v32  ;;  %v2155_v10 = vpack.c.bf16 %v2130_v4, %v2129_v26  ;;  %v7547_v31 = vld [vmem:[#allocation39_spill] sm:$0xff]  ;;  %v7548_v4 = vld [vmem:[#allocation30_spill] sm:$0xff]  ;;  %v7550_v26 = vld [vmem:[#allocation29_spill] sm:$0xff] }
 0x136   : > { %4917 = vmatprep.mubr.msk.bf16.mxu0 %vm747_vm0, %v2153_v45  ;;  %v6188_v45 = vmul.f32 %v5999_v58, %v5761_v61  ;;  %7542 = vst [vmem:[#allocation24_spill] sm:$0xff] %v6191_v37  ;;  %7545 = vst [vmem:[#allocation61_spill] sm:$0xff] %v6201_v11  ;;  %v1805_v61 = vmul.f32 %v5577_v0, %v6180_v55  ;;  %v1806_v58 = vmul.f32 %v5575_v63, %v6184_v38  ;;  %v7549_v41 = vld [vmem:[#allocation74_spill] sm:$0xff]  ;;  %v6258_v63 = vld [vmem:[#allocation2 + $0xb9] sm:$0xff] }
 0x137   : > { %v2154_v59 = vpack.c.bf16 %v2128_v34, %v2127_v19  ;;  %v1808_v51 = vmul.f32 %v7546_v48, %v6005_v53  ;;  %v1807_v19 = vmul.f32 %v7547_v31, %v6003_v29  ;;  %v2131_v60 = vmul.f32 %v7548_v4, %v5815_v49  ;;  %v6226_v62 = vld [vmem:[#allocation2 + $0xa1] sm:$0xff]  ;;  %v7551_v53 = vld [vmem:[#allocation35_spill] sm:$0xff] }
 0x138   : > { %v2132_v32 = vmul.f32 %v7550_v26, %v7549_v41  ;;  %v2133_v29 = vmul.f32 %v7551_v53, %v5850_v40  ;;  %v7555_v40 = vld [vmem:[#allocation72_spill] sm:$0xff]  ;;  %v6284_v11 = vld [vmem:[#allocation2 + $0xe1] sm:$0xff] }
 0x139   : > { %v1831_v34 = vpack.c.bf16 %v1808_v51, %v1807_v19  ;;  %v7553_v19 = vld [vmem:[#allocation73_spill] sm:$0xff] }
 0x13a   : > { %v2156_v49 = vpack.c.bf16 %v2132_v32, %v2131_v60  ;;  %v6246_v32 = vmul.f32 %v6113_v14, %v7555_v40  ;;  %v7557_v60 = vld [vmem:[#allocation46_spill] sm:$0xff] }
 0x13b   : > { %4884 = vmatmul.mubr.msk.bf16.gmra.mxu1 %vm747_vm0, %v1828_v7  ;;  %v1830_v7 = vpack.c.bf16 %v1806_v58, %v1805_v61  ;;  %v7552_v58 = vld [vmem:[#allocation45_spill] sm:$0xff] }
 0x13c   : > { %4887 = vmatprep.mubr.msk.bf16.mxu1 %vm747_vm0, %v1829_v46  ;;  %v2134_v46 = vmul.f32 %v5579_v1, %v5861_v15  ;;  %v1812_v51 = vmul.f32 %v7552_v58, %v6023_v20  ;;  %7556 = vst [vmem:[#allocation66_spill] sm:$0xff] %v6246_v32  ;;  %v2138_v20 = vmul.f32 %v5608_v17, %v5899_v42  ;;  %v6260_v14 = vld [vmem:[#allocation2 + $0xc1] sm:$0xff] }
 0x13d   : > { %4918 = vmatmul.mubr.msk.bf16.gmra.mxu0 %vm747_vm0, %v2154_v59  ;;  %v6224_v59 = vld [vmem:[#allocation2 + $0x99] sm:$0xff] }
 0x13e   : > { %4921 = vmatprep.mubr.msk.bf16.mxu0 %vm747_vm0, %v2155_v10  ;;  %v2157_v61 = vpack.c.bf16 %v2134_v46, %v2133_v29  ;;  %v1809_v15 = vmul.f32 %v5598_v9, %v6224_v59  ;;  %v1810_v10 = vmul.f32 %v5596_v8, %v6226_v62  ;;  %v1811_v46 = vmul.f32 %v7557_v60, %v6021_v27  ;;  %v7559_v8 = vld [vmem:[#allocation79_spill] sm:$0xff]  ;;  %v7561_v27 = vld [vmem:[#allocation42_spill] sm:$0xff] }
 0x140   : > { %v1832_v29 = vpack.c.bf16 %v1810_v10, %v1809_v15  ;;  %v1813_v10 = vmul.f32 %v7511_v44, %v6258_v63  ;;  %v7568_v44 = vld [vmem:[#allocation82_spill] sm:$0xff] }
 0x143   : > { %4888 = vmatmul.mubr.msk.bf16.gmra.mxu1 %vm747_vm0, %v1830_v7  ;;  %v6241_v7 = vmul.f32 %v6097_v35, %v7553_v19  ;;  %v7564_v35 = vld [vmem:[#allocation83_spill] sm:$0xff] }
 0x144   : > { %4891 = vmatprep.mubr.msk.bf16.mxu1 %vm747_vm0, %v1831_v34  ;;  %v7558_v34 = vld [vmem:[#allocation37_spill] sm:$0xff] }
 0x145   : > { %4922 = vmatmul.mubr.msk.bf16.gmra.mxu0 %vm747_vm0, %v2156_v49  ;;  %7554 = vst [vmem:[#allocation60_spill] sm:$0xff] %v6241_v7  ;;  %v2135_v41 = vmul.f32 %v7558_v34, %v5865_v5  ;;  %v1833_v49 = vpack.c.bf16 %v1812_v51, %v1811_v46  ;;  %v2137_v5 = vmul.f32 %v7561_v27, %v5890_v22 }
 0x146   : > { %4925 = vmatprep.mubr.msk.bf16.mxu0 %vm747_vm0, %v2157_v61  ;;  %v7560_v61 = vld [vmem:[#allocation36_spill] sm:$0xff]  ;;  %v1814_v51 = vmul.f32 %v7513_v21, %v6260_v14  ;;  %v7569_v21 = vld [vmem:[#allocation43_spill] sm:$0xff] }
 0x147   : > { %v2136_v9 = vmul.f32 %v7560_v61, %v7559_v8  ;;  %v2159_v42 = vpack.c.bf16 %v2138_v20, %v2137_v5  ;;  %v7562_v8 = vld [vmem:[#allocation58_spill] sm:$0xff]  ;;  %v7566_v20 = vld [vmem:[#allocation88_spill] sm:$0xff]  ;;  %v7567_v5 = vld [vmem:[#allocation49_spill] sm:$0xff]  ;;  %v2140_v0 = vmul.f32 %v7569_v21, %v7568_v44  ;;  %v1820_v44 = vmul.f32 %v7555_v40, %v6070_v52 }
 0x148   : > { %v1816_v46 = vmul.f32 %v7562_v8, %v6044_v6  ;;  %v2142_v7 = vmul.f32 %v7567_v5, %v7566_v20  ;;  %v7570_v6 = vld [vmem:[#allocation86_spill] sm:$0xff]  ;;  %v7574_v20 = vld [vmem:[#allocation87_spill] sm:$0xff] }
 0x149   : > { %v2158_v15 = vpack.c.bf16 %v2136_v9, %v2135_v41  ;;  %v1834_v41 = vpack.c.bf16 %v1814_v51, %v1813_v10 }
 0x14b   : > { %4892 = vmatmul.mubr.msk.bf16.gmra.mxu1 %vm747_vm0, %v1832_v29  ;;  %v7563_v29 = vld [vmem:[#allocation59_spill] sm:$0xff] }
 0x14c   : > { %4895 = vmatprep.mubr.msk.bf16.mxu1 %vm747_vm0, %v1833_v49  ;;  %v1815_v22 = vmul.f32 %v7563_v29, %v6042_v28  ;;  %v7565_v49 = vld [vmem:[#allocation44_spill] sm:$0xff] }
 0x14d   : > { %4926 = vmatmul.mubr.msk.bf16.gmra.mxu0 %vm747_vm0, %v2158_v15  ;;  %v2139_v9 = vmul.f32 %v7565_v49, %v7564_v35  ;;  %v6282_v15 = vld [vmem:[#allocation2 + $0xd9] sm:$0xff] }
 0x14e   : > { %4929 = vmatprep.mubr.msk.bf16.mxu0 %vm747_vm0, %v2159_v42  ;;  %v1835_v32 = vpack.c.bf16 %v1816_v46, %v1815_v22  ;;  %v7571_v42 = vld [vmem:[#allocation50_spill] sm:$0xff]  ;;  %v1817_v51 = vmul.f32 %v5743_v25, %v6282_v15  ;;  %v1818_v46 = vmul.f32 %v7519_v54, %v6284_v11  ;;  %v1819_v22 = vmul.f32 %v7553_v19, %v6068_v23  ;;  %v6304_v25 = vld [vmem:[#allocation2 + $0xf9] sm:$0xff] }
 0x14f   : > { %v2141_v28 = vmul.f32 %v7571_v42, %v7570_v6  ;;  %v2160_v35 = vpack.c.bf16 %v2140_v0, %v2139_v9  ;;  %v7575_v6 = vld [vmem:[#allocation54_spill] sm:$0xff]  ;;  %v1821_v23 = vmul.f32 %v5835_v57, %v6304_v25  ;;  %v7583_v57 = vld [vmem:[#allocation52_spill] sm:$0xff] }
 0x150   : > { %v1837_v9 = vpack.c.bf16 %v1820_v44, %v1819_v22  ;;  %v6306_v54 = vld [vmem:[#allocation2 + $0x101] sm:$0xff] }
 0x151   : > { %v2161_v10 = vpack.c.bf16 %v2142_v7, %v2141_v28  ;;  %v1836_v7 = vpack.c.bf16 %v1818_v46, %v1817_v51  ;;  %v2144_v28 = vmul.f32 %v7575_v6, %v7574_v20  ;;  %v7577_v51 = vld [vmem:[#allocation98_spill] sm:$0xff]  ;;  %v7581_v20 = vld [vmem:[#allocation100_spill] sm:$0xff] }
 0x152   : > { %v7579_v22 = vld [vmem:[#allocation94_spill] sm:$0xff] }
 0x153   : > { %4896 = vmatmul.mubr.msk.bf16.gmra.mxu1 %vm747_vm0, %v1834_v41  ;;  %v7572_v41 = vld [vmem:[#allocation89_spill] sm:$0xff] }
 0x154   : > { %4899 = vmatprep.mubr.msk.bf16.mxu1 %vm747_vm0, %v1835_v32  ;;  %v7573_v32 = vld [vmem:[#allocation55_spill] sm:$0xff] }
 0x155   : > { %4930 = vmatmul.mubr.msk.bf16.gmra.mxu0 %vm747_vm0, %v2160_v35  ;;  %v2143_v0 = vmul.f32 %v7573_v32, %v7572_v41  ;;  %v1822_v35 = vmul.f32 %v5833_v50, %v6306_v54  ;;  %v7580_v41 = vld [vmem:[#allocation8_spill] sm:$0xff] }
 0x156   : > { %4933 = vmatprep.mubr.msk.bf16.mxu0 %vm747_vm0, %v2161_v10  ;;  %v7576_v10 = vld [vmem:[#allocation99_spill] sm:$0xff] }
 0x157   : > { %v2162_v52 = vpack.c.bf16 %v2144_v28, %v2143_v0  ;;  %v7578_v46 = vpack.c.bf16 %v7576_v10, %v7577_v51  ;;  %v1838_v44 = vpack.c.bf16 %v1822_v35, %v1821_v23  ;;  %v7584_v28 = vld [vmem:[#allocation102_spill] sm:$0xff]  ;;  %v3162_v23 = vsel %vm1189_vm2, %v6095_v36, 0  ;;  %v7587_v35 = vld [vmem:[#allocation16_spill] sm:$0xff]  ;;  %v7588_v51 = vld [vmem:[#allocation15_spill] sm:$0xff] }
 0x158   : > { %v2741_v10 = vmul.f32 %v7587_v35, %v6099_v13  ;;  %v3456_v36 = vsel %vm1189_vm2, %v6140_v39, 0  ;;  %v7591_v13 = vld [vmem:[#allocation93_spill] sm:$0xff] }
 0x159   : > { %v7596_v39 = vld [vmem:[#allocation69_spill] sm:$0xff] }
 0x15b   : > { %4900 = vmatmul.mubr.msk.bf16.gmra.mxu1 %vm747_vm0, %v1836_v7  ;;  %v2737_v7 = vmul.f32 %v7580_v41, %v7579_v22  ;;  %v7589_v22 = vld [vmem:[#allocation53_spill] sm:$0xff] }
 0x15c   : > { %4903 = vmatprep.mubr.msk.bf16.mxu1 %vm747_vm0, %v1837_v9  ;;  %v7582_v9 = vld [vmem:[#allocation7_spill] sm:$0xff] }
 0x15d   : > { %4934 = vmatmul.mubr.msk.bf16.gmra.mxu0 %vm747_vm0, %v2162_v52  ;;  %v2738_v0 = vmul.f32 %v7582_v9, %v7581_v20  ;;  %v7585_v52 = vld [vmem:[#allocation101_spill] sm:$0xff] }
 0x15e   : > { %4937 = vmatprep.mubr.msk.bf16.mxu0 %vm747_vm0, %v7578_v46  ;;  %v7586_v37 = vpack.c.bf16 %v7584_v28, %v7585_v52  ;;  %v2742_v46 = vmul.f32 %v7588_v51, %v6101_v16  ;;  %v7592_v16 = vld [vmem:[#allocation92_spill] sm:$0xff]  ;;  %v7595_v28 = vld [vmem:[#allocation63_spill] sm:$0xff] }
 0x15f   : > { %v2769_v50 = vpack.c.bf16 %v2738_v0, %v2737_v7  ;;  %v7593_v20 = vpack.c.bf16 %v7591_v13, %v7592_v16  ;;  %v2745_v0 = vmul.f32 %v7527_v24, %v6158_v33  ;;  %v2749_v33 = vmul.f32 %v7536_v2, %v6180_v55  ;;  %v7603_v13 = vld [vmem:[#allocation103_spill] sm:$0xff] }
 0x160   : > { %v2771_v7 = vpack.c.bf16 %v2742_v46, %v2741_v10  ;;  %v7598_v10 = vld [vmem:[#allocation95_spill] sm:$0xff]  ;;  %v2753_v55 = vmul.f32 %v7547_v31, %v6224_v59  ;;  %v2757_v59 = vmul.f32 %v7557_v60, %v6258_v63  ;;  %v2761_v63 = vmul.f32 %v7563_v29, %v6282_v15 }
 0x161   : > { %v2765_v15 = vmul.f32 %v7553_v19, %v6304_v25  ;;  %v7626_v19 = vld [vmem:[#allocation6_spill] sm:$0xff] }
 0x163   : > { %4904 = vmatmul.mubr.msk.bf16.gmra.mxu1 %vm747_vm0, %v1838_v44  ;;  %v6340_v44 = vld [vmem:[%s7252_s4 + $0x10] sm:$0x3] }
 0x164   : > { %4943 = vmatprep.mubr.msk.bf16.mxu1 %vm747_vm0, %v7583_v57  ;;  %v7594_v57 = vld [vmem:[#allocation23_spill] sm:$0xff] }
 0x165   : > { %4938 = vmatmul.mubr.msk.bf16.gmra.mxu0 %vm747_vm0, %v7586_v37  ;;  %v7590_v37 = vld [vmem:[#allocation62_spill] sm:$0xff] }
 0x166   : > { %4977 = vmatprep.mubr.msk.bf16.mxu0 %vm747_vm0, %v2769_v50  ;;  %v2746_v50 = vmul.f32 %v7594_v57, %v6160_v12  ;;  %v2750_v12 = vmul.f32 %v7535_v30, %v6184_v38  ;;  %v2754_v38 = vmul.f32 %v7546_v48, %v6226_v62  ;;  %v2758_v62 = vmul.f32 %v7552_v58, %v6260_v14 }
 0x167   : > { %v2762_v14 = vmul.f32 %v7562_v8, %v6284_v11  ;;  %v2766_v11 = vmul.f32 %v7555_v40, %v6306_v54  ;;  %v2441_v54 = vld [vmem:[#allocation2 + $0x108] sm:$0xff] }
 0x168   : > { %v2773_v52 = vpack.c.bf16 %v2746_v50, %v2745_v0  ;;  %v7606_v0 = vld [vmem:[#allocation80_spill] sm:$0xff]  ;;  %v2777_v50 = vpack.c.bf16 %v2754_v38, %v2753_v55  ;;  %v7620_v38 = vld [vmem:[#allocation91_spill] sm:$0xff] }
 0x16b   : > { %4944 = vmatmul.mubr.msk.bf16.vlgmr.msra.gmra.mxu1 %vm747_vm0, %v7589_v22  ;;  %v7600_v22 = vld [vmem:[#allocation70_spill] sm:$0xff] }
 0x16c   : > { %5010 = vmatpush3.bf16.msra.mxu1 %v3162_v23  ;;  %4947 = vmatprep.mubr.msk.bf16.mxu1 %vm747_vm0, %v7590_v37  ;;  %v7597_v23 = vld [vmem:[#allocation96_spill] sm:$0xff]  ;;  %v7601_v37 = vld [vmem:[#allocation75_spill] sm:$0xff] }
 0x16d   : > { %5119 = vmatprep.subr.msk.bf16.mxu1 %vm1189_vm2, %v6340_v44  ;;  %4978 = vmatmul.mubr.msk.bf16.vlgmr.msra.gmra.mxu0 %vm747_vm0, %v7593_v20  ;;  %v7599_v46 = vpack.c.bf16 %v7597_v23, %v7598_v10  ;;  %v7605_v20 = vld [vmem:[#allocation76_spill] sm:$0xff]  ;;  %v7610_v23 = vld [vmem:[#allocation81_spill] sm:$0xff] }
 0x16e   : > { %4981 = vmatprep.mubr.msk.bf16.mxu0 %vm747_vm0, %v2771_v7  ;;  %5044 = vmatpush3.bf16.msra.mxu0 %v3456_v36  ;;  %v2775_v36 = vpack.c.bf16 %v2750_v12, %v2749_v33  ;;  %v7602_v7 = vld [vmem:[#allocation104_spill] sm:$0xff]  ;;  %v7613_v12 = vld [vmem:[#allocation107_spill] sm:$0xff] }
 0x16f   : > { %v7604_v16 = vpack.c.bf16 %v7602_v7, %v7603_v13  ;;  %v7611_v10 = vld [vmem:[#allocation84_spill] sm:$0xff]  ;;  %v2781_v7 = vpack.c.bf16 %v2762_v14, %v2761_v63  ;;  %v7617_v13 = vld [vmem:[#allocation110_spill] sm:$0xff] }
 0x170   : > { %v7612_v33 = vld [vmem:[#allocation108_spill] sm:$0xff]  ;;  %v3357_v63 = vld [vmem:[#allocation2 + $0x28] sm:$0xff] }
 0x171   : > { %v3033_v14 = vld [vmem:[#allocation2 + $0x37] sm:$0xff] }
 0x173   : > { %4948 = vmatmul.mubr.msk.bf16.gmra.mxu1 %vm747_vm0, %v7595_v28  ;;  %v7607_v28 = vld [vmem:[#allocation106_spill] sm:$0xff] }
 0x174   : > { %4951 = vmatprep.mubr.msk.bf16.mxu1 %vm747_vm0, %v7596_v39  ;;  %v7608_v39 = vld [vmem:[#allocation105_spill] sm:$0xff] }
 0x175   : > { %4982 = vmatmul.mubr.msk.bf16.gmra.mxu0 %vm747_vm0, %v7599_v46  ;;  %v2779_v46 = vpack.c.bf16 %v2758_v62, %v2757_v59  ;;  %v2442_v62 = vld [vmem:[#allocation2 + $0x110] sm:$0xff] }
 0x176   : > { %4985 = vmatprep.mubr.msk.bf16.mxu0 %vm747_vm0, %v2773_v52  ;;  %v7609_v52 = vpack.c.bf16 %v7607_v28, %v7608_v39  ;;  %v3032_v28 = vld [vmem:[#allocation2 + $0x2f] sm:$0xff] }
 0x177   : > { %v7622_v39 = vld [vmem:[#allocation111_spill] sm:$0xff]  ;;  %v3064_v40 = vmul.f32 %v3032_v28, %v7626_v19  ;;  %v3359_v19 = vld [vmem:[#allocation2 + $0x38] sm:$0xff] }
 0x17b   : > { %4952 = vmatmul.mubr.msk.bf16.gmra.mxu1 %vm747_vm0, %v7600_v22  ;;  %v7614_v22 = vpack.c.bf16 %v7612_v33, %v7613_v12  ;;  %v3358_v33 = vld [vmem:[#allocation2 + $0x30] sm:$0xff]  ;;  %v3034_v12 = vld [vmem:[#allocation2 + $0x3f] sm:$0xff] }
 0x17c   : > { %4955 = vmatprep.mubr.msk.bf16.mxu1 %vm747_vm0, %v7601_v37  ;;  %v7615_v37 = vld [vmem:[#allocation85_spill] sm:$0xff] }
 0x17d   : > { %4986 = vmatmul.mubr.msk.bf16.gmra.mxu0 %vm747_vm0, %v7604_v16  ;;  %v7618_v16 = vld [vmem:[#allocation109_spill] sm:$0xff] }
 0x17e   : > { %4989 = vmatprep.mubr.msk.bf16.mxu0 %vm747_vm0, %v2775_v36  ;;  %v7616_v36 = vld [vmem:[#allocation90_spill] sm:$0xff]  ;;  %v7619_v55 = vpack.c.bf16 %v7617_v13, %v7618_v16  ;;  %v7628_v16 = vld [vmem:[#allocation57_spill] sm:$0xff] }
 0x17f   : > { %v3036_v13 = vld [vmem:[#allocation2 + $0x4f] sm:$0xff] }
 0x183   : > { %4956 = vmatmul.mubr.msk.bf16.gmra.mxu1 %vm747_vm0, %v7605_v20  ;;  %v3031_v20 = vld [vmem:[#allocation2 + $0x27] sm:$0xff] }
 0x184   : > { %4959 = vmatprep.mubr.msk.bf16.mxu1 %vm747_vm0, %v7606_v0  ;;  %v7621_v0 = vld [vmem:[#allocation97_spill] sm:$0xff] }
 0x185   : > { %4990 = vmatmul.mubr.msk.bf16.gmra.mxu0 %vm747_vm0, %v7609_v52  ;;  %v7623_v52 = vld [vmem:[#allocation51_spill] sm:$0xff] }
 0x186   : > { %4993 = vmatprep.mubr.msk.bf16.mxu0 %vm747_vm0, %v2777_v50  ;;  %v2783_v50 = vpack.c.bf16 %v2766_v11, %v2765_v15  ;;  %v7624_v59 = vpack.c.bf16 %v7622_v39, %v7623_v52  ;;  %v7631_v11 = vld [vmem:[#allocation12_spill] sm:$0xff]  ;;  %v3782_v52 = vsel %vm1189_vm2, %v6340_v44, 0  ;;  %v3040_v44 = vld [vmem:[#allocation2 + $0x6f] sm:$0xff] }
 0x18b   : > { %4960 = vmatmul.mubr.msk.bf16.gmra.mxu1 %vm747_vm0, %v7610_v23  ;;  %v7625_v23 = vld [vmem:[#allocation4_spill] sm:$0xff] }
 0x18c   : > { %4963 = vmatprep.mubr.msk.bf16.mxu1 %vm747_vm0, %v7611_v10  ;;  %v3063_v25 = vmul.f32 %v3031_v20, %v7625_v23  ;;  %v6435_v10 = vpack.c.bf16 %v2442_v62, %v2441_v54  ;;  %v7632_v20 = vld [vmem:[#allocation3_spill] sm:$0xff] }
 0x18d   : > { %4994 = vmatmul.mubr.msk.bf16.gmra.mxu0 %vm747_vm0, %v7614_v22  ;;  %v3035_v22 = vld [vmem:[#allocation2 + $0x47] sm:$0xff]  ;;  %v3362_v23 = vld [vmem:[#allocation2 + $0x50] sm:$0xff] }
 0x18e   : > { %4997 = vmatprep.mubr.msk.bf16.mxu0 %vm747_vm0, %v2779_v46  ;;  %v3095_v46 = vpack.c.bf16 %v3064_v40, %v3063_v25  ;;  %v3038_v25 = vld [vmem:[#allocation2 + $0x5f] sm:$0xff]  ;;  %v3039_v40 = vld [vmem:[#allocation2 + $0x67] sm:$0xff] }
 0x193   : > { %4964 = vmatmul.mubr.msk.bf16.gmra.mxu1 %vm747_vm0, %v7615_v37  ;;  %v3389_v37 = vpack.c.bf16 %v3358_v33, %v3357_v63  ;;  %v3361_v33 = vld [vmem:[#allocation2 + $0x48] sm:$0xff] }
 0x194   : > { %4967 = vmatprep.mubr.msk.bf16.mxu1 %vm747_vm0, %v7616_v36  ;;  %v7627_v36 = vld [vmem:[#allocation5_spill] sm:$0xff]  ;;  %v3391_v63 = vpack.c.bf16 %v3362_v23, %v3361_v33  ;;  %v3366_v23 = vld [vmem:[#allocation2 + $0x70] sm:$0xff] }
 0x195   : > { %4998 = vmatmul.mubr.msk.bf16.gmra.mxu0 %vm747_vm0, %v7619_v55  ;;  %v7629_v55 = vld [vmem:[#allocation56_spill] sm:$0xff] }
 0x196   : > { %5001 = vmatprep.mubr.msk.bf16.mxu0 %vm747_vm0, %v2781_v7  ;;  %v3066_v7 = vmul.f32 %v3034_v12, %v7627_v36  ;;  %v7630_v15 = vpack.c.bf16 %v7628_v16, %v7629_v55  ;;  %v3037_v12 = vld [vmem:[#allocation2 + $0x57] sm:$0xff] }
 0x19b   : > { %4968 = vmatmul.mubr.msk.bf16.gmra.mxu1 %vm747_vm0, %v7620_v38  ;;  %v3067_v38 = vmul.f32 %v3035_v22, %v7631_v11 }
 0x19c   : > { %4971 = vmatprep.mubr.msk.bf16.mxu1 %vm747_vm0, %v7621_v0  ;;  %v3065_v0 = vmul.f32 %v3033_v14, %v7632_v20  ;;  %v7634_v14 = vld [vmem:[#allocation13_spill] sm:$0xff]  ;;  %v7637_v20 = vld [vmem:[#allocation19_spill] sm:$0xff] }
 0x19d   : > { %5002 = vmatmul.mubr.msk.bf16.gmra.mxu0 %vm747_vm0, %v7624_v59  ;;  %v3360_v59 = vld [vmem:[#allocation2 + $0x40] sm:$0xff] }
 0x19e   : > { %5005 = vmatprep.mubr.msk.bf16.mxu0 %vm747_vm0, %v2783_v50  ;;  %v7633_v50 = vld [vmem:[#allocation11_spill] sm:$0xff]  ;;  %v3096_v39 = vpack.c.bf16 %v3066_v7, %v3065_v0  ;;  %v7635_v7 = vld [vmem:[#allocation20_spill] sm:$0xff]  ;;  %v3072_v0 = vmul.f32 %v3040_v44, %v7637_v20 }
 0x19f   : > { %v3068_v28 = vmul.f32 %v3036_v13, %v7633_v50  ;;  %v3071_v13 = vmul.f32 %v3039_v40, %v7635_v7  ;;  %v3363_v40 = vld [vmem:[#allocation2 + $0x58] sm:$0xff]  ;;  %v3044_v7 = vld [vmem:[#allocation2 + $0x8f] sm:$0xff] }
 0x1a1   : > { %v3097_v62 = vpack.c.bf16 %v3068_v28, %v3067_v38 }
 0x1a3   : > { %4972 = vmatmul.mubr.msk.bf16.gmra.mxu1 %vm747_vm0, %v6435_v10 }
 0x1a4   : > { %5011 = vmatprep.mubr.msk.bf16.mxu1 %vm747_vm0, %v3095_v46  ;;  %v3390_v46 = vpack.c.bf16 %v3360_v59, %v3359_v19 }
 0x1a5   : > { %5006 = vmatmul.mubr.msk.bf16.gmra.mxu0 %vm747_vm0, %v7630_v15  ;;  %v7636_v15 = vld [vmem:[#allocation14_spill] sm:$0xff] }
 0x1a6   : > { %5045 = vmatprep.mubr.msk.bf16.mxu0 %vm747_vm0, %v3389_v37  ;;  %v3070_v37 = vmul.f32 %v3038_v25, %v7634_v14  ;;  %v3069_v11 = vmul.f32 %v3037_v12, %v7636_v15  ;;  %v3042_v25 = vld [vmem:[#allocation2 + $0x7f] sm:$0xff] }
 0x1aa   : > { %v4809_v54 = vpop.f32.mrf.mxu1 }
 0x1ab   : > { %5012 = vmatmul.mubr.msk.bf16.vlgmr.msra.gmra.mxu1 %vm747_vm0, %v3096_v39  ;;  %v3098_v39 = vpack.c.bf16 %v3070_v37, %v3069_v11 }
 0x1ac   : > { %5078 = vmatpush3.bf16.msra.mxu1 %v3782_v52  ;;  %5015 = vmatprep.mubr.msk.bf16.mxu1 %vm747_vm0, %v3097_v62  ;;  %v1227_v22 = vpop.f32.mrf.mxu1  ;;  %v3364_v52 = vld [vmem:[#allocation2 + $0x60] sm:$0xff]  ;;  %v3099_v62 = vpack.c.bf16 %v3072_v0, %v3071_v13  ;;  %v3076_v0 = vmul.f32 %v3044_v7, %v7539_v56 }
 0x1ad   : > { %v4843_v36 = vpop.f32.mrf.mxu0  ;;  %5046 = vmatmul.mubr.msk.bf16.vlgmr.msra.gmra.mxu0 %vm747_vm0, %v3390_v46  ;;  %v3043_v46 = vld [vmem:[#allocation2 + $0x87] sm:$0xff]  ;;  %v3392_v12 = vpack.c.bf16 %v3364_v52, %v3363_v40  ;;  %v3367_v40 = vld [vmem:[#allocation2 + $0x78] sm:$0xff] }
 0x1ae   : > { %v6456_v16 = vadd.f32 %v4843_v36, %v4809_v54  ;;  %5049 = vmatprep.mubr.msk.bf16.mxu0 %vm747_vm0, %v3391_v63  ;;  %v4810_v55 = vpop.f32.mrf.mxu1  ;;  %v3041_v63 = vld [vmem:[#allocation2 + $0x77] sm:$0xff]  ;;  %v3074_v36 = vmul.f32 %v3042_v25, %v7541_v18  ;;  %v3368_v52 = vld [vmem:[#allocation2 + $0x80] sm:$0xff] }
 0x1af   : > { %v1439_v38 = vpop.f32.mrf.mxu0  ;;  %v3046_v25 = vld [vmem:[#allocation2 + $0x9f] sm:$0xff]  ;;  %v3394_v56 = vpack.c.bf16 %v3368_v52, %v3367_v40 }
 0x1b0   : > { %v6461_v50 = vadd.f32 %v1439_v38, %v1227_v22  ;;  %v1230_v28 = vpop.f32.mrf.mxu1  ;;  %v3365_v22 = vld [vmem:[#allocation2 + $0x68] sm:$0xff]  ;;  %v3073_v38 = vmul.f32 %v3041_v63, %v7538_v47  ;;  %v3372_v52 = vld [vmem:[#allocation2 + $0xa0] sm:$0xff]  ;;  %v3371_v40 = vld [vmem:[#allocation2 + $0x98] sm:$0xff] }
 0x1b1   : > { %v4844_v59 = vpop.f32.mrf.mxu0  ;;  %v3393_v44 = vpack.c.bf16 %v3366_v23, %v3365_v22  ;;  %v3370_v23 = vld [vmem:[#allocation2 + $0x90] sm:$0xff] }
 0x1b2   : > { %v6463_v19 = vadd.f32 %v4844_v59, %v4810_v55  ;;  %v3075_v55 = vmul.f32 %v3043_v46, %v7544_v3  ;;  %v3100_v18 = vpack.c.bf16 %v3074_v36, %v3073_v38  ;;  %v3047_v46 = vld [vmem:[#allocation2 + $0xa7] sm:$0xff]  ;;  %v3048_v36 = vld [vmem:[#allocation2 + $0xaf] sm:$0xff] }
 0x1b3   : > { %v4813_v54 = vpop.f32.mrf.mxu1  ;;  %5016 = vmatmul.mubr.msk.bf16.gmra.mxu1 %vm747_vm0, %v3098_v39  ;;  %v1442_v33 = vpop.f32.mrf.mxu0 }
 0x1b4   : > { %5019 = vmatprep.mubr.msk.bf16.mxu1 %vm747_vm0, %v3099_v62  ;;  %v6467_v14 = vadd.f32 %v1442_v33, %v1230_v28  ;;  %v3101_v62 = vpack.c.bf16 %v3076_v0, %v3075_v55  ;;  %v3369_v33 = vld [vmem:[#allocation2 + $0x88] sm:$0xff]  ;;  %v3080_v0 = vmul.f32 %v3048_v36, %v5579_v1  ;;  %v3396_v1 = vpack.c.bf16 %v3372_v52, %v3371_v40  ;;  %v3376_v52 = vld [vmem:[#allocation2 + $0xc0] sm:$0xff]  ;;  %v3375_v40 = vld [vmem:[#allocation2 + $0xb8] sm:$0xff] }
 0x1b5   : > { %v1243_v37 = vpop.f32.mrf.mxu1  ;;  %v4847_v13 = vpop.f32.mrf.mxu0  ;;  %5050 = vmatmul.mubr.msk.bf16.gmra.mxu0 %vm747_vm0, %v3392_v12  ;;  %v3045_v12 = vld [vmem:[#allocation2 + $0x97] sm:$0xff] }
 0x1b6   : > { %v6472_v15 = vadd.f32 %v4847_v13, %v4813_v54  ;;  %5053 = vmatprep.mubr.msk.bf16.mxu0 %vm747_vm0, %v3393_v44  ;;  %v3078_v44 = vmul.f32 %v3046_v25, %v7550_v26  ;;  %v3079_v13 = vmul.f32 %v3047_v46, %v7551_v53  ;;  %v3077_v38 = vmul.f32 %v3045_v12, %v7548_v4  ;;  %v3050_v25 = vld [vmem:[#allocation2 + $0xbf] sm:$0xff]  ;;  %v3051_v46 = vld [vmem:[#allocation2 + $0xc7] sm:$0xff] }
 0x1b7   : > { %v4814_v11 = vpop.f32.mrf.mxu1  ;;  %v1455_v20 = vpop.f32.mrf.mxu0 }
 0x1b8   : > { %v6477_v28 = vadd.f32 %v1455_v20, %v1243_v37  ;;  %v3395_v37 = vpack.c.bf16 %v3370_v23, %v3369_v33  ;;  %v3102_v26 = vpack.c.bf16 %v3078_v44, %v3077_v38  ;;  %v3374_v23 = vld [vmem:[#allocation2 + $0xb0] sm:$0xff] }
 0x1b9   : > { %v1246_v39 = vpop.f32.mrf.mxu1  ;;  %v4848_v59 = vpop.f32.mrf.mxu0  ;;  %v3052_v44 = vld [vmem:[#allocation2 + $0xcf] sm:$0xff] }
 0x1ba   : > { %v6479_v3 = vadd.f32 %v4848_v59, %v4814_v11 }
 0x1bb   : > { %v4817_v54 = vpop.f32.mrf.mxu1  ;;  %5020 = vmatmul.mubr.msk.bf16.gmra.mxu1 %vm747_vm0, %v3100_v18  ;;  %v1458_v47 = vpop.f32.mrf.mxu0 }
 0x1bc   : > { %5023 = vmatprep.mubr.msk.bf16.mxu1 %vm747_vm0, %v3101_v62  ;;  %v6483_v22 = vadd.f32 %v1458_v47, %v1246_v39  ;;  %v3103_v62 = vpack.c.bf16 %v3080_v0, %v3079_v13  ;;  %v3373_v47 = vld [vmem:[#allocation2 + $0xa8] sm:$0xff]  ;;  %v3084_v0 = vmul.f32 %v3052_v44, %v5608_v17  ;;  %v3398_v17 = vpack.c.bf16 %v3376_v52, %v3375_v40  ;;  %v3380_v52 = vld [vmem:[#allocation2 + $0xe0] sm:$0xff]  ;;  %v3379_v40 = vld [vmem:[#allocation2 + $0xd8] sm:$0xff] }
 0x1bd   : > { %v1259_v63 = vpop.f32.mrf.mxu1  ;;  %v4851_v7 = vpop.f32.mrf.mxu0  ;;  %5054 = vmatmul.mubr.msk.bf16.gmra.mxu0 %vm747_vm0, %v3394_v56  ;;  %v3049_v56 = vld [vmem:[#allocation2 + $0xb7] sm:$0xff] }
 0x1be   : > { %v6488_v55 = vadd.f32 %v4851_v7, %v4817_v54  ;;  %5057 = vmatprep.mubr.msk.bf16.mxu0 %vm747_vm0, %v3395_v37  ;;  %v3082_v37 = vmul.f32 %v3050_v25, %v7560_v61  ;;  %v3083_v7 = vmul.f32 %v3051_v46, %v7561_v27  ;;  %v3081_v38 = vmul.f32 %v3049_v56, %v7558_v34  ;;  %v3054_v25 = vld [vmem:[#allocation2 + $0xdf] sm:$0xff]  ;;  %v3055_v46 = vld [vmem:[#allocation2 + $0xe7] sm:$0xff] }
 0x1bf   : > { %v4818_v11 = vpop.f32.mrf.mxu1  ;;  %v1471_v20 = vpop.f32.mrf.mxu0 }
 0x1c0   : > { %v6493_v39 = vadd.f32 %v1471_v20, %v1259_v63  ;;  %v3397_v63 = vpack.c.bf16 %v3374_v23, %v3373_v47  ;;  %v3104_v61 = vpack.c.bf16 %v3082_v37, %v3081_v38  ;;  %v3378_v23 = vld [vmem:[#allocation2 + $0xd0] sm:$0xff] }
 0x1c1   : > { %v1262_v18 = vpop.f32.mrf.mxu1  ;;  %v4852_v59 = vpop.f32.mrf.mxu0  ;;  %v3056_v37 = vld [vmem:[#allocation2 + $0xef] sm:$0xff] }
 0x1c2   : > { %v6495_v53 = vadd.f32 %v4852_v59, %v4818_v11 }
 0x1c3   : > { %v4821_v54 = vpop.f32.mrf.mxu1  ;;  %5024 = vmatmul.mubr.msk.bf16.gmra.mxu1 %vm747_vm0, %v3102_v26  ;;  %v1474_v4 = vpop.f32.mrf.mxu0 }
 0x1c4   : > { %5027 = vmatprep.mubr.msk.bf16.mxu1 %vm747_vm0, %v3103_v62  ;;  %v6499_v33 = vadd.f32 %v1474_v4, %v1262_v18  ;;  %v3105_v62 = vpack.c.bf16 %v3084_v0, %v3083_v7  ;;  %v3377_v4 = vld [vmem:[#allocation2 + $0xc8] sm:$0xff]  ;;  %v3088_v0 = vmul.f32 %v3056_v37, %v7567_v5 }
 0x1c5   : > { %v1275_v12 = vpop.f32.mrf.mxu1  ;;  %v4855_v36 = vpop.f32.mrf.mxu0  ;;  %5058 = vmatmul.mubr.msk.bf16.gmra.mxu0 %vm747_vm0, %v3396_v1  ;;  %v3053_v1 = vld [vmem:[#allocation2 + $0xd7] sm:$0xff]  ;;  %v3381_v5 = vld [vmem:[#allocation2 + $0xe8] sm:$0xff] }
 0x1c6   : > { %v6504_v13 = vadd.f32 %v4855_v36, %v4821_v54  ;;  %5061 = vmatprep.mubr.msk.bf16.mxu0 %vm747_vm0, %v3397_v63  ;;  %v3086_v63 = vmul.f32 %v3054_v25, %v7569_v21  ;;  %v3087_v36 = vmul.f32 %v3055_v46, %v7571_v42  ;;  %v3085_v38 = vmul.f32 %v3053_v1, %v7565_v49  ;;  %v3058_v25 = vld [vmem:[#allocation2 + $0xff] sm:$0xff] }
 0x1c7   : > { %v4822_v11 = vpop.f32.mrf.mxu1  ;;  %v1487_v20 = vpop.f32.mrf.mxu0  ;;  %v3400_v49 = vpack.c.bf16 %v3380_v52, %v3379_v40  ;;  %v3383_v52 = vld [vmem:[#allocation2 + $0xf8] sm:$0xff]  ;;  %v3651_v40 = vld [vmem:[#allocation2 + $0x29] sm:$0xff] }
 0x1c8   : > { %v6509_v18 = vadd.f32 %v1487_v20, %v1275_v12  ;;  %v3399_v12 = vpack.c.bf16 %v3378_v23, %v3377_v4  ;;  %v3106_v21 = vpack.c.bf16 %v3086_v63, %v3085_v38  ;;  %v3382_v23 = vld [vmem:[#allocation2 + $0xf0] sm:$0xff] }
 0x1c9   : > { %v1278_v26 = vpop.f32.mrf.mxu1  ;;  %v4856_v59 = vpop.f32.mrf.mxu0  ;;  %v3401_v1 = vpack.c.bf16 %v3382_v23, %v3381_v5  ;;  %v7638_v23 = vpack.c.bf16 %v6198_v43, %v6188_v45  ;;  %v3388_v45 = vld [vmem:[#allocation2 + $0x120] sm:$0xff] }
 0x1ca   : > { %v6511_v27 = vadd.f32 %v4856_v59, %v4822_v11 }
 0x1cb   : > { %v4825_v54 = vpop.f32.mrf.mxu1  ;;  %5028 = vmatmul.mubr.msk.bf16.gmra.mxu1 %vm747_vm0, %v3104_v61  ;;  %v1490_v34 = vpop.f32.mrf.mxu0 }
 0x1cc   : > { %5031 = vmatprep.mubr.msk.bf16.mxu1 %vm747_vm0, %v3105_v62  ;;  %v6515_v47 = vadd.f32 %v1490_v34, %v1278_v26  ;;  %v3107_v62 = vpack.c.bf16 %v3088_v0, %v3087_v36  ;;  %v3057_v34 = vld [vmem:[#allocation2 + $0xf7] sm:$0xff]  ;;  %v3384_v0 = vld [vmem:[#allocation2 + $0x100] sm:$0xff] }
 0x1cd   : > { %v1291_v56 = vpop.f32.mrf.mxu1  ;;  %v4859_v44 = vpop.f32.mrf.mxu0  ;;  %5062 = vmatmul.mubr.msk.bf16.gmra.mxu0 %vm747_vm0, %v3398_v17 }
 0x1ce   : > { %v6520_v7 = vadd.f32 %v4859_v44, %v4825_v54  ;;  %5065 = vmatprep.mubr.msk.bf16.mxu0 %vm747_vm0, %v3399_v12  ;;  %v3089_v44 = vmul.f32 %v3057_v34, %v7573_v32  ;;  %v3402_v32 = vpack.c.bf16 %v3384_v0, %v3383_v52  ;;  %v3656_v52 = vld [vmem:[#allocation2 + $0x51] sm:$0xff] }
 0x1cf   : > { %v4826_v11 = vpop.f32.mrf.mxu1  ;;  %v1503_v20 = vpop.f32.mrf.mxu0 }
 0x1d0   : > { %v6525_v26 = vadd.f32 %v1503_v20, %v1291_v56  ;;  %v3090_v56 = vmul.f32 %v3058_v25, %v7575_v6 }
 0x1d1   : > { %v1294_v61 = vpop.f32.mrf.mxu1  ;;  %v4860_v59 = vpop.f32.mrf.mxu0 }
 0x1d2   : > { %v6527_v42 = vadd.f32 %v4860_v59, %v4826_v11  ;;  %v3108_v20 = vpack.c.bf16 %v3090_v56, %v3089_v44  ;;  %v3652_v59 = vld [vmem:[#allocation2 + $0x31] sm:$0xff] }
 0x1d3   : > { %v4829_v54 = vpop.f32.mrf.mxu1  ;;  %5032 = vmatmul.mubr.msk.bf16.gmra.mxu1 %vm747_vm0, %v3106_v21  ;;  %v1506_v46 = vpop.f32.mrf.mxu0 }
 0x1d4   : > { %5035 = vmatprep.mubr.msk.bf16.mxu1 %vm747_vm0, %v3107_v62  ;;  %v6531_v17 = vadd.f32 %v1506_v46, %v1294_v61 }
 0x1d5   : > { %v1307_v4 = vpop.f32.mrf.mxu1  ;;  %v4863_v12 = vpop.f32.mrf.mxu0  ;;  %5066 = vmatmul.mubr.msk.bf16.gmra.mxu0 %vm747_vm0, %v3400_v49  ;;  %v3684_v49 = vmul.f32 %v3652_v59, %v7582_v9 }
 0x1d6   : > { %v6535_v63 = vadd.f32 %v4863_v12, %v4829_v54  ;;  %5069 = vmatprep.mubr.msk.bf16.mxu0 %vm747_vm0, %v3401_v1  ;;  %v3683_v1 = vmul.f32 %v3651_v40, %v7580_v41 }
 0x1d7   : > { %v4830_v37 = vpop.f32.mrf.mxu1  ;;  %v1519_v36 = vpop.f32.mrf.mxu0 }
 0x1d8   : > { %v6539_v11 = vadd.f32 %v1519_v36, %v1307_v4  ;;  %v3387_v4 = vld [vmem:[#allocation2 + $0x118] sm:$0xff]  ;;  %v3715_v44 = vpack.c.bf16 %v3684_v49, %v3683_v1 }
 0x1d9   : > { %v1310_v38 = vpop.f32.mrf.mxu1  ;;  %v4864_v61 = vpop.f32.mrf.mxu0  ;;  %v3404_v36 = vpack.c.bf16 %v3388_v45, %v3387_v4 }
 0x1da   : > { %v6541_v21 = vadd.f32 %v4864_v61, %v4830_v37  ;;  %v7639_v61 = vld [vmem:[#allocation24_spill] sm:$0xff] }
 0x1db   : > { %v4833_v6 = vpop.f32.mrf.mxu1  ;;  %5036 = vmatmul.mubr.msk.bf16.gmra.mxu1 %vm747_vm0, %v3108_v20  ;;  %v1522_v62 = vpop.f32.mrf.mxu0  ;;  %v3654_v20 = vld [vmem:[#allocation2 + $0x41] sm:$0xff] }
 0x1dc   : > { %5039 = vmatprep.mubr.msk.bf16.mxu1 %vm747_vm0, %v7638_v23  ;;  %v6548_v25 = vadd.f32 %v1522_v62, %v1310_v38  ;;  %v3653_v38 = vld [vmem:[#allocation2 + $0x39] sm:$0xff]  ;;  %v7642_v23 = vld [vmem:[#allocation10_spill] sm:$0xff] }
 0x1dd   : > { %v1323_v54 = vpop.f32.mrf.mxu1  ;;  %v4867_v46 = vpop.f32.mrf.mxu0  ;;  %5070 = vmatmul.mubr.msk.bf16.gmra.mxu0 %vm747_vm0, %v3402_v32  ;;  %v3685_v32 = vmul.f32 %v3653_v38, %v7642_v23 }
 0x1de   : > { %v6552_v5 = vadd.f32 %v4867_v46, %v4833_v6  ;;  %5073 = vmatprep.mubr.msk.bf16.mxu0 %vm747_vm0, %v6435_v10  ;;  %v7640_v6 = vld [vmem:[#allocation61_spill] sm:$0xff]  ;;  %v3655_v46 = vld [vmem:[#allocation2 + $0x49] sm:$0xff] }
 0x1df   : > { %v4834_v34 = vpop.f32.mrf.mxu1  ;;  %v1535_v43 = vpop.f32.mrf.mxu0  ;;  %v7641_v10 = vpack.c.bf16 %v7639_v61, %v7640_v6  ;;  %v3687_v1 = vmul.f32 %v3655_v46, %v7587_v35  ;;  %v3657_v6 = vld [vmem:[#allocation2 + $0x59] sm:$0xff] }
 0x1e0   : > { %v6557_v56 = vadd.f32 %v1535_v43, %v1323_v54  ;;  %v7643_v54 = vld [vmem:[#allocation9_spill] sm:$0xff] }
 0x1e1   : > { %v1326_v12 = vpop.f32.mrf.mxu1  ;;  %v4868_v37 = vpop.f32.mrf.mxu0  ;;  %v3686_v40 = vmul.f32 %v3654_v20, %v7643_v54  ;;  %v3658_v20 = vld [vmem:[#allocation2 + $0x61] sm:$0xff] }
 0x1e2   : > { %v6559_v9 = vadd.f32 %v4868_v37, %v4834_v34  ;;  %v3688_v34 = vmul.f32 %v3656_v52, %v7588_v51  ;;  %v3660_v51 = vld [vmem:[#allocation2 + $0x71] sm:$0xff] }
 0x1e3   : > { %v4837_v0 = vpop.f32.mrf.mxu1  ;;  %5040 = vmatmul.mubr.msk.bf16.gmra.mxu1 %vm747_vm0, %v7641_v10  ;;  %v1538_v59 = vpop.f32.mrf.mxu0 }
 0x1e4   : > { %5079 = vmatprep.mubr.msk.bf16.mxu1 %vm747_vm0, %v3715_v44  ;;  %v6566_v41 = vadd.f32 %v1538_v59, %v1326_v12  ;;  %v3716_v44 = vpack.c.bf16 %v3686_v40, %v3685_v32  ;;  %v3717_v38 = vpack.c.bf16 %v3688_v34, %v3687_v1  ;;  %v7645_v32 = vld [vmem:[#allocation17_spill] sm:$0xff]  ;;  %v3659_v40 = vld [vmem:[#allocation2 + $0x69] sm:$0xff]  ;;  %v3692_v34 = vmul.f32 %v3660_v51, %v7594_v57  ;;  %v3664_v51 = vld [vmem:[#allocation2 + $0x91] sm:$0xff] }
 0x1e5   : > { %v1339_v62 = vpop.f32.mrf.mxu1  ;;  %v4871_v49 = vpop.f32.mrf.mxu0  ;;  %5074 = vmatmul.mubr.msk.bf16.gmra.mxu0 %vm747_vm0, %v3404_v36  ;;  %v3690_v54 = vmul.f32 %v3658_v20, %v7645_v32  ;;  %v7647_v32 = vld [vmem:[#allocation25_spill] sm:$0xff] }
 0x1e6   : > { %v6572_v4 = vadd.f32 %v4871_v49, %v4837_v0 }
 0x1e7   : > { %v4838_v45 = vpop.f32.mrf.mxu1  ;;  %v1551_v43 = vpop.f32.mrf.mxu0 }
 0x1e8   : > { %v6575_v37 = vadd.f32 %v1551_v43, %v1339_v62  ;;  %v7644_v62 = vld [vmem:[#allocation18_spill] sm:$0xff] }
 0x1e9   : > { %v1342_v12 = vpop.f32.mrf.mxu1  ;;  %v4872_v61 = vpop.f32.mrf.mxu0  ;;  %v3689_v23 = vmul.f32 %v3657_v6, %v7644_v62 }
 0x1ea   : > { %v6577_v10 = vadd.f32 %v4872_v61, %v4838_v45 }
 0x1eb   : > { %v4877_v59 = vpop.f32.mrf.mxu1  ;;  %5080 = vmatmul.mubr.msk.bf16.vlgmr.msra.gmra.mxu1 %vm747_vm0, %v3716_v44  ;;  %v1554_v36 = vpop.f32.mrf.mxu0 }
 0x1ec   : > { %v2055_v0 = vadd.f32 %v4877_v59, %v6456_v16  ;;  %5083 = vmatprep.mubr.msk.bf16.mxu1 %vm747_vm0, %v3717_v38  ;;  %v6582_v35 = vadd.f32 %v1554_v36, %v1342_v12  ;;  %v3691_v12 = vmul.f32 %v3659_v40, %v7527_v24  ;;  %v3718_v38 = vpack.c.bf16 %v3690_v54, %v3689_v23  ;;  %v3662_v36 = vld [vmem:[#allocation2 + $0x81] sm:$0xff]  ;;  %v3663_v40 = vld [vmem:[#allocation2 + $0x89] sm:$0xff] }
 0x1ed   : > { %v1926_v52 = vpop.f32.mrf.mxu1  ;;  %v4911_v49 = vpop.f32.mrf.mxu0  ;;  %v7646_v23 = vld [vmem:[#allocation26_spill] sm:$0xff]  ;;  %v3694_v54 = vmul.f32 %v3662_v36, %v7647_v32 }
 0x1ee   : > { %v2053_v46 = vadd.f32 %v1926_v52, %v6461_v50  ;;  %v6588_v45 = vadd.f32 %v4911_v49, %v2055_v0  ;;  %v3719_v59 = vpack.c.bf16 %v3692_v34, %v3691_v12  ;;  %v3661_v50 = vld [vmem:[#allocation2 + $0x79] sm:$0xff]  ;;  %v3696_v34 = vmul.f32 %v3664_v51, %v7535_v30  ;;  %v3666_v36 = vld [vmem:[#allocation2 + $0xa1] sm:$0xff]  ;;  %v3668_v51 = vld [vmem:[#allocation2 + $0xb1] sm:$0xff] }
 0x1ef   : > { %v4878_v43 = vpop.f32.mrf.mxu1  ;;  %v2252_v1 = vpop.f32.mrf.mxu0  ;;  %v3695_v12 = vmul.f32 %v3663_v40, %v7536_v2  ;;  %v3667_v32 = vld [vmem:[#allocation2 + $0xa9] sm:$0xff] }
 0x1f0   : > { %v2056_v16 = vadd.f32 %v4878_v43, %v6463_v19  ;;  %v6592_v44 = vadd.f32 %v2252_v1, %v2053_v46 }
 0x1f1   : > { %v1929_v61 = vpop.f32.mrf.mxu1  ;;  %v4912_v20 = vpop.f32.mrf.mxu0 }
 0x1f2   : > { %v2054_v6 = vadd.f32 %v1929_v61, %v6467_v14  ;;  %v6595_v52 = vadd.f32 %v4912_v20, %v2056_v16  ;;  %v3693_v14 = vmul.f32 %v3661_v50, %v7646_v23  ;;  %v3721_v50 = vpack.c.bf16 %v3696_v34, %v3695_v12  ;;  %v7649_v23 = vld [vmem:[#allocation33_spill] sm:$0xff] }
 0x1f3   : > { %v4881_v57 = vpop.f32.mrf.mxu1  ;;  %5084 = vmatmul.mubr.msk.bf16.gmra.mxu1 %vm747_vm0, %v3718_v38  ;;  %v2255_v0 = vpop.f32.mrf.mxu0 }
 0x1f4   : > { %v2059_v19 = vadd.f32 %v4881_v57, %v6472_v15  ;;  %5087 = vmatprep.mubr.msk.bf16.mxu1 %vm747_vm0, %v3719_v59  ;;  %v6600_v24 = vadd.f32 %v2255_v0, %v2054_v6  ;;  %v3720_v6 = vpack.c.bf16 %v3694_v54, %v3693_v14  ;;  %v3698_v14 = vmul.f32 %v3666_v36, %v7649_v23  ;;  %v3672_v36 = vld [vmem:[#allocation2 + $0xd1] sm:$0xff] }
 0x1f5   : > { %v1942_v62 = vpop.f32.mrf.mxu1  ;;  %v4915_v49 = vpop.f32.mrf.mxu0 }
 0x1f6   : > { %v2057_v46 = vadd.f32 %v1942_v62, %v6477_v28  ;;  %v6606_v43 = vadd.f32 %v4915_v49, %v2059_v19  ;;  %v3665_v28 = vld [vmem:[#allocation2 + $0x99] sm:$0xff]  ;;  %v7648_v62 = vld [vmem:[#allocation34_spill] sm:$0xff] }
 0x1f7   : > { %v4882_v16 = vpop.f32.mrf.mxu1  ;;  %v2268_v1 = vpop.f32.mrf.mxu0 }
 0x1f8   : > { %v2060_v15 = vadd.f32 %v4882_v16, %v6479_v3  ;;  %v6610_v61 = vadd.f32 %v2268_v1, %v2057_v46  ;;  %v3700_v46 = vmul.f32 %v3668_v51, %v7546_v48 }
 0x1f9   : > { %v1945_v38 = vpop.f32.mrf.mxu1  ;;  %v4916_v59 = vpop.f32.mrf.mxu0 }
 0x1fa   : > { %v2058_v20 = vadd.f32 %v1945_v38, %v6483_v22  ;;  %v6613_v57 = vadd.f32 %v4916_v59, %v2060_v15  ;;  %v3697_v22 = vmul.f32 %v3665_v28, %v7648_v62  ;;  %v3699_v15 = vmul.f32 %v3667_v32, %v7547_v31  ;;  %v3671_v62 = vld [vmem:[#allocation2 + $0xc9] sm:$0xff] }
 0x1fb   : > { %v4885_v30 = vpop.f32.mrf.mxu1  ;;  %5088 = vmatmul.mubr.msk.bf16.gmra.mxu1 %vm747_vm0, %v3720_v6  ;;  %v2271_v19 = vpop.f32.mrf.mxu0 }
 0x1fc   : > { %v2063_v3 = vadd.f32 %v4885_v30, %v6488_v55  ;;  %5091 = vmatprep.mubr.msk.bf16.mxu1 %vm747_vm0, %v3721_v50  ;;  %v6618_v2 = vadd.f32 %v2271_v19, %v2058_v20  ;;  %v3722_v38 = vpack.c.bf16 %v3698_v14, %v3697_v22  ;;  %v3723_v59 = vpack.c.bf16 %v3700_v46, %v3699_v15  ;;  %v3670_v50 = vld [vmem:[#allocation2 + $0xc1] sm:$0xff]  ;;  %v7651_v19 = vld [vmem:[#allocation40_spill] sm:$0xff] }
 0x1fd   : > { %v1958_v0 = vpop.f32.mrf.mxu1  ;;  %v4919_v40 = vpop.f32.mrf.mxu0  ;;  %v3704_v14 = vmul.f32 %v3672_v36, %v7552_v58  ;;  %v3703_v46 = vmul.f32 %v3671_v62, %v7557_v60  ;;  %v7653_v36 = vld [vmem:[#allocation47_spill] sm:$0xff] }
 0x1fe   : > { %v2061_v54 = vadd.f32 %v1958_v0, %v6493_v39  ;;  %v6624_v49 = vadd.f32 %v4919_v40, %v2063_v3  ;;  %v3669_v39 = vld [vmem:[#allocation2 + $0xb9] sm:$0xff]  ;;  %v3702_v0 = vmul.f32 %v3670_v50, %v7651_v19 }
 0x1ff   : > { %v4886_v34 = vpop.f32.mrf.mxu1  ;;  %v2284_v16 = vpop.f32.mrf.mxu0  ;;  %v7650_v3 = vld [vmem:[#allocation41_spill] sm:$0xff] }
 0x200   : > { %v2064_v55 = vadd.f32 %v4886_v34, %v6495_v53  ;;  %v6628_v1 = vadd.f32 %v2284_v16, %v2061_v54 }
 0x201   : > { %v1961_v12 = vpop.f32.mrf.mxu1  ;;  %v4920_v20 = vpop.f32.mrf.mxu0 }
 0x202   : > { %v2062_v6 = vadd.f32 %v1961_v12, %v6499_v33  ;;  %v6631_v28 = vadd.f32 %v4920_v20, %v2064_v55  ;;  %v3701_v33 = vmul.f32 %v3669_v39, %v7650_v3 }
 0x203   : > { %v4889_v48 = vpop.f32.mrf.mxu1  ;;  %5092 = vmatmul.mubr.msk.bf16.gmra.mxu1 %vm747_vm0, %v3722_v38  ;;  %v2287_v30 = vpop.f32.mrf.mxu0  ;;  %v3725_v38 = vpack.c.bf16 %v3704_v14, %v3703_v46 }
 0x204   : > { %v2067_v53 = vadd.f32 %v4889_v48, %v6504_v13  ;;  %5095 = vmatprep.mubr.msk.bf16.mxu1 %vm747_vm0, %v3723_v59  ;;  %v6636_v31 = vadd.f32 %v2287_v30, %v2062_v6  ;;  %v3724_v16 = vpack.c.bf16 %v3702_v0, %v3701_v33  ;;  %v3674_v6 = vld [vmem:[#allocation2 + $0xe1] sm:$0xff]  ;;  %v3676_v59 = vld [vmem:[#allocation2 + $0xf1] sm:$0xff]  ;;  %v3675_v30 = vld [vmem:[#allocation2 + $0xe9] sm:$0xff] }
 0x205   : > { %v1974_v51 = vpop.f32.mrf.mxu1  ;;  %v4923_v23 = vpop.f32.mrf.mxu0  ;;  %v7652_v48 = vld [vmem:[#allocation48_spill] sm:$0xff]  ;;  %v3708_v33 = vmul.f32 %v3676_v59, %v7562_v8 }
 0x206   : > { %v2065_v22 = vadd.f32 %v1974_v51, %v6509_v18  ;;  %v6642_v32 = vadd.f32 %v4923_v23, %v2067_v53  ;;  %v3673_v18 = vld [vmem:[#allocation2 + $0xd9] sm:$0xff]  ;;  %v3706_v53 = vmul.f32 %v3674_v6, %v7653_v36 }
 0x207   : > { %v4890_v54 = vpop.f32.mrf.mxu1  ;;  %v2300_v40 = vpop.f32.mrf.mxu0 }
 0x208   : > { %v2068_v13 = vadd.f32 %v4890_v54, %v6511_v27  ;;  %v6646_v34 = vadd.f32 %v2300_v40, %v2065_v22  ;;  %v3707_v22 = vmul.f32 %v3675_v30, %v7563_v29 }
 0x209   : > { %v1977_v55 = vpop.f32.mrf.mxu1  ;;  %v4924_v12 = vpop.f32.mrf.mxu0 }
 0x20a   : > { %v2066_v15 = vadd.f32 %v1977_v55, %v6515_v47  ;;  %v6649_v20 = vadd.f32 %v4924_v12, %v2068_v13  ;;  %v3705_v47 = vmul.f32 %v3673_v18, %v7652_v48  ;;  %v3727_v46 = vpack.c.bf16 %v3708_v33, %v3707_v22  ;;  %v3678_v55 = vld [vmem:[#allocation2 + $0x101] sm:$0xff] }
 0x20b   : > { %v4893_v58 = vpop.f32.mrf.mxu1  ;;  %5096 = vmatmul.mubr.msk.bf16.gmra.mxu1 %vm747_vm0, %v3724_v16  ;;  %v2303_v39 = vpop.f32.mrf.mxu0 }
 0x20c   : > { %v2071_v27 = vadd.f32 %v4893_v58, %v6520_v7  ;;  %5099 = vmatprep.mubr.msk.bf16.mxu1 %vm747_vm0, %v3725_v38  ;;  %v6654_v60 = vadd.f32 %v2303_v39, %v2066_v15  ;;  %v3726_v54 = vpack.c.bf16 %v3706_v53, %v3705_v47  ;;  %v7654_v38 = vld [vmem:[#allocation65_spill] sm:$0xff] }
 0x20d   : > { %v1990_v50 = vpop.f32.mrf.mxu1  ;;  %v4927_v3 = vpop.f32.mrf.mxu0 }
 0x20e   : > { %v2069_v51 = vadd.f32 %v1990_v50, %v6525_v26  ;;  %v6660_v19 = vadd.f32 %v4927_v3, %v2071_v27  ;;  %v3677_v26 = vld [vmem:[#allocation2 + $0xf9] sm:$0xff] }
 0x20f   : > { %v4894_v0 = vpop.f32.mrf.mxu1  ;;  %v2316_v62 = vpop.f32.mrf.mxu0  ;;  %v3709_v18 = vmul.f32 %v3677_v26, %v7654_v38  ;;  %v7660_v38 = vld [vmem:[#allocation78_spill] sm:$0xff] }
 0x210   : > { %v2072_v7 = vadd.f32 %v4894_v0, %v6527_v42  ;;  %v6664_v23 = vadd.f32 %v2316_v62, %v2069_v51  ;;  %v7656_v0 = vld [vmem:[#allocation66_spill] sm:$0xff] }
 0x211   : > { %v1993_v14 = vpop.f32.mrf.mxu1  ;;  %v4928_v40 = vpop.f32.mrf.mxu0 }
 0x212   : > { %v2070_v13 = vadd.f32 %v1993_v14, %v6531_v17  ;;  %v6667_v16 = vadd.f32 %v4928_v40, %v2072_v7  ;;  %v7655_v17 = vld [vmem:[#allocation64_spill] sm:$0xff] }
 0x213   : > { %v4897_v8 = vpop.f32.mrf.mxu1  ;;  %5100 = vmatmul.mubr.msk.bf16.gmra.mxu1 %vm747_vm0, %v3726_v54  ;;  %v2319_v15 = vpop.f32.mrf.mxu0  ;;  %v3710_v6 = vmul.f32 %v3678_v55, %v7655_v17  ;;  %v7657_v7 = vld [vmem:[#allocation60_spill] sm:$0xff] }
 0x214   : > { %v2075_v42 = vadd.f32 %v4897_v8, %v6535_v63  ;;  %5103 = vmatprep.mubr.msk.bf16.mxu1 %vm747_vm0, %v3727_v46  ;;  %v6672_v29 = vadd.f32 %v2319_v15, %v2070_v13  ;;  %v7658_v62 = vpack.c.bf16 %v7656_v0, %v7657_v7 }
 0x215   : > { %v2006_v12 = vpop.f32.mrf.mxu1  ;;  %v4931_v59 = vpop.f32.mrf.mxu0  ;;  %v3728_v36 = vpack.c.bf16 %v3710_v6, %v3709_v18 }
 0x216   : > { %v2073_v58 = vadd.f32 %v2006_v12, %v6539_v11  ;;  %v6677_v27 = vadd.f32 %v4931_v59, %v2075_v42  ;;  %v7659_v12 = vld [vmem:[#allocation77_spill] sm:$0xff] }
 0x217   : > { %v4898_v39 = vpop.f32.mrf.mxu1  ;;  %v2332_v48 = vpop.f32.mrf.mxu0  ;;  %v7661_v18 = vpack.c.bf16 %v7659_v12, %v7660_v38 }
 0x218   : > { %v2076_v50 = vadd.f32 %v4898_v39, %v6541_v21  ;;  %v6680_v63 = vadd.f32 %v2332_v48, %v2073_v58 }
 0x219   : > { %v2009_v47 = vpop.f32.mrf.mxu1  ;;  %v4932_v30 = vpop.f32.mrf.mxu0 }
 0x21a   : > { %v2074_v53 = vadd.f32 %v2009_v47, %v6548_v25  ;;  %v6683_v51 = vadd.f32 %v4932_v30, %v2076_v50 }
 0x21b   : > { %v4901_v3 = vpop.f32.mrf.mxu1  ;;  %5104 = vmatmul.mubr.msk.bf16.gmra.mxu1 %vm747_vm0, %v3728_v36  ;;  %v2335_v33 = vpop.f32.mrf.mxu0 }
 0x21c   : > { %v2079_v11 = vadd.f32 %v4901_v3, %v6552_v5  ;;  %5107 = vmatprep.mubr.msk.bf16.mxu1 %vm747_vm0, %v7658_v62  ;;  %v6691_v21 = vadd.f32 %v2335_v33, %v2074_v53 }
 0x21d   : > { %v2022_v22 = vpop.f32.mrf.mxu1  ;;  %v4935_v25 = vpop.f32.mrf.mxu0 }
 0x21e   : > { %v2077_v14 = vadd.f32 %v2022_v22, %v6557_v56  ;;  %v6694_v54 = vadd.f32 %v4935_v25, %v2079_v11 }
 0x21f   : > { %v4902_v13 = vpop.f32.mrf.mxu1  ;;  %v2348_v46 = vpop.f32.mrf.mxu0 }
 0x220   : > { %v2080_v40 = vadd.f32 %v4902_v13, %v6559_v9  ;;  %v6697_v26 = vadd.f32 %v2348_v46, %v2077_v14 }
 0x221   : > { %v2025_v5 = vpop.f32.mrf.mxu1  ;;  %v4936_v8 = vpop.f32.mrf.mxu0 }
 0x222   : > { %v2078_v55 = vadd.f32 %v2025_v5, %v6566_v41  ;;  %v6700_v42 = vadd.f32 %v4936_v8, %v2080_v40 }
 0x223   : > { %v4905_v15 = vpop.f32.mrf.mxu1  ;;  %5108 = vmatmul.mubr.msk.bf16.gmra.mxu1 %vm747_vm0, %v7661_v18  ;;  %v2351_v17 = vpop.f32.mrf.mxu0 }
 0x224   : > { %v2083_v56 = vadd.f32 %v4905_v15, %v6572_v4  ;;  %v6707_v6 = vadd.f32 %v2351_v17, %v2078_v55 }
 0x225   : > { %v2038_v9 = vpop.f32.mrf.mxu1  ;;  %v4939_v59 = vpop.f32.mrf.mxu0 }
 0x226   : > { %v2081_v58 = vadd.f32 %v2038_v9, %v6575_v37  ;;  %v6710_v39 = vadd.f32 %v4939_v59, %v2083_v56 }
 0x227   : > { %v4906_v41 = vpop.f32.mrf.mxu1  ;;  %v2364_v48 = vpop.f32.mrf.mxu0 }
 0x228   : > { %v2084_v50 = vadd.f32 %v4906_v41, %v6577_v10  ;;  %v6713_v47 = vadd.f32 %v2364_v48, %v2081_v58 }
 0x229   : > { %v2041_v36 = vpop.f32.mrf.mxu1  ;;  %v4940_v30 = vpop.f32.mrf.mxu0 }
 0x22a   : > { %v2082_v53 = vadd.f32 %v2041_v36, %v6582_v35  ;;  %v6716_v4 = vadd.f32 %v4940_v30, %v2084_v50 }
 0x22b   : > { %v4945_v3 = vpop.f32.mrf.mxu1  ;;  %v2367_v11 = vpop.f32.mrf.mxu0 }
 0x22c   : > { %v6719_v33 = vadd.f32 %v4945_v3, %v6588_v45  ;;  %v6721_v37 = vadd.f32 %v2367_v11, %v2082_v53 }
 0x22d   : > { %v2546_v0 = vpop.f32.mrf.mxu1  ;;  %v6726_v10 = vpop.f32.mrf.mxu0 }
 0x22e   : > { %v6724_v7 = vadd.f32 %v2546_v0, %v6592_v44 }
 0x22f   : > { %v4946_v62 = vpop.f32.mrf.mxu1  ;;  %v6731_v35 = vpop.f32.mrf.mxu0 }
 0x230   : > { %v6729_v22 = vadd.f32 %v4946_v62, %v6595_v52 }
 0x231   : > { %v2549_v14 = vpop.f32.mrf.mxu1  ;;  %v6736_v45 = vpop.f32.mrf.mxu0 }
 0x232   : > { %v6734_v25 = vadd.f32 %v2549_v14, %v6600_v24 }
 0x233   : > { %v4949_v13 = vpop.f32.mrf.mxu1  ;;  %v6741_v44 = vpop.f32.mrf.mxu0 }
 0x234   : > { %v6739_v40 = vadd.f32 %v4949_v13, %v6606_v43 }
 0x235   : > { %v2562_v46 = vpop.f32.mrf.mxu1  ;;  %v6746_v52 = vpop.f32.mrf.mxu0 }
 0x236   : > { %v6744_v5 = vadd.f32 %v2562_v46, %v6610_v61 }
 0x237   : > { %v4950_v55 = vpop.f32.mrf.mxu1  ;;  %v6751_v24 = vpop.f32.mrf.mxu0 }
 0x238   : > { %v6749_v8 = vadd.f32 %v4950_v55, %v6613_v57 }
 0x239   : > { %v2565_v15 = vpop.f32.mrf.mxu1  ;;  %v6756_v43 = vpop.f32.mrf.mxu0 }
 0x23a   : > { %v6754_v12 = vadd.f32 %v2565_v15, %v6618_v2 }
 0x23b   : > { %v4953_v38 = vpop.f32.mrf.mxu1  ;;  %v6761_v61 = vpop.f32.mrf.mxu0 }
 0x23c   : > { %v6759_v18 = vadd.f32 %v4953_v38, %v6624_v49 }
 0x23d   : > { %v2578_v56 = vpop.f32.mrf.mxu1  ;;  %v6766_v57 = vpop.f32.mrf.mxu0 }
 0x23e   : > { %v6764_v17 = vadd.f32 %v2578_v56, %v6628_v1 }
 0x23f   : > { %v4954_v9 = vpop.f32.mrf.mxu1  ;;  %v6771_v2 = vpop.f32.mrf.mxu0 }
 0x240   : > { %v6769_v58 = vadd.f32 %v4954_v9, %v6631_v28 }
 0x241   : > { %v2581_v59 = vpop.f32.mrf.mxu1  ;;  %v6776_v49 = vpop.f32.mrf.mxu0 }
 0x242   : > { %v6774_v41 = vadd.f32 %v2581_v59, %v6636_v31 }
 0x243   : > { %v4957_v50 = vpop.f32.mrf.mxu1  ;;  %v6781_v1 = vpop.f32.mrf.mxu0 }
 0x244   : > { %v6779_v48 = vadd.f32 %v4957_v50, %v6642_v32 }
 0x245   : > { %v2594_v36 = vpop.f32.mrf.mxu1  ;;  %v6786_v28 = vpop.f32.mrf.mxu0 }
 0x246   : > { %v6784_v53 = vadd.f32 %v2594_v36, %v6646_v34 }
 0x247   : > { %v4958_v30 = vpop.f32.mrf.mxu1  ;;  %v6791_v31 = vpop.f32.mrf.mxu0 }
 0x248   : > { %v6789_v3 = vadd.f32 %v4958_v30, %v6649_v20 }
 0x249   : > { %v2597_v11 = vpop.f32.mrf.mxu1  ;;  %v6796_v32 = vpop.f32.mrf.mxu0 }
 0x24a   : > { %v6794_v0 = vadd.f32 %v2597_v11, %v6654_v60  ;;  %7663 = vst [vmem:[#allocation32_spill] sm:$0xff] %v6796_v32 }
 0x24b   : > { %v4961_v62 = vpop.f32.mrf.mxu1  ;;  %v6801_v34 = vpop.f32.mrf.mxu0 }
 0x24c   : > { %7662 = vst [vmem:[#allocation31_spill] sm:$0xff] %v6794_v0  ;;  %v6799_v14 = vadd.f32 %v4961_v62, %v6660_v19  ;;  %7665 = vst [vmem:[#allocation22_spill] sm:$0xff] %v6801_v34 }
 0x24d   : > { %v2610_v13 = vpop.f32.mrf.mxu1  ;;  %v6806_v20 = vpop.f32.mrf.mxu0 }
 0x24e   : > { %7664 = vst [vmem:[#allocation68_spill] sm:$0xff] %v6799_v14  ;;  %v6804_v46 = vadd.f32 %v2610_v13, %v6664_v23  ;;  %7667 = vst [vmem:[#allocation67_spill] sm:$0xff] %v6806_v20 }
 0x24f   : > { %v4962_v55 = vpop.f32.mrf.mxu1  ;;  %v6811_v60 = vpop.f32.mrf.mxu0 }
 0x250   : > { %7666 = vst [vmem:[#allocation27_spill] sm:$0xff] %v6804_v46  ;;  %v6809_v15 = vadd.f32 %v4962_v55, %v6667_v16  ;;  %7669 = vst [vmem:[#allocation71_spill] sm:$0xff] %v6811_v60 }
 0x251   : > { %v2613_v38 = vpop.f32.mrf.mxu1  ;;  %v6816_v19 = vpop.f32.mrf.mxu0 }
 0x252   : > { %7668 = vst [vmem:[#allocation21_spill] sm:$0xff] %v6809_v15  ;;  %v6814_v56 = vadd.f32 %v2613_v38, %v6672_v29  ;;  %7671 = vst [vmem:[#allocation38_spill] sm:$0xff] %v6816_v19 }
 0x253   : > { %v4965_v9 = vpop.f32.mrf.mxu1  ;;  %v6821_v23 = vpop.f32.mrf.mxu0 }
 0x254   : > { %7670 = vst [vmem:[#allocation28_spill] sm:$0xff] %v6814_v56  ;;  %v6819_v59 = vadd.f32 %v4965_v9, %v6677_v27  ;;  %7673 = vst [vmem:[#allocation30_spill] sm:$0xff] %v6821_v23 }
 0x255   : > { %v2626_v50 = vpop.f32.mrf.mxu1  ;;  %v6826_v16 = vpop.f32.mrf.mxu0 }
 0x256   : > { %7672 = vst [vmem:[#allocation39_spill] sm:$0xff] %v6819_v59  ;;  %v6824_v36 = vadd.f32 %v2626_v50, %v6680_v63  ;;  %7675 = vst [vmem:[#allocation29_spill] sm:$0xff] %v6826_v16 }
 0x257   : > { %v4966_v30 = vpop.f32.mrf.mxu1  ;;  %v6831_v29 = vpop.f32.mrf.mxu0 }
 0x258   : > { %7674 = vst [vmem:[#allocation74_spill] sm:$0xff] %v6824_v36  ;;  %v6829_v11 = vadd.f32 %v4966_v30, %v6683_v51  ;;  %7677 = vst [vmem:[#allocation45_spill] sm:$0xff] %v6831_v29 }
 0x259   : > { %v2629_v62 = vpop.f32.mrf.mxu1  ;;  %v6836_v27 = vpop.f32.mrf.mxu0 }
 0x25a   : > { %7676 = vst [vmem:[#allocation35_spill] sm:$0xff] %v6829_v11  ;;  %v6834_v13 = vadd.f32 %v2629_v62, %v6691_v21  ;;  %7679 = vst [vmem:[#allocation72_spill] sm:$0xff] %v6836_v27 }
 0x25b   : > { %v4969_v55 = vpop.f32.mrf.mxu1  ;;  %v6841_v63 = vpop.f32.mrf.mxu0 }
 0x25c   : > { %7678 = vst [vmem:[#allocation73_spill] sm:$0xff] %v6834_v13  ;;  %v6839_v38 = vadd.f32 %v4969_v55, %v6694_v54  ;;  %7681 = vst [vmem:[#allocation37_spill] sm:$0xff] %v6841_v63 }
 0x25d   : > { %v2642_v9 = vpop.f32.mrf.mxu1  ;;  %v6846_v51 = vpop.f32.mrf.mxu0 }
 0x25e   : > { %7680 = vst [vmem:[#allocation46_spill] sm:$0xff] %v6839_v38  ;;  %v6844_v50 = vadd.f32 %v2642_v9, %v6697_v26  ;;  %7683 = vst [vmem:[#allocation36_spill] sm:$0xff] %v6846_v51 }
 0x25f   : > { %v4970_v30 = vpop.f32.mrf.mxu1  ;;  %v6851_v21 = vpop.f32.mrf.mxu0 }
 0x260   : > { %7682 = vst [vmem:[#allocation79_spill] sm:$0xff] %v6844_v50  ;;  %v6849_v11 = vadd.f32 %v4970_v30, %v6700_v42  ;;  %7685 = vst [vmem:[#allocation58_spill] sm:$0xff] %v6851_v21 }
 0x261   : > { %v2645_v62 = vpop.f32.mrf.mxu1  ;;  %v6856_v54 = vpop.f32.mrf.mxu0 }
 0x262   : > { %7684 = vst [vmem:[#allocation42_spill] sm:$0xff] %v6849_v11  ;;  %v6854_v13 = vadd.f32 %v2645_v62, %v6707_v6  ;;  %7687 = vst [vmem:[#allocation83_spill] sm:$0xff] %v6856_v54 }
 0x263   : > { %v4973_v55 = vpop.f32.mrf.mxu1  ;;  %v6861_v26 = vpop.f32.mrf.mxu0 }
 0x264   : > { %7686 = vst [vmem:[#allocation59_spill] sm:$0xff] %v6854_v13  ;;  %v6859_v38 = vadd.f32 %v4973_v55, %v6710_v39  ;;  %7689 = vst [vmem:[#allocation88_spill] sm:$0xff] %v6861_v26 }
 0x265   : > { %v2658_v9 = vpop.f32.mrf.mxu1  ;;  %v6866_v42 = vpop.f32.mrf.mxu0 }
 0x266   : > { %7688 = vst [vmem:[#allocation44_spill] sm:$0xff] %v6859_v38  ;;  %v6864_v50 = vadd.f32 %v2658_v9, %v6713_v47  ;;  %7691 = vst [vmem:[#allocation82_spill] sm:$0xff] %v6866_v42 }
 0x267   : > { %v4974_v30 = vpop.f32.mrf.mxu1  ;;  %v6871_v6 = vpop.f32.mrf.mxu0 }
 0x268   : > { %7690 = vst [vmem:[#allocation49_spill] sm:$0xff] %v6864_v50  ;;  %v6869_v11 = vadd.f32 %v4974_v30, %v6716_v4  ;;  %7693 = vst [vmem:[#allocation86_spill] sm:$0xff] %v6871_v6 }
 0x269   : > { %v2661_v62 = vpop.f32.mrf.mxu1  ;;  %v6876_v39 = vpop.f32.mrf.mxu0 }
 0x26a   : > { %7692 = vst [vmem:[#allocation43_spill] sm:$0xff] %v6869_v11  ;;  %v6874_v13 = vadd.f32 %v2661_v62, %v6721_v37  ;;  %7695 = vst [vmem:[#allocation89_spill] sm:$0xff] %v6876_v39 }
 0x26b   : > { %v5013_v55 = vpop.f32.mrf.mxu1  ;;  %v6878_v38 = vpop.f32.mrf.mxu0 }
 0x26c   : > { %7694 = vst [vmem:[#allocation50_spill] sm:$0xff] %v6874_v13  ;;  %7696 = vst [vmem:[#allocation55_spill] sm:$0xff] %v6878_v38 }
 0x26d   : > { %v3198_v26 = vpop.f32.mrf.mxu1  ;;  %v5047_v47 = vpop.f32.mrf.mxu0 }
 0x26f   : > { %v5014_v9 = vpop.f32.mrf.mxu1  ;;  %v3492_v50 = vpop.f32.mrf.mxu0 }
 0x271   : > { %v3201_v42 = vpop.f32.mrf.mxu1  ;;  %v5048_v54 = vpop.f32.mrf.mxu0 }
 0x273   : > { %v6880_v21 = vpop.f32.mrf.mxu1  ;;  %v6882_v4 = vpop.f32.mrf.mxu0 }
 0x275   : > { %v6884_v30 = vpop.f32.mrf.mxu1  ;;  %v6888_v37 = vpop.f32.mrf.mxu0 }
 0x277   : > { %v6886_v11 = vpop.f32.mrf.mxu1  ;;  %v6894_v38 = vpop.f32.mrf.mxu0 }
 0x279   : > { %v6890_v62 = vpop.f32.mrf.mxu1  ;;  %v6900_v51 = vpop.f32.mrf.mxu0 }
 0x27b   : > { %v6892_v13 = vpop.f32.mrf.mxu1  ;;  %v6906_v29 = vpop.f32.mrf.mxu0 }
 0x27d   : > { %v6896_v39 = vpop.f32.mrf.mxu1  ;;  %v6912_v59 = vpop.f32.mrf.mxu0 }
 0x27f   : > { %v6898_v6 = vpop.f32.mrf.mxu1  ;;  %v6918_v19 = vpop.f32.mrf.mxu0 }
 0x281   : > { %v6902_v63 = vpop.f32.mrf.mxu1  ;;  %v6924_v46 = vpop.f32.mrf.mxu0 }
 0x283   : > { %v6904_v27 = vpop.f32.mrf.mxu1  ;;  %v6930_v34 = vpop.f32.mrf.mxu0 }
 0x284   : > { %7705 = vst [vmem:[#allocation52_spill] sm:$0xff] %v6930_v34 }
 0x285   : > { %v6908_v36 = vpop.f32.mrf.mxu1 }
 0x286   : > { %7697 = vst [vmem:[#allocation87_spill] sm:$0xff] %v6908_v36 }
 0x287   : > { %v6910_v16 = vpop.f32.mrf.mxu1 }
 0x288   : > { %7698 = vst [vmem:[#allocation54_spill] sm:$0xff] %v6910_v16 }
 0x289   : > { %v6914_v23 = vpop.f32.mrf.mxu1 }
 0x28a   : > { %7699 = vst [vmem:[#allocation99_spill] sm:$0xff] %v6914_v23  ;;  %v6936_v23 = vpop.f32.mrf.mxu0 }
 0x28b   : > { %v6916_v56 = vpop.f32.mrf.mxu1 }
 0x28c   : > { %7700 = vst [vmem:[#allocation98_spill] sm:$0xff] %v6916_v56 }
 0x28d   : > { %v6920_v15 = vpop.f32.mrf.mxu1 }
 0x28e   : > { %7701 = vst [vmem:[#allocation94_spill] sm:$0xff] %v6920_v15  ;;  %v6942_v15 = vpop.f32.mrf.mxu0 }
 0x28f   : > { %v6922_v60 = vpop.f32.mrf.mxu1  ;;  %7710 = vst [vmem:[#allocation53_spill] sm:$0xff] %v6942_v15 }
 0x290   : > { %7702 = vst [vmem:[#allocation8_spill] sm:$0xff] %v6922_v60 }
 0x291   : > { %v6926_v20 = vpop.f32.mrf.mxu1 }
 0x292   : > { %7703 = vst [vmem:[#allocation100_spill] sm:$0xff] %v6926_v20  ;;  %v6948_v20 = vpop.f32.mrf.mxu0 }
 0x293   : > { %v6928_v14 = vpop.f32.mrf.mxu1  ;;  %7713 = vst [vmem:[#allocation92_spill] sm:$0xff] %v6948_v20 }
 0x294   : > { %7704 = vst [vmem:[#allocation7_spill] sm:$0xff] %v6928_v14 }
 0x295   : > { %v6932_v16 = vpop.f32.mrf.mxu1 }
 0x296   : > { %7706 = vst [vmem:[#allocation102_spill] sm:$0xff] %v6932_v16  ;;  %v6956_v16 = vpop.f32.mrf.mxu0 }
 0x297   : > { %v6934_v0 = vpop.f32.mrf.mxu1  ;;  %7716 = vst [vmem:[#allocation69_spill] sm:$0xff] %v6956_v16 }
 0x298   : > { %7707 = vst [vmem:[#allocation101_spill] sm:$0xff] %v6934_v0  ;;  %v3001_v0 = vadd.f32 %v6726_v10, %v6719_v33  ;;  %v3000_v33 = vadd.f32 %v6741_v44, %v6734_v25  ;;  %v6986_v25 = vld [vmem:[%s7254_s6] ss:$0 sm:$0xff] }
 0x299   : > { %v6938_v56 = vpop.f32.mrf.mxu1 }
 0x29a   : > { %7708 = vst [vmem:[#allocation16_spill] sm:$0xff] %v6938_v56  ;;  %v3327_v15 = vadd.f32 %v5013_v55, %v3001_v0  ;;  %v3326_v0 = vadd.f32 %v3201_v42, %v3000_v33  ;;  %v3004_v42 = vadd.f32 %v6761_v61, %v6754_v12  ;;  %v3009_v12 = vadd.f32 %v6766_v57, %v6759_v18 }
 0x29b   : > { %v6940_v36 = vpop.f32.mrf.mxu1 }
 0x29c   : > { %7709 = vst [vmem:[#allocation15_spill] sm:$0xff] %v6940_v36  ;;  %v2999_v36 = vadd.f32 %v6731_v35, %v6724_v7  ;;  %v3621_v10 = vadd.f32 %v5047_v47, %v3327_v15  ;;  %v6975_v7 = vld [vmem:[%s7253_s5] ss:$0 sm:$0xff]  ;;  %v3335_v57 = vadd.f32 %v6892_v13, %v3009_v12 }
 0x29d   : > { %v6944_v60 = vpop.f32.mrf.mxu1 }
 0x29e   : > { %7711 = vst [vmem:[#allocation62_spill] sm:$0xff] %v6944_v60  ;;  %v3325_v20 = vadd.f32 %v3198_v26, %v2999_v36  ;;  %v3003_v36 = vadd.f32 %v6751_v24, %v6744_v5  ;;  %v3620_v5 = vadd.f32 %v6882_v4, %v3326_v0 }
 0x29f   : > { %v6946_v32 = vpop.f32.mrf.mxu1 }
 0x2a0   : > { %7712 = vst [vmem:[#allocation93_spill] sm:$0xff] %v6946_v32  ;;  %v3002_v32 = vadd.f32 %v6736_v45, %v6729_v22  ;;  %v3619_v35 = vadd.f32 %v3492_v50, %v3325_v20  ;;  %v3005_v45 = vadd.f32 %v6746_v52, %v6739_v40  ;;  %v3006_v50 = vadd.f32 %v6756_v43, %v6749_v8 }
 0x2a1   : > { %v6950_v14 = vpop.f32.mrf.mxu1  ;;  %v3329_v40 = vadd.f32 %v6884_v30, %v3003_v36  ;;  %v3330_v30 = vadd.f32 %v6890_v62, %v3004_v42  ;;  %v3007_v36 = vadd.f32 %v6771_v2, %v6764_v17  ;;  %v3008_v17 = vadd.f32 %v6781_v1, %v6774_v41 }
 0x2a2   : > { %7714 = vst [vmem:[#allocation23_spill] sm:$0xff] %v6950_v14  ;;  %v6966_v14 = vpop.f32.mrf.mxu0  ;;  %v3328_v16 = vadd.f32 %v5014_v9, %v3002_v32  ;;  %v3332_v8 = vadd.f32 %v6886_v11, %v3006_v50 }
 0x2a3   : > { %v6952_v34 = vpop.f32.mrf.mxu1  ;;  %v3623_v11 = vadd.f32 %v6894_v38, %v3329_v40  ;;  %v3624_v2 = vadd.f32 %v6906_v29, %v3330_v30 }
 0x2a4   : > { %7715 = vst [vmem:[#allocation63_spill] sm:$0xff] %v6952_v34  ;;  %v6977_v55 = vpop.f32.mrf.mxu0  ;;  %v3622_v32 = vadd.f32 %v5048_v54, %v3328_v16  ;;  %v3626_v18 = vadd.f32 %v6900_v51, %v3332_v8  ;;  %v3013_v8 = vadd.f32 %v6786_v28, %v6779_v48 }
 0x2a5   : > { %v6958_v56 = vpop.f32.mrf.mxu1 }
 0x2a6   : > { %7717 = vst [vmem:[#allocation96_spill] sm:$0xff] %v6958_v56  ;;  %v6994_v24 = vpop.f32.mrf.mxu0  ;;  %v3339_v28 = vadd.f32 %v6904_v27, %v3013_v8 }
 0x2a7   : > { %v6962_v60 = vpop.f32.mrf.mxu1 }
 0x2a9   : > { %v6968_v34 = vpop.f32.mrf.mxu1 }
 0x2ab   : > { %v5081_v56 = vpop.f32.mrf.mxu1 }
 0x2ac   : > { %v3947_v22 = vadd.f32 %v5081_v56, %v3621_v10  ;;  %v3331_v56 = vadd.f32 %v6880_v21, %v3005_v45  ;;  %v7015_v10 = vpop.f32.mrf.mxu0 }
 0x2ad   : > { %v3818_v44 = vpop.f32.mrf.mxu1 }
 0x2ae   : > { %v3986_v15 = vmul.f32 %v6975_v7, %v3947_v22  ;;  %v3945_v20 = vadd.f32 %v3818_v44, %v3619_v35  ;;  %v3625_v61 = vadd.f32 %v6888_v37, %v3331_v56  ;;  %v7032_v50 = vpop.f32.mrf.mxu0 }
 0x2af   : > { %v5082_v52 = vpop.f32.mrf.mxu1 }
 0x2b0   : > { %v4025_v26 = vadd.f32 %v6986_v25, %v3986_v15  ;;  %v3984_v16 = vmul.f32 %v6975_v7, %v3945_v20  ;;  %v3948_v54 = vadd.f32 %v5082_v52, %v3622_v32  ;;  %v3010_v20 = vadd.f32 %v6776_v49, %v6769_v58 }
 0x2b1   : > { %v3821_v43 = vpop.f32.mrf.mxu1  ;;  %v3333_v58 = vadd.f32 %v6896_v39, %v3007_v36  ;;  %v3629_v49 = vadd.f32 %v6912_v59, %v3335_v57  ;;  %v3011_v39 = vadd.f32 %v6791_v31, %v6784_v53  ;;  %v3334_v59 = vadd.f32 %v6902_v63, %v3008_v17  ;;  %v7720_v36 = vld [vmem:[#allocation87_spill] sm:$0xff] }
 0x2b2   : > { %v4057_v21 = vmax.f32 %v4025_v26, 0.0  ;;  %v4023_v47 = vadd.f32 %v6986_v25, %v3984_v16  ;;  %v3987_v9 = vmul.f32 %v6975_v7, %v3948_v54  ;;  %v3946_v4 = vadd.f32 %v3821_v43, %v3620_v5 }
 0x2b3   : > { %v5085_v33 = vpop.f32.mrf.mxu1  ;;  %v3336_v41 = vadd.f32 %v6898_v6, %v3010_v20  ;;  %v3627_v48 = vadd.f32 %v6918_v19, %v3333_v58  ;;  %v3337_v19 = vadd.f32 %v7720_v36, %v3011_v39  ;;  %v7724_v20 = vld [vmem:[#allocation67_spill] sm:$0xff]  ;;  %v7725_v58 = vld [vmem:[#allocation54_spill] sm:$0xff] }
 0x2b4   : > { %v4571_v35 = vpack.c.bf16 %v4057_v21, %v4057_v21  ;;  %v4055_v0 = vmax.f32 %v4023_v47, 0.0  ;;  %v4026_v22 = vadd.f32 %v6986_v25, %v3987_v9  ;;  %v3985_v45 = vmul.f32 %v6975_v7, %v3946_v4  ;;  %v7050_v21 = vpop.f32.mrf.mxu0 }
 0x2b5   : > { %v3951_v38 = vadd.f32 %v5085_v33, %v3625_v61  ;;  %v3834_v37 = vpop.f32.mrf.mxu1  ;;  %v3630_v53 = vadd.f32 %v6924_v46, %v3336_v41  ;;  %v7726_v41 = vld [vmem:[#allocation53_spill] sm:$0xff] }
 0x2b6   : > { %4218 = vst.msk [vmem:[%s7008_s19 + $0x8] sm:$0xf] %vm4215_vm3, %v4571_v35  ;;  %v4569_v62 = vpack.c.bf16 %v4055_v0, %v4055_v0  ;;  %v4058_v44 = vmax.f32 %v4026_v22, 0.0  ;;  %v4024_v32 = vadd.f32 %v6986_v25, %v3985_v45  ;;  %v3949_v15 = vadd.f32 %v3834_v37, %v3623_v11  ;;  %v7718_v35 = vld [vmem:[#allocation32_spill] sm:$0xff] }
 0x2b7   : > { %v3990_v13 = vmul.f32 %v6975_v7, %v3951_v38  ;;  %v5086_v51 = vpop.f32.mrf.mxu1  ;;  %v3014_v0 = vadd.f32 %v7718_v35, %v6789_v3  ;;  %v7719_v22 = vld [vmem:[#allocation52_spill] sm:$0xff]  ;;  %v7722_v3 = vld [vmem:[#allocation22_spill] sm:$0xff] }
 0x2b8   : > { %4216 = vst.msk [vmem:[%s7008_s19] sm:$0xf] %vm4215_vm3, %v4569_v62  ;;  %v4572_v56 = vpack.c.bf16 %v4058_v44, %v4058_v44  ;;  %v4056_v40 = vmax.f32 %v4024_v32, 0.0  ;;  %v3988_v52 = vmul.f32 %v6975_v7, %v3949_v15  ;;  %v3952_v5 = vadd.f32 %v5086_v51, %v3626_v18  ;;  %v7067_v18 = vpop.f32.mrf.mxu0  ;;  %v7721_v44 = vld [vmem:[#allocation31_spill] sm:$0xff]  ;;  %v7723_v15 = vld [vmem:[#allocation68_spill] sm:$0xff] }
 0x2b9   : > { %v4029_v1 = vadd.f32 %v6986_v25, %v3990_v13  ;;  %v3837_v29 = vpop.f32.mrf.mxu1  ;;  %v3628_v45 = vadd.f32 %v7719_v22, %v3334_v59  ;;  %v3012_v32 = vadd.f32 %v7722_v3, %v7721_v44  ;;  %v3017_v17 = vadd.f32 %v7724_v20, %v7723_v15  ;;  %v7736_v44 = vld [vmem:[#allocation28_spill] sm:$0xff]  ;;  %v7737_v3 = vld [vmem:[#allocation30_spill] sm:$0xff] }
 0x2ba   : > { %4219 = vst.msk [vmem:[%s7008_s19 + $0xc] sm:$0xf] %vm4215_vm3, %v4572_v56  ;;  %v4570_v26 = vpack.c.bf16 %v4056_v40, %v4056_v40  ;;  %v4027_v16 = vadd.f32 %v6986_v25, %v3988_v52  ;;  %v3991_v54 = vmul.f32 %v6975_v7, %v3952_v5  ;;  %v3950_v42 = vadd.f32 %v3837_v29, %v3624_v2  ;;  %v7727_v29 = vld [vmem:[#allocation99_spill] sm:$0xff]  ;;  %v7738_v20 = vld [vmem:[#allocation8_spill] sm:$0xff] }
 0x2bb   : > { %v4061_v6 = vmax.f32 %v4029_v1, 0.0  ;;  %v5089_v43 = vpop.f32.mrf.mxu1  ;;  %v3633_v2 = vadd.f32 %v6936_v23, %v3339_v28  ;;  %v3631_v1 = vadd.f32 %v7726_v41, %v3337_v19  ;;  %v7741_v41 = vld [vmem:[#allocation74_spill] sm:$0xff] }
 0x2bc   : > { %4217 = vst.msk [vmem:[%s7008_s19 + $0x4] sm:$0xf] %vm4215_vm3, %v4570_v26  ;;  %v4059_v47 = vmax.f32 %v4027_v16, 0.0  ;;  %v4030_v9 = vadd.f32 %v6986_v25, %v3991_v54  ;;  %v3989_v4 = vmul.f32 %v6975_v7, %v3950_v42  ;;  %v3955_v12 = vadd.f32 %v5089_v43, %v3629_v49  ;;  %v7085_v54 = vpop.f32.mrf.mxu0  ;;  %v7729_v43 = vld [vmem:[#allocation71_spill] sm:$0xff] }
 0x2bd   : > { %v4575_v31 = vpack.c.bf16 %v4061_v6, %v4061_v6  ;;  %v3850_v63 = vpop.f32.mrf.mxu1  ;;  %v3340_v49 = vadd.f32 %v7725_v58, %v3014_v0  ;;  %v3338_v26 = vadd.f32 %v7727_v29, %v3012_v32  ;;  %v7728_v6 = vld [vmem:[#allocation27_spill] sm:$0xff]  ;;  %v7734_v0 = vld [vmem:[#allocation69_spill] sm:$0xff]  ;;  %v3016_v32 = vadd.f32 %v7737_v3, %v7736_v44 }
 0x2be   : > { %v4573_v61 = vpack.c.bf16 %v4059_v47, %v4059_v47  ;;  %v4062_v11 = vmax.f32 %v4030_v9, 0.0  ;;  %v4028_v30 = vadd.f32 %v6986_v25, %v3989_v4  ;;  %v3994_v33 = vmul.f32 %v6975_v7, %v3955_v12  ;;  %v7730_v9 = vld [vmem:[#allocation21_spill] sm:$0xff]  ;;  %v7731_v4 = vld [vmem:[#allocation38_spill] sm:$0xff] }
 0x2bf   : > { %4222 = vst.msk [vmem:[%s7008_s19 + $0x18] sm:$0xf] %vm4215_vm3, %v4575_v31  ;;  %v3953_v46 = vadd.f32 %v3850_v63, %v3627_v48  ;;  %v5090_v27 = vpop.f32.mrf.mxu1  ;;  %v3015_v47 = vadd.f32 %v7729_v43, %v7728_v6  ;;  %v3018_v12 = vadd.f32 %v7731_v4, %v7730_v9  ;;  %v7732_v48 = vld [vmem:[#allocation98_spill] sm:$0xff]  ;;  %v3632_v22 = vadd.f32 %v7734_v0, %v3338_v26  ;;  %v7740_v58 = vld [vmem:[#allocation29_spill] sm:$0xff]  ;;  %v7743_v6 = vld [vmem:[#allocation100_spill] sm:$0xff] }
 0x2c0   : > { %4220 = vst.msk [vmem:[%s7008_s19 + $0x10] sm:$0xf] %vm4215_vm3, %v4573_v61  ;;  %v4576_v57 = vpack.c.bf16 %v4062_v11, %v4062_v11  ;;  %v4060_v38 = vmax.f32 %v4028_v30, 0.0  ;;  %v4033_v37 = vadd.f32 %v6986_v25, %v3994_v33  ;;  %v3956_v62 = vadd.f32 %v5090_v27, %v3630_v53  ;;  %v7733_v33 = vld [vmem:[#allocation92_spill] sm:$0xff]  ;;  %v7103_v27 = vpop.f32.mrf.mxu0  ;;  %v7744_v9 = vld [vmem:[#allocation7_spill] sm:$0xff]  ;;  %v7750_v44 = vld [vmem:[#allocation101_spill] sm:$0xff] }
 0x2c1   : > { %v3992_v13 = vmul.f32 %v6975_v7, %v3953_v46  ;;  %v3853_v51 = vpop.f32.mrf.mxu1  ;;  %v3343_v53 = vadd.f32 %v7732_v48, %v3017_v17  ;;  %v3634_v35 = vadd.f32 %v7733_v33, %v3340_v49  ;;  %v3344_v17 = vadd.f32 %v7738_v20, %v3018_v12  ;;  %v7748_v33 = vld [vmem:[#allocation37_spill] sm:$0xff] }
 0x2c2   : > { %4223 = vst.msk [vmem:[%s7008_s19 + $0x1c] sm:$0xf] %vm4215_vm3, %v4576_v57  ;;  %v4574_v56 = vpack.c.bf16 %v4060_v38, %v4060_v38  ;;  %v4065_v40 = vmax.f32 %v4033_v37, 0.0  ;;  %v3995_v52 = vmul.f32 %v6975_v7, %v3956_v62  ;;  %v3954_v5 = vadd.f32 %v3853_v51, %v3628_v45  ;;  %v7735_v45 = vld [vmem:[#allocation94_spill] sm:$0xff] }
 0x2c3   : > { %v4031_v16 = vadd.f32 %v6986_v25, %v3992_v13  ;;  %v5093_v23 = vpop.f32.mrf.mxu1  ;;  %v3341_v36 = vadd.f32 %v7735_v45, %v3015_v47  ;;  %v3637_v15 = vadd.f32 %v6966_v14, %v3343_v53  ;;  %v3342_v43 = vadd.f32 %v7743_v6, %v3016_v32 }
 0x2c4   : > { %4221 = vst.msk [vmem:[%s7008_s19 + $0x14] sm:$0xf] %vm4215_vm3, %v4574_v56  ;;  %v4579_v42 = vpack.c.bf16 %v4065_v40, %v4065_v40  ;;  %v4034_v8 = vadd.f32 %v6986_v25, %v3995_v52  ;;  %v3993_v39 = vmul.f32 %v6975_v7, %v3954_v5  ;;  %v3959_v59 = vadd.f32 %v5093_v23, %v3633_v2  ;;  %v7739_v5 = vld [vmem:[#allocation39_spill] sm:$0xff]  ;;  %v7122_v23 = vpop.f32.mrf.mxu0 }
 0x2c5   : > { %v4063_v28 = vmax.f32 %v4031_v16, 0.0  ;;  %v3866_v31 = vpop.f32.mrf.mxu1  ;;  %v3021_v49 = vadd.f32 %v7740_v58, %v7739_v5  ;;  %v3635_v29 = vadd.f32 %v6977_v55, %v3341_v36  ;;  %v3638_v47 = vadd.f32 %v6994_v24, %v3344_v17  ;;  %v7749_v24 = vld [vmem:[#allocation102_spill] sm:$0xff]  ;;  %v7753_v5 = vld [vmem:[#allocation16_spill] sm:$0xff] }
 0x2c6   : > { %4226 = vst.msk [vmem:[%s7008_s19 + $0x28] sm:$0xf] %vm4215_vm3, %v4579_v42  ;;  %v4066_v63 = vmax.f32 %v4034_v8, 0.0  ;;  %v4032_v61 = vadd.f32 %v6986_v25, %v3993_v39  ;;  %v3998_v11 = vmul.f32 %v6975_v7, %v3959_v59  ;;  %v3957_v30 = vadd.f32 %v3866_v31, %v3631_v1  ;;  %v7742_v1 = vld [vmem:[#allocation45_spill] sm:$0xff]  ;;  %v7140_v36 = vpop.f32.mrf.mxu0 }
 0x2c7   : > { %v4577_v19 = vpack.c.bf16 %v4063_v28, %v4063_v28  ;;  %v5094_v46 = vpop.f32.mrf.mxu1  ;;  %v3019_v14 = vadd.f32 %v7742_v1, %v7741_v41  ;;  %v3347_v4 = vadd.f32 %v7744_v9, %v3021_v49 }
 0x2c8   : > { %v4580_v57 = vpack.c.bf16 %v4066_v63, %v4066_v63  ;;  %v4064_v38 = vmax.f32 %v4032_v61, 0.0  ;;  %v4037_v37 = vadd.f32 %v6986_v25, %v3998_v11  ;;  %v3996_v62 = vmul.f32 %v6975_v7, %v3957_v30  ;;  %v7745_v63 = vld [vmem:[#allocation35_spill] sm:$0xff]  ;;  %v7746_v61 = vld [vmem:[#allocation72_spill] sm:$0xff]  ;;  %v7747_v30 = vld [vmem:[#allocation73_spill] sm:$0xff]  ;;  %v3591_v49 = vpop.f32.mrf.mxu0 }
 0x2c9   : > { %4224 = vst.msk [vmem:[%s7008_s19 + $0x20] sm:$0xf] %vm4215_vm3, %v4577_v19  ;;  %v3960_v2 = vadd.f32 %v5094_v46, %v3634_v35  ;;  %v3869_v13 = vpop.f32.mrf.mxu1  ;;  %v3022_v11 = vadd.f32 %v7746_v61, %v7745_v63  ;;  %v3020_v35 = vadd.f32 %v7748_v33, %v7747_v30  ;;  %v3345_v0 = vadd.f32 %v7749_v24, %v3019_v14  ;;  %v7760_v24 = vld [vmem:[#allocation59_spill] sm:$0xff] }
 0x2ca   : > { %4227 = vst.msk [vmem:[%s7008_s19 + $0x2c] sm:$0xf] %vm4215_vm3, %v4580_v57  ;;  %v4578_v51 = vpack.c.bf16 %v4064_v38, %v4064_v38  ;;  %v4069_v56 = vmax.f32 %v4037_v37, 0.0  ;;  %v4035_v40 = vadd.f32 %v6986_v25, %v3996_v62  ;;  %v3958_v52 = vadd.f32 %v3869_v13, %v3632_v22  ;;  %v5075_v61 = vpop.f32.mrf.mxu0 }
 0x2cb   : > { %v3999_v26 = vmul.f32 %v6975_v7, %v3960_v2  ;;  %v5097_v16 = vpop.f32.mrf.mxu1  ;;  %v3636_v37 = vadd.f32 %v7015_v10, %v3342_v43  ;;  %v3641_v62 = vadd.f32 %v7032_v50, %v3347_v4  ;;  %v3348_v3 = vadd.f32 %v7750_v44, %v3022_v11 }
 0x2cc   : > { %4225 = vst.msk [vmem:[%s7008_s19 + $0x24] sm:$0xf] %vm4215_vm3, %v4578_v51  ;;  %v4583_v42 = vpack.c.bf16 %v4069_v56, %v4069_v56  ;;  %v4067_v8 = vmax.f32 %v4035_v40, 0.0  ;;  %v3997_v39 = vmul.f32 %v6975_v7, %v3958_v52  ;;  %v3963_v59 = vadd.f32 %v5097_v16, %v3637_v15  ;;  %v7751_v51 = vld [vmem:[#allocation46_spill] sm:$0xff]  ;;  %v7752_v56 = vld [vmem:[#allocation36_spill] sm:$0xff] }
 0x2cd   : > { %v4038_v55 = vadd.f32 %v6986_v25, %v3999_v26  ;;  %v3882_v12 = vpop.f32.mrf.mxu1  ;;  %v3025_v40 = vadd.f32 %v7752_v56, %v7751_v51  ;;  %v3639_v52 = vadd.f32 %v7050_v21, %v3345_v0  ;;  %v3346_v10 = vadd.f32 %v7753_v5, %v3020_v35  ;;  %v7754_v26 = vld [vmem:[#allocation79_spill] sm:$0xff]  ;;  %v7755_v16 = vld [vmem:[#allocation58_spill] sm:$0xff]  ;;  %v7761_v0 = vld [vmem:[#allocation88_spill] sm:$0xff]  ;;  %v3604_v56 = vpop.f32.mrf.mxu0 }
 0x2ce   : > { %4230 = vst.msk [vmem:[%s7008_s19 + $0x38] sm:$0xf] %vm4215_vm3, %v4583_v42  ;;  %v4581_v48 = vpack.c.bf16 %v4067_v8, %v4067_v8  ;;  %v4036_v53 = vadd.f32 %v6986_v25, %v3997_v39  ;;  %v4002_v28 = vmul.f32 %v6975_v7, %v3963_v59  ;;  %v3961_v31 = vadd.f32 %v3882_v12, %v3635_v29  ;;  %v7756_v8 = vld [vmem:[#allocation42_spill] sm:$0xff]  ;;  %v7757_v21 = vld [vmem:[#allocation83_spill] sm:$0xff] }
 0x2cf   : > { %v4070_v22 = vmax.f32 %v4038_v55, 0.0  ;;  %v5098_v45 = vpop.f32.mrf.mxu1  ;;  %v3023_v42 = vadd.f32 %v7755_v16, %v7754_v26  ;;  %v3026_v39 = vadd.f32 %v7757_v21, %v7756_v8  ;;  %v3642_v59 = vadd.f32 %v7067_v18, %v3348_v3  ;;  %v7758_v12 = vld [vmem:[#allocation15_spill] sm:$0xff] }
 0x2d0   : > { %4228 = vst.msk [vmem:[%s7008_s19 + $0x30] sm:$0xf] %vm4215_vm3, %v4581_v48  ;;  %v4068_v19 = vmax.f32 %v4036_v53, 0.0  ;;  %v4041_v46 = vadd.f32 %v6986_v25, %v4002_v28  ;;  %v4000_v57 = vmul.f32 %v6975_v7, %v3961_v31  ;;  %v3964_v38 = vadd.f32 %v5098_v45, %v3638_v47  ;;  %v7759_v28 = vld [vmem:[#allocation62_spill] sm:$0xff]  ;;  %v7762_v45 = vld [vmem:[#allocation44_spill] sm:$0xff]  ;;  %v7769_v21 = vld [vmem:[#allocation43_spill] sm:$0xff] }
 0x2d1   : > { %v4584_v32 = vpack.c.bf16 %v4070_v22, %v4070_v22  ;;  %v3885_v15 = vpop.f32.mrf.mxu1  ;;  %v3351_v48 = vadd.f32 %v7758_v12, %v3025_v40  ;;  %v3640_v53 = vadd.f32 %v7085_v54, %v3346_v10  ;;  %v3349_v31 = vadd.f32 %v7759_v28, %v3023_v42 }
 0x2d2   : > { %v4582_v20 = vpack.c.bf16 %v4068_v19, %v4068_v19  ;;  %v4073_v17 = vmax.f32 %v4041_v46, 0.0  ;;  %v4039_v2 = vadd.f32 %v6986_v25, %v4000_v57  ;;  %v4003_v13 = vmul.f32 %v6975_v7, %v3964_v38  ;;  %v7763_v19 = vld [vmem:[#allocation82_spill] sm:$0xff]  ;;  %v7764_v46 = vld [vmem:[#allocation93_spill] sm:$0xff] }
 0x2d3   : > { %4231 = vst.msk [vmem:[%s7008_s19 + $0x3c] sm:$0xf] %vm4215_vm3, %v4584_v32  ;;  %v3962_v50 = vadd.f32 %v3885_v15, %v3636_v37  ;;  %v5101_v58 = vpop.f32.mrf.mxu1  ;;  %v3024_v22 = vadd.f32 %v7761_v0, %v7760_v24  ;;  %v3029_v54 = vadd.f32 %v7763_v19, %v7762_v45  ;;  %v3352_v57 = vadd.f32 %v7764_v46, %v3026_v39  ;;  %v7770_v39 = vld [vmem:[#allocation89_spill] sm:$0xff] }
 0x2d4   : > { %4229 = vst.msk [vmem:[%s7008_s19 + $0x34] sm:$0xf] %vm4215_vm3, %v4582_v20  ;;  %v4587_v41 = vpack.c.bf16 %v4073_v17, %v4073_v17  ;;  %v4071_v1 = vmax.f32 %v4039_v2, 0.0  ;;  %v4042_v14 = vadd.f32 %v6986_v25, %v4003_v13  ;;  %v3967_v29 = vadd.f32 %v5101_v58, %v3641_v62  ;;  %v7765_v17 = vld [vmem:[#allocation23_spill] sm:$0xff]  ;;  %v7767_v58 = vld [vmem:[#allocation86_spill] sm:$0xff] }
 0x2d5   : > { %v4001_v6 = vmul.f32 %v6975_v7, %v3962_v50  ;;  %v3898_v43 = vpop.f32.mrf.mxu1  ;;  %v3645_v15 = vadd.f32 %v7103_v27, %v3351_v48  ;;  %v3643_v20 = vadd.f32 %v7122_v23, %v3349_v31  ;;  %v3350_v2 = vadd.f32 %v7765_v17, %v3024_v22  ;;  %v7766_v50 = vld [vmem:[#allocation49_spill] sm:$0xff]  ;;  %v7768_v27 = vld [vmem:[#allocation63_spill] sm:$0xff]  ;;  %v7773_v31 = vld [vmem:[#allocation96_spill] sm:$0xff] }
 0x2d6   : > { %4234 = vst.msk [vmem:[%s7008_s19 + $0x48] sm:$0xf] %vm4215_vm3, %v4587_v41  ;;  %v4585_v47 = vpack.c.bf16 %v4071_v1, %v4071_v1  ;;  %v4074_v9 = vmax.f32 %v4042_v14, 0.0  ;;  %v4006_v4 = vmul.f32 %v6975_v7, %v3967_v29  ;;  %v3965_v55 = vadd.f32 %v3898_v43, %v3639_v52  ;;  %v7772_v43 = vld [vmem:[#allocation55_spill] sm:$0xff] }
 0x2d7   : > { %v4040_v63 = vadd.f32 %v6986_v25, %v4001_v6  ;;  %v5102_v18 = vpop.f32.mrf.mxu1  ;;  %v3027_v41 = vadd.f32 %v7767_v58, %v7766_v50  ;;  %v3646_v1 = vadd.f32 %v7140_v36, %v3352_v57  ;;  %v3355_v14 = vadd.f32 %v7768_v27, %v3029_v54  ;;  %v7771_v6 = vld [vmem:[#allocation50_spill] sm:$0xff] }
 0x2d8   : > { %4232 = vst.msk [vmem:[%s7008_s19 + $0x40] sm:$0xf] %vm4215_vm3, %v4585_v47  ;;  %v4588_v11 = vpack.c.bf16 %v4074_v9, %v4074_v9  ;;  %v4045_v30 = vadd.f32 %v6986_v25, %v4006_v4  ;;  %v4004_v33 = vmul.f32 %v6975_v7, %v3965_v55  ;;  %v3968_v35 = vadd.f32 %v5102_v18, %v3642_v59  ;;  %v5076_v55 = vpop.f32.mrf.mxu0 }
 0x2d9   : > { %v4072_v38 = vmax.f32 %v4040_v63, 0.0  ;;  %v3901_v37 = vpop.f32.mrf.mxu1  ;;  %v3030_v59 = vadd.f32 %v7770_v39, %v7769_v21  ;;  %v3028_v36 = vadd.f32 %v7772_v43, %v7771_v6  ;;  %v3644_v47 = vadd.f32 %v3591_v49, %v3350_v2 }
 0x2da   : > { %4235 = vst.msk [vmem:[%s7008_s19 + $0x4c] sm:$0xf] %vm4215_vm3, %v4588_v11  ;;  %v4077_v62 = vmax.f32 %v4045_v30, 0.0  ;;  %v4043_v44 = vadd.f32 %v6986_v25, %v4004_v33  ;;  %v4007_v3 = vmul.f32 %v6975_v7, %v3968_v35  ;;  %v3966_v32 = vadd.f32 %v3901_v37, %v3640_v53  ;;  %v3607_v54 = vpop.f32.mrf.mxu0 }
 0x2db   : > { %v4586_v13 = vpack.c.bf16 %v4072_v38, %v4072_v38  ;;  %v5105_v51 = vpop.f32.mrf.mxu1  ;;  %v3353_v63 = vadd.f32 %v7773_v31, %v3027_v41  ;;  %v3649_v18 = vadd.f32 %v5075_v61, %v3355_v14  ;;  %v3356_v11 = vadd.f32 %v6962_v60, %v3030_v59 }
 0x2dc   : > { %v4591_v40 = vpack.c.bf16 %v4077_v62, %v4077_v62  ;;  %v4075_v52 = vmax.f32 %v4043_v44, 0.0  ;;  %v4046_v5 = vadd.f32 %v6986_v25, %v4007_v3  ;;  %v4005_v10 = vmul.f32 %v6975_v7, %v3966_v32 }
 0x2dd   : > { %4233 = vst.msk [vmem:[%s7008_s19 + $0x44] sm:$0xf] %vm4215_vm3, %v4586_v13  ;;  %v3971_v23 = vadd.f32 %v5105_v51, %v3645_v15  ;;  %v3914_v29 = vpop.f32.mrf.mxu1  ;;  %v3354_v22 = vadd.f32 %v6968_v34, %v3028_v36  ;;  %v3647_v38 = vadd.f32 %v3604_v56, %v3353_v63  ;;  %v3650_v37 = vadd.f32 %v5076_v55, %v3356_v11 }
 0x2de   : > { %4238 = vst.msk [vmem:[%s7008_s19 + $0x58] sm:$0xf] %vm4215_vm3, %v4591_v40  ;;  %v4589_v26 = vpack.c.bf16 %v4075_v52, %v4075_v52  ;;  %v4078_v16 = vmax.f32 %v4046_v5, 0.0  ;;  %v4044_v42 = vadd.f32 %v6986_v25, %v4005_v10  ;;  %v3969_v8 = vadd.f32 %v3914_v29, %v3643_v20 }
 0x2df   : > { %v4010_v9 = vmul.f32 %v6975_v7, %v3971_v23  ;;  %v5106_v4 = vpop.f32.mrf.mxu1  ;;  %v3648_v20 = vadd.f32 %v3607_v54, %v3354_v22 }
 0x2e0   : > { %4236 = vst.msk [vmem:[%s7008_s19 + $0x50] sm:$0xf] %vm4215_vm3, %v4589_v26  ;;  %v4592_v12 = vpack.c.bf16 %v4078_v16, %v4078_v16  ;;  %v4076_v48 = vmax.f32 %v4044_v42, 0.0  ;;  %v4008_v53 = vmul.f32 %v6975_v7, %v3969_v8  ;;  %v3972_v28 = vadd.f32 %v5106_v4, %v3646_v1 }
 0x2e1   : > { %v4049_v30 = vadd.f32 %v6986_v25, %v4010_v9  ;;  %v3917_v49 = vpop.f32.mrf.mxu1 }
 0x2e2   : > { %4239 = vst.msk [vmem:[%s7008_s19 + $0x5c] sm:$0xf] %vm4215_vm3, %v4592_v12  ;;  %v4590_v33 = vpack.c.bf16 %v4076_v48, %v4076_v48  ;;  %v4047_v35 = vadd.f32 %v6986_v25, %v4008_v53  ;;  %v4011_v24 = vmul.f32 %v6975_v7, %v3972_v28  ;;  %v3970_v0 = vadd.f32 %v3917_v49, %v3644_v47 }
 0x2e3   : > { %v4081_v45 = vmax.f32 %v4049_v30, 0.0  ;;  %v5109_v19 = vpop.f32.mrf.mxu1 }
 0x2e4   : > { %4237 = vst.msk [vmem:[%s7008_s19 + $0x54] sm:$0xf] %vm4215_vm3, %v4590_v33  ;;  %v4079_v60 = vmax.f32 %v4047_v35, 0.0  ;;  %v4050_v61 = vadd.f32 %v6986_v25, %v4011_v24  ;;  %v4009_v46 = vmul.f32 %v6975_v7, %v3970_v0  ;;  %v3975_v57 = vadd.f32 %v5109_v19, %v3649_v18 }
 0x2e5   : > { %v4595_v62 = vpack.c.bf16 %v4081_v45, %v4081_v45  ;;  %v3930_v44 = vpop.f32.mrf.mxu1 }
 0x2e6   : > { %v4593_v3 = vpack.c.bf16 %v4079_v60, %v4079_v60  ;;  %v4082_v34 = vmax.f32 %v4050_v61, 0.0  ;;  %v4048_v32 = vadd.f32 %v6986_v25, %v4009_v46  ;;  %v4014_v15 = vmul.f32 %v6975_v7, %v3975_v57 }
 0x2e7   : > { %4242 = vst.msk [vmem:[%s7008_s19 + $0x68] sm:$0xf] %vm4215_vm3, %v4595_v62  ;;  %v3973_v17 = vadd.f32 %v3930_v44, %v3647_v38  ;;  %v5110_v2 = vpop.f32.mrf.mxu1 }
 0x2e8   : > { %4240 = vst.msk [vmem:[%s7008_s19 + $0x60] sm:$0xf] %vm4215_vm3, %v4593_v3  ;;  %v4596_v13 = vpack.c.bf16 %v4082_v34, %v4082_v34  ;;  %v4080_v51 = vmax.f32 %v4048_v32, 0.0  ;;  %v4053_v56 = vadd.f32 %v6986_v25, %v4014_v15  ;;  %v3976_v40 = vadd.f32 %v5110_v2, %v3650_v37 }
 0x2e9   : > { %v4012_v52 = vmul.f32 %v6975_v7, %v3973_v17  ;;  %v3933_v5 = vpop.f32.mrf.mxu1 }
 0x2ea   : > { %4243 = vst.msk [vmem:[%s7008_s19 + $0x6c] sm:$0xf] %vm4215_vm3, %v4596_v13  ;;  %v4594_v10 = vpack.c.bf16 %v4080_v51, %v4080_v51  ;;  %v4085_v50 = vmax.f32 %v4053_v56, 0.0  ;;  %v4015_v58 = vmul.f32 %v6975_v7, %v3976_v40  ;;  %v3974_v41 = vadd.f32 %v3933_v5, %v3648_v20 }
 0x2eb   : > { %v4051_v1 = vadd.f32 %v6986_v25, %v4012_v52 }
 0x2ec   : > { %4241 = vst.msk [vmem:[%s7008_s19 + $0x64] sm:$0xf] %vm4215_vm3, %v4594_v10  ;;  %v4599_v27 = vpack.c.bf16 %v4085_v50, %v4085_v50  ;;  %v4054_v14 = vadd.f32 %v6986_v25, %v4015_v58  ;;  %v4013_v23 = vmul.f32 %v6975_v7, %v3974_v41 }
 0x2ed   : > { %v4083_v29 = vmax.f32 %v4051_v1, 0.0 }
 0x2ee   : > { %4246 = vst.msk [vmem:[%s7008_s19 + $0x78] sm:$0xf] %vm4215_vm3, %v4599_v27  ;;  %v4086_v26 = vmax.f32 %v4054_v14, 0.0  ;;  %v4052_v16 = vadd.f32 %v6986_v25, %v4013_v23 }
 0x2ef   : > { %v4597_v42 = vpack.c.bf16 %v4083_v29, %v4083_v29 }
 0x2f0   : > { %v4600_v8 = vpack.c.bf16 %v4086_v26, %v4086_v26  ;;  %v4084_v21 = vmax.f32 %v4052_v16, 0.0 }
 0x2f1   : > { %4244 = vst.msk [vmem:[%s7008_s19 + $0x70] sm:$0xf] %vm4215_vm3, %v4597_v42 }
 0x2f2   : > { %4247 = vst.msk [vmem:[%s7008_s19 + $0x7c] sm:$0xf] %vm4215_vm3, %v4600_v8  ;;  %v4598_v39 = vpack.c.bf16 %v4084_v21, %v4084_v21 }
 0x2f4   : > { %4245 = vst.msk [vmem:[%s7008_s19 + $0x74] sm:$0xf] %vm4215_vm3, %v4598_v39 }
 0x2f5 PF: > { %s18_s27 = sadd.s32 1, %s5155_s27  }
 0x2f6   : > { %p15_p4 = scmp.ge.s32.totalorder %s18_s27, 4  }
 0x2f8   :  { %17 = sbr.rel (!%p15_p4) target bundleno = 1 (0x1), region = 91 }

</bundles_post_ra>
